<compile_context>
chip_gen: v5e
topology: v5e:2x2
jax: 0.10.0
libtpu: 0.0.40
codegen_flags: <defaults>
</compile_context>

<pallas_src>
import functools

import jax
import jax.numpy as jnp
from jax.experimental import pallas as pl
from jax.experimental.pallas import tpu as pltpu

_LANE = 128
_SUBLANE = 8
_CHUNK = 128  # rows per in-kernel sub-chunk (full MXU M dim, ~16 f32 vregs)


def _round_up(n, m):
    return ((n + m - 1) // m) * m


def _softplus(x):
    # Matches torch.nn.functional.softplus(beta=1, threshold=20): returns x
    # for x > 20, else log1p(exp(x)).  The discarded branch may overflow to
    # +inf for very large x, which is benign (log1p(inf)=inf, never selected).
    # TODO(synk): on v6e/v7x, if profiling shows the EUP as the critical slot,
    # compute exp/log1p in bf16 (EUP bf16 ~2x rate) and cast back to f32 for
    # the residual add; do NOT do this on v5e (no bf16 EUP/VPU).
    return jnp.where(x > 20.0, x, jnp.log1p(jnp.exp(x)))


def ritznet_kernel(x_ref, w_ref, b_ref, wout_ref, bout_ref, o_ref, *, depth, chunk):
    # x_ref:    (tile_b, width_p)          VMEM f32
    # w_ref:    (depth, width_p, width_p)  VMEM bf16 (pre-transposed: in x out)
    # b_ref:    (depth, width_p)           VMEM f32
    # wout_ref: (width_p, dd_p)            VMEM bf16
    # bout_ref: (1, dd_p)                  VMEM f32
    # o_ref:    (tile_b, dd_p)             VMEM f32
    n_chunks = x_ref.shape[0] // chunk

    # Sub-chunk loop (scf.for) bounds the live range of x/h to one chunk.
    @pl.loop(0, n_chunks)
    def _(c):
        row = pl.multiple_of(c * chunk, chunk)
        x = x_ref[pl.ds(row, chunk), :]                      # f32 (chunk, width_p)
        # Static unroll over depth: neutral at small depth (<= ~8).
        # TODO(synk): for large depth*width^2 (v7x's 64 MiB VMEM), stream the
        # weight stack over an "arbitrary" depth grid axis with x carried in a
        # VMEM scratch accumulator instead of holding it all resident.
        for d in range(depth):
            h = jnp.dot(x.astype(jnp.bfloat16), w_ref[d],    # bf16 MXU, f32 acc
                        preferred_element_type=jnp.float32)
            h = h + b_ref[pl.ds(d, 1), :]                    # (1, width_p) 2D slice
            x = _softplus(h) + x                             # f32 VPU/EUP
        out = jnp.dot(x.astype(jnp.bfloat16), wout_ref[...],
                      preferred_element_type=jnp.float32)
        out = out + bout_ref[...]
        o_ref[pl.ds(row, chunk), :] = out.astype(o_ref.dtype)


def _pad2(a, rows, cols):
    return jnp.pad(a, ((0, rows - a.shape[0]), (0, cols - a.shape[1])))


def _vmem_capacity_bytes():
    try:
        return int(pltpu.get_tpu_info().vmem_capacity_bytes)
    except Exception:
        return 64 << 20  # conservative: v7x per-TensorCore VMEM


def ritznet_forward(x, w_stack, b_stack, w_out, b_out, *, tile_b=512):
    """RitzNet forward; x: (batch, width) -> (batch, dd)."""
    batch, width = x.shape
    depth = w_stack.shape[0]
    dd = w_out.shape[1]

    # ---- lane/sublane-dense padded shapes -----------------------------------
    width_p = _round_up(max(width, _LANE), _LANE)
    dd_p = _round_up(max(dd, _LANE), _LANE)

    # Batch tiling: big tiles amortize ~0.35us per-grid-step overhead; the
    # in-kernel chunk loop keeps vreg pressure at one 128-row chunk.
    tile_b = max(_CHUNK, _round_up(min(tile_b, batch), _CHUNK))
    if batch >= 2 * _CHUNK:
        # v7x: keep >= 2 grid steps so the "parallel" axis feeds both TCs.
        tile_b = min(tile_b, _round_up(-(-batch // 2), _CHUNK))
    batch_p = _round_up(batch, tile_b)

    # Zero-padded weight ROWS mean padded input lanes never contaminate real
    # output columns (bf16 cast of 0.0 is exactly 0.0), so results are exact
    # w.r.t. the padding; the wrapper slices the padding back off.
    xp = jnp.pad(x.astype(jnp.float32),
                 ((0, batch_p - batch), (0, width_p - width)))
    wp = jnp.pad(w_stack, ((0, 0), (0, width_p - width), (0, width_p - width))
                 ).astype(jnp.bfloat16)                       # bf16 MXU inputs
    bp = jnp.pad(b_stack, ((0, 0), (0, width_p - width))).astype(jnp.float32)
    woutp = _pad2(w_out, width_p, dd_p).astype(jnp.bfloat16)
    boutp = _pad2(b_out, 1, dd_p).astype(jnp.float32)

    # ---- footprint / cost bookkeeping ---------------------------------------
    weight_bytes = ((depth * width_p * width_p + width_p * dd_p) * 2   # bf16
                    + (depth * width_p + dd_p) * 4)                    # f32 biases
    io_bytes = tile_b * (width_p + dd_p) * 4                           # one IO tile
    vmem_cap = _vmem_capacity_bytes()

    flops = 2 * batch_p * depth * width_p * width_p + 2 * batch_p * width_p * dd_p
    transcendentals = 2 * batch_p * depth * width_p          # exp + log1p / elem / layer
    bytes_accessed = (batch_p * width_p + batch_p * dd_p) * 4 + weight_bytes
    cost = pl.CostEstimate(flops=flops, transcendentals=transcendentals,
                           bytes_accessed=bytes_accessed)

    grid = (batch_p // tile_b,)
    kernel = functools.partial(ritznet_kernel, depth=depth, chunk=_CHUNK)

    def run(single_buffer_weights):
        wkw = {}
        if single_buffer_weights:
            # Constant-index weight/bias blocks do not need the default 2-deep
            # pipeline buffers; halves resident weight VMEM (matters on v7x).
            wkw = dict(pipeline_mode=pl.Buffered(1))
        wbuf = 1 if single_buffer_weights else 2
        # IO blocks are double-buffered by the pipeline; add compiler headroom,
        # cap at ~75% of this generation's VMEM.
        vmem_limit = int(min(max(wbuf * weight_bytes + 2 * io_bytes + (8 << 20),
                                 16 << 20),
                             (vmem_cap * 3) // 4))
        call = pl.pallas_call(
            kernel,
            out_shape=jax.ShapeDtypeStruct((batch_p, dd_p), jnp.float32),
            grid=grid,
            in_specs=[
                pl.BlockSpec((tile_b, width_p), lambda i: (i, 0)),
                pl.BlockSpec((depth, width_p, width_p), lambda i: (0, 0, 0), **wkw),
                pl.BlockSpec((depth, width_p), lambda i: (0, 0), **wkw),
                pl.BlockSpec((width_p, dd_p), lambda i: (0, 0), **wkw),
                pl.BlockSpec((1, dd_p), lambda i: (0, 0), **wkw),
            ],
            out_specs=pl.BlockSpec((tile_b, dd_p), lambda i: (i, 0)),
            compiler_params=pltpu.CompilerParams(
                dimension_semantics=("parallel",),
                vmem_limit_bytes=vmem_limit,
            ),
            cost_estimate=cost,
        )
        return jax.block_until_ready(call(xp, wp, bp, woutp, boutp))

    if hasattr(pl, "Buffered"):
        try:
            out_p = run(True)
        except Exception:
            # pipeline_mode / Buffered(1) not supported by this jax build:
            # fall back to default double-buffered weight blocks.
            out_p = run(False)
    else:
        out_p = run(False)

    # TODO(synk): for dd==1 at very large batch, emit a compact lane-dense
    # (batch_p//128, 128) output slab (one XLU transpose per chunk) instead of
    # a 128x zero-padded column to cut output HBM footprint/DMA by 128x.
    return out_p[:batch, :dd]


def init_params(key, depth, width, dd):
    # Deterministic init mimicking nn.Linear default (uniform +-1/sqrt(fan_in)).
    keys = jax.random.split(key, 4)
    bound = 1.0 / jnp.sqrt(width)
    # hidden weights stored pre-transposed: (depth, in, out)
    w_stack = jax.random.uniform(
        keys[0], (depth, width, width), jnp.float32, -bound, bound)
    b_stack = jax.random.uniform(
        keys[1], (depth, width), jnp.float32, -bound, bound)
    w_out = jax.random.uniform(keys[2], (width, dd), jnp.float32, -bound, bound)
    b_out = jax.random.uniform(keys[3], (1, dd), jnp.float32, -bound, bound)
    return w_stack, b_stack, w_out, b_out


def ritznet_reference(x, w_stack, b_stack, w_out, b_out):
    # Pure-f32 pure-JAX reference (module semantics).
    for d in range(w_stack.shape[0]):
        x = _softplus(x @ w_stack[d] + b_stack[d]) + x
    return x @ w_out + b_out


def ritznet_reference_mixed(x, w_stack, b_stack, w_out, b_out):
    # Same numerics as the kernel: bf16 MXU inputs, f32 accumulation/elementwise.
    wb = w_stack.astype(jnp.bfloat16)
    wob = w_out.astype(jnp.bfloat16)
    for d in range(w_stack.shape[0]):
        h = jnp.dot(x.astype(jnp.bfloat16), wb[d],
                    preferred_element_type=jnp.float32) + b_stack[d]
        x = _softplus(h) + x
    return jnp.dot(x.astype(jnp.bfloat16), wob,
                   preferred_element_type=jnp.float32) + b_out


if __name__ == "__main__":
    depth, width, dd = 4, 32, 1
    batch = 512  # 2 grid tiles (both v7x TCs) x 2 in-kernel 128-row chunks

    key = jax.random.PRNGKey(0)
    kx, kp = jax.random.split(key)
    x = jax.random.normal(kx, (batch, width), dtype=jnp.float32)
    w_stack, b_stack, w_out, b_out = init_params(kp, depth, width, dd)

    out = ritznet_forward(x, w_stack, b_stack, w_out, b_out)
    out = jax.block_until_ready(out)
    assert out.shape == (batch, dd)

    # Tight check vs a reference with identical mixed precision (bf16 MXU
    # inputs, f32 accumulation), loose check vs the pure-f32 module semantics.
    ref_mixed = ritznet_reference_mixed(x, w_stack, b_stack, w_out, b_out)
    ref_f32 = ritznet_reference(x, w_stack, b_stack, w_out, b_out)
    assert jnp.allclose(out, ref_mixed, atol=1e-3, rtol=1e-3), "mismatch vs bf16-MXU reference"
    assert jnp.allclose(out, ref_f32, atol=5e-2, rtol=5e-2), "mismatch vs f32 reference"

    print("KERNEL_OK")
</pallas_src>

<mosaic_0001>
module attributes {stable_mosaic.version = 11 : i64} {
  func.func @ritznet_kernel(%arg0: i32, %arg1: memref<256x128xf32, #tpu.memory_space<vmem>>, %arg2: memref<4x128x128xbf16, #tpu.memory_space<vmem>>, %arg3: memref<4x128xf32, #tpu.memory_space<vmem>>, %arg4: memref<128x128xbf16, #tpu.memory_space<vmem>>, %arg5: memref<1x128xf32, #tpu.memory_space<vmem>>, %arg6: memref<256x128xf32, #tpu.memory_space<vmem>>) attributes {dimension_semantics = [#tpu.dimension_semantics<parallel>], iteration_bounds = array<i64: 2>, scalar_prefetch = 0 : i64, scratch_operands = 0 : i64, tpu.core_type = #tpu.core_type<tc>, window_params = [{transform_indices = @transform_0, window_bounds = array<i64: 256, 128>}, {pipeline_mode = #tpu.pipeline_mode<synchronous>, transform_indices = @transform_1, window_bounds = array<i64: 4, 128, 128>}, {pipeline_mode = #tpu.pipeline_mode<synchronous>, transform_indices = @transform_2, window_bounds = array<i64: 4, 128>}, {pipeline_mode = #tpu.pipeline_mode<synchronous>, transform_indices = @transform_3, window_bounds = array<i64: 128, 128>}, {pipeline_mode = #tpu.pipeline_mode<synchronous>, transform_indices = @transform_4, window_bounds = array<i64: 1, 128>}, {transform_indices = @transform_5, window_bounds = array<i64: 256, 128>}]} {
    %c0_i32 = arith.constant 0 : i32
    %c2_i32 = arith.constant 2 : i32
    %0 = arith.addi %c0_i32, %c2_i32 : i32
    %c1_i32 = arith.constant 1 : i32
    scf.for %arg7 = %c0_i32 to %0 step %c1_i32  : i32 {
      %c1_i32_1 = arith.constant 1 : i32
      %1 = arith.muli %arg7, %c1_i32_1 : i32
      %c0_i32_2 = arith.constant 0 : i32
      %2 = arith.addi %c0_i32_2, %1 : i32
      %c128_i32 = arith.constant 128 : i32
      %3 = arith.muli %2, %c128_i32 : i32
      %4 = tpu.assume_multiple %3, 128 : i32
      %5 = arith.index_cast %4 : i32 to index
      %c0 = arith.constant 0 : index
      %6 = vector.load %arg1[%5, %c0] : memref<256x128xf32, #tpu.memory_space<vmem>>, vector<128x128xf32>
      %7 = arith.truncf %6 : vector<128x128xf32> to vector<128x128xbf16>
      %c0_3 = arith.constant 0 : index
      %c0_4 = arith.constant 0 : index
      %c0_5 = arith.constant 0 : index
      %8 = vector.load %arg2[%c0_3, %c0_4, %c0_5] : memref<4x128x128xbf16, #tpu.memory_space<vmem>>, vector<1x128x128xbf16>
      %9 = vector.shape_cast %8 : vector<1x128x128xbf16> to vector<128x128xbf16>
      %cst = arith.constant dense<0.000000e+00> : vector<128x128xf32>
      %10 = tpu.matmul %7, %9, %cst {dimension_numbers = #tpu.dot_dimension_numbers<[1], [0], [0], [1], [0, 0, 1, 1], [], []>} : vector<128x128xbf16>, vector<128x128xbf16>, vector<128x128xf32> -> vector<128x128xf32>
      %c0_6 = arith.constant 0 : index
      %c0_7 = arith.constant 0 : index
      %11 = vector.load %arg3[%c0_6, %c0_7] : memref<4x128xf32, #tpu.memory_space<vmem>>, vector<1x128xf32>
      %12 = vector.broadcast %11 : vector<1x128xf32> to vector<128x128xf32>
      %13 = arith.addf %10, %12 : vector<128x128xf32>
      %cst_8 = arith.constant 2.000000e+01 : f32
      %14 = vector.broadcast %cst_8 : f32 to vector<128x128xf32>
      %15 = arith.cmpf ogt, %13, %14 : vector<128x128xf32>
      %16 = math.exp %13 : vector<128x128xf32>
      %17 = math.log1p %16 : vector<128x128xf32>
      %18 = arith.select %15, %13, %17 : vector<128x128xi1>, vector<128x128xf32>
      %19 = arith.addf %18, %6 : vector<128x128xf32>
      %20 = arith.truncf %19 : vector<128x128xf32> to vector<128x128xbf16>
      %c1 = arith.constant 1 : index
      %c0_9 = arith.constant 0 : index
      %c0_10 = arith.constant 0 : index
      %21 = vector.load %arg2[%c1, %c0_9, %c0_10] : memref<4x128x128xbf16, #tpu.memory_space<vmem>>, vector<1x128x128xbf16>
      %22 = vector.shape_cast %21 : vector<1x128x128xbf16> to vector<128x128xbf16>
      %cst_11 = arith.constant dense<0.000000e+00> : vector<128x128xf32>
      %23 = tpu.matmul %20, %22, %cst_11 {dimension_numbers = #tpu.dot_dimension_numbers<[1], [0], [0], [1], [0, 0, 1, 1], [], []>} : vector<128x128xbf16>, vector<128x128xbf16>, vector<128x128xf32> -> vector<128x128xf32>
      %c1_12 = arith.constant 1 : index
      %c0_13 = arith.constant 0 : index
      %24 = vector.load %arg3[%c1_12, %c0_13] : memref<4x128xf32, #tpu.memory_space<vmem>>, vector<1x128xf32>
      %25 = vector.broadcast %24 : vector<1x128xf32> to vector<128x128xf32>
      %26 = arith.addf %23, %25 : vector<128x128xf32>
      %cst_14 = arith.constant 2.000000e+01 : f32
      %27 = vector.broadcast %cst_14 : f32 to vector<128x128xf32>
      %28 = arith.cmpf ogt, %26, %27 : vector<128x128xf32>
      %29 = math.exp %26 : vector<128x128xf32>
      %30 = math.log1p %29 : vector<128x128xf32>
      %31 = arith.select %28, %26, %30 : vector<128x128xi1>, vector<128x128xf32>
      %32 = arith.addf %31, %19 : vector<128x128xf32>
      %33 = arith.truncf %32 : vector<128x128xf32> to vector<128x128xbf16>
      %c2 = arith.constant 2 : index
      %c0_15 = arith.constant 0 : index
      %c0_16 = arith.constant 0 : index
      %34 = vector.load %arg2[%c2, %c0_15, %c0_16] : memref<4x128x128xbf16, #tpu.memory_space<vmem>>, vector<1x128x128xbf16>
      %35 = vector.shape_cast %34 : vector<1x128x128xbf16> to vector<128x128xbf16>
      %cst_17 = arith.constant dense<0.000000e+00> : vector<128x128xf32>
      %36 = tpu.matmul %33, %35, %cst_17 {dimension_numbers = #tpu.dot_dimension_numbers<[1], [0], [0], [1], [0, 0, 1, 1], [], []>} : vector<128x128xbf16>, vector<128x128xbf16>, vector<128x128xf32> -> vector<128x128xf32>
      %c2_18 = arith.constant 2 : index
      %c0_19 = arith.constant 0 : index
      %37 = vector.load %arg3[%c2_18, %c0_19] : memref<4x128xf32, #tpu.memory_space<vmem>>, vector<1x128xf32>
      %38 = vector.broadcast %37 : vector<1x128xf32> to vector<128x128xf32>
      %39 = arith.addf %36, %38 : vector<128x128xf32>
      %cst_20 = arith.constant 2.000000e+01 : f32
      %40 = vector.broadcast %cst_20 : f32 to vector<128x128xf32>
      %41 = arith.cmpf ogt, %39, %40 : vector<128x128xf32>
      %42 = math.exp %39 : vector<128x128xf32>
      %43 = math.log1p %42 : vector<128x128xf32>
      %44 = arith.select %41, %39, %43 : vector<128x128xi1>, vector<128x128xf32>
      %45 = arith.addf %44, %32 : vector<128x128xf32>
      %46 = arith.truncf %45 : vector<128x128xf32> to vector<128x128xbf16>
      %c3 = arith.constant 3 : index
      %c0_21 = arith.constant 0 : index
      %c0_22 = arith.constant 0 : index
      %47 = vector.load %arg2[%c3, %c0_21, %c0_22] : memref<4x128x128xbf16, #tpu.memory_space<vmem>>, vector<1x128x128xbf16>
      %48 = vector.shape_cast %47 : vector<1x128x128xbf16> to vector<128x128xbf16>
      %cst_23 = arith.constant dense<0.000000e+00> : vector<128x128xf32>
      %49 = tpu.matmul %46, %48, %cst_23 {dimension_numbers = #tpu.dot_dimension_numbers<[1], [0], [0], [1], [0, 0, 1, 1], [], []>} : vector<128x128xbf16>, vector<128x128xbf16>, vector<128x128xf32> -> vector<128x128xf32>
      %c3_24 = arith.constant 3 : index
      %c0_25 = arith.constant 0 : index
      %50 = vector.load %arg3[%c3_24, %c0_25] : memref<4x128xf32, #tpu.memory_space<vmem>>, vector<1x128xf32>
      %51 = vector.broadcast %50 : vector<1x128xf32> to vector<128x128xf32>
      %52 = arith.addf %49, %51 : vector<128x128xf32>
      %cst_26 = arith.constant 2.000000e+01 : f32
      %53 = vector.broadcast %cst_26 : f32 to vector<128x128xf32>
      %54 = arith.cmpf ogt, %52, %53 : vector<128x128xf32>
      %55 = math.exp %52 : vector<128x128xf32>
      %56 = math.log1p %55 : vector<128x128xf32>
      %57 = arith.select %54, %52, %56 : vector<128x128xi1>, vector<128x128xf32>
      %58 = arith.addf %57, %45 : vector<128x128xf32>
      %59 = arith.truncf %58 : vector<128x128xf32> to vector<128x128xbf16>
      %c0_27 = arith.constant 0 : index
      %c0_28 = arith.constant 0 : index
      %60 = vector.load %arg4[%c0_27, %c0_28] : memref<128x128xbf16, #tpu.memory_space<vmem>>, vector<128x128xbf16>
      %cst_29 = arith.constant dense<0.000000e+00> : vector<128x128xf32>
      %61 = tpu.matmul %59, %60, %cst_29 {dimension_numbers = #tpu.dot_dimension_numbers<[1], [0], [0], [1], [0, 0, 1, 1], [], []>} : vector<128x128xbf16>, vector<128x128xbf16>, vector<128x128xf32> -> vector<128x128xf32>
      %c0_30 = arith.constant 0 : index
      %c0_31 = arith.constant 0 : index
      %62 = vector.load %arg5[%c0_30, %c0_31] : memref<1x128xf32, #tpu.memory_space<vmem>>, vector<1x128xf32>
      %63 = vector.broadcast %62 : vector<1x128xf32> to vector<128x128xf32>
      %64 = arith.addf %61, %63 : vector<128x128xf32>
      %65 = arith.index_cast %4 : i32 to index
      %c0_32 = arith.constant 0 : index
      %66 = vector.load %arg6[%65, %c0_32] : memref<256x128xf32, #tpu.memory_space<vmem>>, vector<128x128xf32>
      tpu.vector_store %arg6[%65, %c0_32], %64 {strides = array<i32>} : memref<256x128xf32, #tpu.memory_space<vmem>>, vector<128x128xf32>,
    }
    %c2_i32_0 = arith.constant 2 : i32
    return
  }
  func.func @transform_0(%arg0: i32) -> (i32, i32) {
    %c0_i32 = arith.constant 0 : i32
    %c0_i32_0 = arith.constant 0 : i32
    return %arg0, %c0_i32 : i32, i32
  }
  func.func @transform_1(%arg0: i32) -> (i32, i32, i32) {
    %c0_i32 = arith.constant 0 : i32
    %c0_i32_0 = arith.constant 0 : i32
    %c0_i32_1 = arith.constant 0 : i32
    %c0_i32_2 = arith.constant 0 : i32
    return %c0_i32, %c0_i32_0, %c0_i32_1 : i32, i32, i32
  }
  func.func @transform_2(%arg0: i32) -> (i32, i32) {
    %c0_i32 = arith.constant 0 : i32
    %c0_i32_0 = arith.constant 0 : i32
    %c0_i32_1 = arith.constant 0 : i32
    return %c0_i32, %c0_i32_0 : i32, i32
  }
  func.func @transform_3(%arg0: i32) -> (i32, i32) {
    %c0_i32 = arith.constant 0 : i32
    %c0_i32_0 = arith.constant 0 : i32
    %c0_i32_1 = arith.constant 0 : i32
    return %c0_i32, %c0_i32_0 : i32, i32
  }
  func.func @transform_4(%arg0: i32) -> (i32, i32) {
    %c0_i32 = arith.constant 0 : i32
    %c0_i32_0 = arith.constant 0 : i32
    %c0_i32_1 = arith.constant 0 : i32
    return %c0_i32, %c0_i32_0 : i32, i32
  }
  func.func @transform_5(%arg0: i32) -> (i32, i32) {
    %c0_i32 = arith.constant 0 : i32
    %c0_i32_0 = arith.constant 0 : i32
    return %arg0, %c0_i32 : i32, i32
  }
}

module attributes {stable_mosaic.version = 11 : i64} {
  func.func @ritznet_kernel(%arg0: i32, %arg1: memref<256x128xf32, #tpu.memory_space<vmem>>, %arg2: memref<4x128x128xbf16, #tpu.memory_space<vmem>>, %arg3: memref<4x128xf32, #tpu.memory_space<vmem>>, %arg4: memref<128x128xbf16, #tpu.memory_space<vmem>>, %arg5: memref<1x128xf32, #tpu.memory_space<vmem>>, %arg6: memref<256x128xf32, #tpu.memory_space<vmem>>) attributes {dimension_semantics = [#tpu.dimension_semantics<parallel>], iteration_bounds = array<i64: 2>, scalar_prefetch = 0 : i64, scratch_operands = 0 : i64, tpu.core_type = #tpu.core_type<tc>, window_params = [{transform_indices = @transform_0, window_bounds = array<i64: 256, 128>}, {pipeline_mode = #tpu.pipeline_mode<synchronous>, transform_indices = @transform_1, window_bounds = array<i64: 4, 128, 128>}, {pipeline_mode = #tpu.pipeline_mode<synchronous>, transform_indices = @transform_2, window_bounds = array<i64: 4, 128>}, {pipeline_mode = #tpu.pipeline_mode<synchronous>, transform_indices = @transform_3, window_bounds = array<i64: 128, 128>}, {pipeline_mode = #tpu.pipeline_mode<synchronous>, transform_indices = @transform_4, window_bounds = array<i64: 1, 128>}, {transform_indices = @transform_5, window_bounds = array<i64: 256, 128>}]} {
    %c0_i32 = arith.constant 0 : i32
    %c2_i32 = arith.constant 2 : i32
    %0 = arith.addi %c0_i32, %c2_i32 : i32
    %c1_i32 = arith.constant 1 : i32
    scf.for %arg7 = %c0_i32 to %0 step %c1_i32  : i32 {
      %c1_i32_1 = arith.constant 1 : i32
      %1 = arith.muli %arg7, %c1_i32_1 : i32
      %c0_i32_2 = arith.constant 0 : i32
      %2 = arith.addi %c0_i32_2, %1 : i32
      %c128_i32 = arith.constant 128 : i32
      %3 = arith.muli %2, %c128_i32 : i32
      %4 = tpu.assume_multiple %3, 128 : i32
      %5 = arith.index_cast %4 : i32 to index
      %c0 = arith.constant 0 : index
      %6 = vector.load %arg1[%5, %c0] : memref<256x128xf32, #tpu.memory_space<vmem>>, vector<128x128xf32>
      %7 = arith.truncf %6 : vector<128x128xf32> to vector<128x128xbf16>
      %c0_3 = arith.constant 0 : index
      %c0_4 = arith.constant 0 : index
      %c0_5 = arith.constant 0 : index
      %8 = vector.load %arg2[%c0_3, %c0_4, %c0_5] : memref<4x128x128xbf16, #tpu.memory_space<vmem>>, vector<1x128x128xbf16>
      %9 = vector.shape_cast %8 : vector<1x128x128xbf16> to vector<128x128xbf16>
      %cst = arith.constant dense<0.000000e+00> : vector<128x128xf32>
      %10 = tpu.matmul %7, %9, %cst {dimension_numbers = #tpu.dot_dimension_numbers<[1], [0], [0], [1], [0, 0, 1, 1], [], []>} : vector<128x128xbf16>, vector<128x128xbf16>, vector<128x128xf32> -> vector<128x128xf32>
      %c0_6 = arith.constant 0 : index
      %c0_7 = arith.constant 0 : index
      %11 = vector.load %arg3[%c0_6, %c0_7] : memref<4x128xf32, #tpu.memory_space<vmem>>, vector<1x128xf32>
      %12 = vector.broadcast %11 : vector<1x128xf32> to vector<128x128xf32>
      %13 = arith.addf %10, %12 : vector<128x128xf32>
      %cst_8 = arith.constant 2.000000e+01 : f32
      %14 = vector.broadcast %cst_8 : f32 to vector<128x128xf32>
      %15 = arith.cmpf ogt, %13, %14 : vector<128x128xf32>
      %16 = math.exp %13 : vector<128x128xf32>
      %17 = math.log1p %16 : vector<128x128xf32>
      %18 = arith.select %15, %13, %17 : vector<128x128xi1>, vector<128x128xf32>
      %19 = arith.addf %18, %6 : vector<128x128xf32>
      %20 = arith.truncf %19 : vector<128x128xf32> to vector<128x128xbf16>
      %c1 = arith.constant 1 : index
      %c0_9 = arith.constant 0 : index
      %c0_10 = arith.constant 0 : index
      %21 = vector.load %arg2[%c1, %c0_9, %c0_10] : memref<4x128x128xbf16, #tpu.memory_space<vmem>>, vector<1x128x128xbf16>
      %22 = vector.shape_cast %21 : vector<1x128x128xbf16> to vector<128x128xbf16>
      %cst_11 = arith.constant dense<0.000000e+00> : vector<128x128xf32>
      %23 = tpu.matmul %20, %22, %cst_11 {dimension_numbers = #tpu.dot_dimension_numbers<[1], [0], [0], [1], [0, 0, 1, 1], [], []>} : vector<128x128xbf16>, vector<128x128xbf16>, vector<128x128xf32> -> vector<128x128xf32>
      %c1_12 = arith.constant 1 : index
      %c0_13 = arith.constant 0 : index
      %24 = vector.load %arg3[%c1_12, %c0_13] : memref<4x128xf32, #tpu.memory_space<vmem>>, vector<1x128xf32>
      %25 = vector.broadcast %24 : vector<1x128xf32> to vector<128x128xf32>
      %26 = arith.addf %23, %25 : vector<128x128xf32>
      %cst_14 = arith.constant 2.000000e+01 : f32
      %27 = vector.broadcast %cst_14 : f32 to vector<128x128xf32>
      %28 = arith.cmpf ogt, %26, %27 : vector<128x128xf32>
      %29 = math.exp %26 : vector<128x128xf32>
      %30 = math.log1p %29 : vector<128x128xf32>
      %31 = arith.select %28, %26, %30 : vector<128x128xi1>, vector<128x128xf32>
      %32 = arith.addf %31, %19 : vector<128x128xf32>
      %33 = arith.truncf %32 : vector<128x128xf32> to vector<128x128xbf16>
      %c2 = arith.constant 2 : index
      %c0_15 = arith.constant 0 : index
      %c0_16 = arith.constant 0 : index
      %34 = vector.load %arg2[%c2, %c0_15, %c0_16] : memref<4x128x128xbf16, #tpu.memory_space<vmem>>, vector<1x128x128xbf16>
      %35 = vector.shape_cast %34 : vector<1x128x128xbf16> to vector<128x128xbf16>
      %cst_17 = arith.constant dense<0.000000e+00> : vector<128x128xf32>
      %36 = tpu.matmul %33, %35, %cst_17 {dimension_numbers = #tpu.dot_dimension_numbers<[1], [0], [0], [1], [0, 0, 1, 1], [], []>} : vector<128x128xbf16>, vector<128x128xbf16>, vector<128x128xf32> -> vector<128x128xf32>
      %c2_18 = arith.constant 2 : index
      %c0_19 = arith.constant 0 : index
      %37 = vector.load %arg3[%c2_18, %c0_19] : memref<4x128xf32, #tpu.memory_space<vmem>>, vector<1x128xf32>
      %38 = vector.broadcast %37 : vector<1x128xf32> to vector<128x128xf32>
      %39 = arith.addf %36, %38 : vector<128x128xf32>
      %cst_20 = arith.constant 2.000000e+01 : f32
      %40 = vector.broadcast %cst_20 : f32 to vector<128x128xf32>
      %41 = arith.cmpf ogt, %39, %40 : vector<128x128xf32>
      %42 = math.exp %39 : vector<128x128xf32>
      %43 = math.log1p %42 : vector<128x128xf32>
      %44 = arith.select %41, %39, %43 : vector<128x128xi1>, vector<128x128xf32>
      %45 = arith.addf %44, %32 : vector<128x128xf32>
      %46 = arith.truncf %45 : vector<128x128xf32> to vector<128x128xbf16>
      %c3 = arith.constant 3 : index
      %c0_21 = arith.constant 0 : index
      %c0_22 = arith.constant 0 : index
      %47 = vector.load %arg2[%c3, %c0_21, %c0_22] : memref<4x128x128xbf16, #tpu.memory_space<vmem>>, vector<1x128x128xbf16>
      %48 = vector.shape_cast %47 : vector<1x128x128xbf16> to vector<128x128xbf16>
      %cst_23 = arith.constant dense<0.000000e+00> : vector<128x128xf32>
      %49 = tpu.matmul %46, %48, %cst_23 {dimension_numbers = #tpu.dot_dimension_numbers<[1], [0], [0], [1], [0, 0, 1, 1], [], []>} : vector<128x128xbf16>, vector<128x128xbf16>, vector<128x128xf32> -> vector<128x128xf32>
      %c3_24 = arith.constant 3 : index
      %c0_25 = arith.constant 0 : index
      %50 = vector.load %arg3[%c3_24, %c0_25] : memref<4x128xf32, #tpu.memory_space<vmem>>, vector<1x128xf32>
      %51 = vector.broadcast %50 : vector<1x128xf32> to vector<128x128xf32>
      %52 = arith.addf %49, %51 : vector<128x128xf32>
      %cst_26 = arith.constant 2.000000e+01 : f32
      %53 = vector.broadcast %cst_26 : f32 to vector<128x128xf32>
      %54 = arith.cmpf ogt, %52, %53 : vector<128x128xf32>
      %55 = math.exp %52 : vector<128x128xf32>
      %56 = math.log1p %55 : vector<128x128xf32>
      %57 = arith.select %54, %52, %56 : vector<128x128xi1>, vector<128x128xf32>
      %58 = arith.addf %57, %45 : vector<128x128xf32>
      %59 = arith.truncf %58 : vector<128x128xf32> to vector<128x128xbf16>
      %c0_27 = arith.constant 0 : index
      %c0_28 = arith.constant 0 : index
      %60 = vector.load %arg4[%c0_27, %c0_28] : memref<128x128xbf16, #tpu.memory_space<vmem>>, vector<128x128xbf16>
      %cst_29 = arith.constant dense<0.000000e+00> : vector<128x128xf32>
      %61 = tpu.matmul %59, %60, %cst_29 {dimension_numbers = #tpu.dot_dimension_numbers<[1], [0], [0], [1], [0, 0, 1, 1], [], []>} : vector<128x128xbf16>, vector<128x128xbf16>, vector<128x128xf32> -> vector<128x128xf32>
      %c0_30 = arith.constant 0 : index
      %c0_31 = arith.constant 0 : index
      %62 = vector.load %arg5[%c0_30, %c0_31] : memref<1x128xf32, #tpu.memory_space<vmem>>, vector<1x128xf32>
      %63 = vector.broadcast %62 : vector<1x128xf32> to vector<128x128xf32>
      %64 = arith.addf %61, %63 : vector<128x128xf32>
      %65 = arith.index_cast %4 : i32 to index
      %c0_32 = arith.constant 0 : index
      %66 = vector.load %arg6[%65, %c0_32] : memref<256x128xf32, #tpu.memory_space<vmem>>, vector<128x128xf32>
      tpu.vector_store %arg6[%65, %c0_32], %64 {strides = array<i32>} : memref<256x128xf32, #tpu.memory_space<vmem>>, vector<128x128xf32>,
    }
    %c2_i32_0 = arith.constant 2 : i32
    return
  }
  func.func @transform_0(%arg0: i32) -> (i32, i32) {
    %c0_i32 = arith.constant 0 : i32
    %c0_i32_0 = arith.constant 0 : i32
    return %arg0, %c0_i32 : i32, i32
  }
  func.func @transform_1(%arg0: i32) -> (i32, i32, i32) {
    %c0_i32 = arith.constant 0 : i32
    %c0_i32_0 = arith.constant 0 : i32
    %c0_i32_1 = arith.constant 0 : i32
    %c0_i32_2 = arith.constant 0 : i32
    return %c0_i32, %c0_i32_0, %c0_i32_1 : i32, i32, i32
  }
  func.func @transform_2(%arg0: i32) -> (i32, i32) {
    %c0_i32 = arith.constant 0 : i32
    %c0_i32_0 = arith.constant 0 : i32
    %c0_i32_1 = arith.constant 0 : i32
    return %c0_i32, %c0_i32_0 : i32, i32
  }
  func.func @transform_3(%arg0: i32) -> (i32, i32) {
    %c0_i32 = arith.constant 0 : i32
    %c0_i32_0 = arith.constant 0 : i32
    %c0_i32_1 = arith.constant 0 : i32
    return %c0_i32, %c0_i32_0 : i32, i32
  }
  func.func @transform_4(%arg0: i32) -> (i32, i32) {
    %c0_i32 = arith.constant 0 : i32
    %c0_i32_0 = arith.constant 0 : i32
    %c0_i32_1 = arith.constant 0 : i32
    return %c0_i32, %c0_i32_0 : i32, i32
  }
  func.func @transform_5(%arg0: i32) -> (i32, i32) {
    %c0_i32 = arith.constant 0 : i32
    %c0_i32_0 = arith.constant 0 : i32
    return %arg0, %c0_i32 : i32, i32
  }
}

</mosaic_0001>

<bundles_post_ra>
// kernel: tpu_custom_call.1
= control target key start
LH: loop header
LB: loop body
LE: loop exit
PB: predicated region body
PF: predicated region fallthrough
CT: control target
= control target key end

     0   :  { %10 = vsyncpa [#allocation3], 0  ;;  %s3528_s0 = inlined_call_operand.hbm [shape: f32[512,128], index: 0, kind: input, shape index: {}]   ;;  %s3529_s1 = inlined_call_operand.hbm [shape: bf16[4,128,128], index: 1, kind: input, shape index: {}]   ;;  %s3530_s2 = inlined_call_operand.hbm [shape: f32[4,128], index: 2, kind: input, shape index: {}]   ;;  %s3531_s3 = inlined_call_operand.hbm [shape: bf16[128,128], index: 3, kind: input, shape index: {}]   ;;  %s3532_s4 = inlined_call_operand.vmem [shape: f32[1,128], index: 4, kind: input, shape index: {}]   ;;  %s3533_s5 = inlined_call_operand.hbm [shape: f32[512,128], index: 5, kind: output, shape index: {}]  }
   0x1   :  { %12 = vsyncpa [#allocation3 + $0x1], 0 }
   0x2   :  { %13 = vsyncpa [#allocation6], 0 }
   0x3   :  { %14 = vsyncpa [#allocation9], 0 }
   0x4   :  { %15 = vsyncpa [#allocation4], 0 }
   0x5   :  { %17 = vsyncpa [#allocation4 + $0x1], 0  ;;  %s2821_s18 = smov 0   ;;  %s2823_s19 = smov 0  }
   0x6   :  { %s2825_s20 = smov 0   ;;  %s2827_s21 = smov 0  }
   0x7 LB: > { %s2842_s22 = sadd.s32 4294967295, %s2776_s21   ;;  %s1979_s23 = sadd.s32 4294967294, %s2776_s21   ;;  %s2776_s21 = sphi %s2827_s21, %s3544_s21   ;;  %s2772_s20 = sphi %s2825_s20, %s3543_s20   ;;  %s2768_s19 = sphi %s2823_s19, %s3542_s19   ;;  %s2764_s18 = sphi %s2821_s18, %s3541_s18  }
   0x8   : > { %p43_p0 = scmp.ne.s32.totalorder %s2768_s19, %s2764_s18  ;;  %p44_p1 = scmp.eq.s32.totalorder %s2842_s22, 0 }
   0x9   : > { %p151_p2 = scmp.eq.s32.totalorder %s2842_s22, 1  ;;  %p157_p3 = scmp.eq.s32.totalorder %s1979_s23, 1 }
   0xa   : > { %p2851_p4 = por %p44_p1, %p43_p0  ;;  %p1980_p5 = scmp.ge.s32.totalorder %s2776_s21, 1 }
   0xb   : > { %p2856_p6 = por %p157_p3, %p43_p0  ;;  %p164_p7 = scmp.lt.s32.totalorder %s2776_s21, 3 }
   0xc   : > { %s175_s28 = sshll.u32 %s3529_s1, 4  ;;  %s2782_s30 = smov [#allocation5]   ;;  %s176_s28 = int_to_ptr.hbm [resolvable:$true] %s175_s28 }
   0xd   : > { %p2864_p8 = pnand %p1980_p5, %p164_p7  ;;  %s177_s6 = sshll.u32 %s2782_s30, 4  ;;  %s178_s6 = int_to_ptr.vmem [resolvable:$true] %s177_s6 }
   0xe   : > { %s190_s10 = sshll.u32 %s3530_s2, 4  ;;  %s2783_s11 = smov 64   ;;  %s191_s10 = int_to_ptr.hbm [resolvable:$true] %s190_s10 }
   0xf   : > { %p2242_p9 = pneg %p2864_p8  ;;  %s2784_s12 = smov 4  }
  0x10   : > { %s2785_s13 = smov [#allocation7]   ;;  %s201_s17 = sshll.u32 %s3531_s3, 4  ;;  %s202_s17 = int_to_ptr.hbm [resolvable:$true] %s201_s17 }
  0x11   : > { %p2872_p10 = pnand %p2242_p9, %p44_p1  ;;  %s192_s14 = sshll.u32 %s2785_s13, 4  ;;  %s193_s14 = int_to_ptr.vmem [resolvable:$true] %s192_s14 }
  0x12   : > { %s2786_s23 = smov [#allocation8]   ;;  %s2888_s27 = sadd.s32 1, %s2776_s21  }
  0x13   : > { %2245 = dma.hbm_to_vmem [thread:$0]  (!%p2872_p10), %s176_s28, 4096, %s178_s6, [#allocation6], %s2783_s11, %s2783_s11, %s2784_s12  }
  0x14   : > { %2248 = dma.hbm_to_vmem [thread:$0]  (!%p2872_p10), %s191_s10, 64, %s193_s14, [#allocation6]  }
  0x15   : > { %s203_s26 = sshll.u32 %s2786_s23, 4  ;;  %s27_s28 = ssub.s32 %s2776_s21, %s2888_s27  ;;  %s204_s26 = int_to_ptr.vmem [resolvable:$true] %s203_s26 }
  0x16   : > { %2251 = dma.hbm_to_vmem [thread:$0]  (!%p2872_p10), %s202_s17, 1024, %s204_s26, [#allocation9], %s2783_s11, %s2783_s11, %s2784_s12  }
  0x17   : > { %s30_s30 = sadd.s32 1, %s2772_s20  ;;  %p28_p12 = scmp.eq.s32.totalorder %s27_s28, 0 }
  0x18   : > { %p37_p13 = scmp.ne.s32.totalorder %s2772_s20, %s2768_s19  ;;  %p38_p0 = scmp.eq.s32.totalorder %s2776_s21, 0 }
  0x19   : > { %p2263_p3 = scmp.lt.s32.totalorder %s2776_s21, 2  ;;  %s220_s9 = sand.u32 1, %s2772_s20  }
  0x1a   : > { %s2900_s6 = scalar_select %p28_p12, %s2772_s20, %s30_s30  }
  0x1b   : > { %p39_p5 = por %p38_p0, %p37_p13  ;;  %p2904_p7 = por %p151_p2, %p37_p13 }
  0x1c   : > { %s2160_s10 = sshll.u32 %s2776_s21, 8  ;;  %s1985_s7 = sshll.u32 %s220_s9, 8 }
  0x1d   : > { %s229_s12 = scalar_lea.hbm %s3528_s0, %s2160_s10  ;;  %s224_s15 = scalar_lea.vmem [#allocation2], %s1985_s7 }
  0x1e   : > { %s230_s14 = sshll.u32 %s229_s12, 4  ;;  %s232_s16 = sshll.u32 %s224_s15, 4  ;;  %s231_s14 = int_to_ptr.hbm [resolvable:$true] %s230_s14  ;;  %s233_s16 = int_to_ptr.vmem [resolvable:$true] %s232_s16 }
  0x1f   : > { %p2915_p9 = pnand %p2263_p3, %p39_p5  ;;  %s221_s23 = scalar_lea.sflag [#allocation3], %s220_s9 }
  0x20   : > { %s2668_s26 = sshra.s32 %s231_s14, 4  ;;  %s2675_s7 = scalar_lea.hbm %s3528_s0, 512  ;;  %s2669_s26 = int_to_ptr.hbm [resolvable:$true] %s2668_s26 }
  0x21   : > { %s2670_s28 = scalar_lea.hbm %s2669_s26, 256  ;;  %p2672_p10 = pneg %p2915_p9 }
  0x22   : > { %p2671_p2 = scmp.ne.s32.totalorder %s2669_s26, %s2670_s28  ;;  %p2676_p0 = scmp.lt.s32.totalorder %s2669_s26, %s3528_s0 }
  0x23   : > { %p2677_p3 = scmp.lt.s32.totalorder %s2675_s7, %s2670_s28 }
  0x24   : > { %p2673_p12 = pnand %p2672_p10, %p2671_p2 }
  0x25   : > { %p2678_p5 = por %p2677_p3, %p2676_p0 }
  0x26   : > { %p2674_p13 = pneg %p2673_p12 }
  0x28   : > { %p2679_p11 = pnand %p2678_p5, %p2674_p13 }
  0x2a   : > { %2682 = shalt.err (!%p2679_p11)
}
  0x2b   : > { %s2787_s9 = smov 128   ;;  %s2788_s12 = smov 8  }
  0x2c   : > { %2255 = dma.hbm_to_vmem [thread:$0]  (!%p2915_p9), %s231_s14, 4096, %s233_s16, %s221_s23, %s2787_s9, %s2787_s9, %s2788_s12  }
  0x2d   : > { %244 = sbr.rel (%p2864_p8) target bundleno = 1000 (0x3e8), region = 40  ;;  %s2932_s15 = sand.u32 (!%p2864_p8), 1, %s2768_s19  }
  0x2e   : > { %s1989_s30 = sshll.u32 (!%p2864_p8), %s2932_s15, 8  ;;  %s247_s26 = scalar_lea.sflag (!%p2864_p8), [#allocation3], %s2932_s15 }
  0x2f   : > { %s2936_s28 = scalar_lea.vmem (!%p2864_p8), [#allocation2], %s1989_s30 }
  0x32   : > { %2747 = dma.done.wait (%p2851_p4), %s247_s26, 4096  }
  0x33   : > { %2749 = vsyncadd (%p2851_p4), %s247_s26, 4294963200 }
  0x34   : > { %2751 = dma.done.wait (%p44_p1), [#allocation6], 4160  }
  0x35   : > { %2753 = vsyncadd (%p44_p1), [#allocation6], 4294963136 }
  0x36   : > { %2755 = dma.done.wait (%p44_p1), [#allocation9], 1024  }
  0x37   : > { %2757 = vsyncadd (%p44_p1), [#allocation9], 4294966272  ;;  %s2950_s29 = scalar_lea.vmem [#allocation10], %s1989_s30  ;;  %s2952_s14 = smov 0  }
  0x38 LB: >> { %v2168_v0 = vld [vmem:[#allocation5 + $0x38] sm:$0xff]  ;;  %v2167_v1 = vld [vmem:[#allocation5 + $0x30] sm:$0xff]  ;;  %v2166_v2 = vld [vmem:[#allocation5 + $0x28] sm:$0xff]  ;;  %s1994_s24 = sshll.u32 %s2780_s14, 7  ;;  %s300_s14 = sadd.s32 1, %s2780_s14   ;;  %s2780_s14 = sphi %s2952_s14, %s300_s14  }
  0x39   : >> { %393 = vmatpush.bf16.msra.mxu0 %v2168_v0  ;;  %2202 = vmatpush.bf16.msra.mxu1 %v2168_v0  ;;  %v2165_v3 = vld [vmem:[#allocation5 + $0x20] sm:$0xff]  ;;  %v2164_v4 = vld [vmem:[#allocation5 + $0x18] sm:$0xff]  ;;  %v2163_v5 = vld [vmem:[#allocation5 + $0x10] sm:$0xff]  ;;  %s2961_s16 = scalar_lea.vmem %s2936_s28, %s1994_s24 [#allocation2]  ;;  %s3473_s10 = scalar_lea.vmem %s2950_s29, %s1994_s24 [#allocation10] }
  0x3a   : >> { %2203 = vmatpush.bf16.msra.mxu2 %v2168_v0  ;;  %2204 = vmatpush.bf16.msra.mxu3 %v2168_v0  ;;  %v2162_v6 = vld [vmem:[#allocation5 + $0x8] sm:$0xff]  ;;  %v2161_v7 = vld [vmem:[#allocation5] sm:$0xff]  ;;  %v2996_v20 = vld [vmem:[%s2961_s16 + $0x10] sm:$0xff]  ;;  %p297_p1 = scmp.ge.s32.totalorder %s300_s14, 2  }
  0x3b   : >> { %v2964_v8 = vld [vmem:[%s2961_s16] sm:$0xff]  ;;  %v2967_v9 = vld [vmem:[%s2961_s16 + $0x8] sm:$0xff]  ;;  %v2999_v21 = vld [vmem:[%s2961_s16 + $0x18] sm:$0xff]  ;;  %s2201_s7 = sshll.u32 (%p297_p1), %s2842_s22, 8  ;;  %s1865_s12 = sshll.u32 (%p297_p1), %s2950_s29, 4  ;;  %s1866_s12 = int_to_ptr.vmem [resolvable:$true] %s1865_s12 }
  0x3c   : >> { %v2970_v10 = vld [vmem:[%s2961_s16 + $0x20] sm:$0xff]  ;;  %v2973_v11 = vld [vmem:[%s2961_s16 + $0x28] sm:$0xff]  ;;  %v319_v16 = vpack.c.bf16 %v2967_v9, %v2964_v8  ;;  %v3002_v22 = vld [vmem:[%s2961_s16 + $0x30] sm:$0xff]  ;;  %v320_v28 = vpack.c.bf16 %v2999_v21, %v2996_v20  ;;  %s1864_s9 = scalar_lea.hbm (%p297_p1), %s3533_s5, %s2201_s7  ;;  %s1853_s26 = scalar_lea.sflag (%p297_p1), [#allocation4], %s2932_s15 }
  0x3d   : >> { %394 = vmatpush.bf16.msra.mxu0 %v2167_v1  ;;  %2205 = vmatpush.bf16.msra.mxu1 %v2167_v1  ;;  %v2976_v12 = vld [vmem:[%s2961_s16 + $0x40] sm:$0xff]  ;;  %v2979_v13 = vld [vmem:[%s2961_s16 + $0x48] sm:$0xff]  ;;  %v321_v17 = vpack.c.bf16 %v2973_v11, %v2970_v10  ;;  %v3005_v23 = vld [vmem:[%s2961_s16 + $0x38] sm:$0xff]  ;;  %s1867_s30 = sshll.u32 (%p297_p1), %s1864_s9, 4  ;;  %s2718_s22 = scalar_lea.hbm (%p297_p1), %s3533_s5, 512  ;;  %s1868_s30 = int_to_ptr.hbm [resolvable:$true] %s1867_s30 }
  0x3e   : >> { %2206 = vmatpush.bf16.msra.mxu2 %v2167_v1  ;;  %2207 = vmatpush.bf16.msra.mxu3 %v2167_v1  ;;  %v2982_v14 = vld [vmem:[%s2961_s16 + $0x60] sm:$0xff]  ;;  %v2985_v15 = vld [vmem:[%s2961_s16 + $0x68] sm:$0xff]  ;;  %v323_v18 = vpack.c.bf16 %v2979_v13, %v2976_v12  ;;  %v3008_v24 = vld [vmem:[%s2961_s16 + $0x50] sm:$0xff]  ;;  %v322_v29 = vpack.c.bf16 %v3005_v23, %v3002_v22  ;;  %s2712_s24 = sshra.s32 (%p297_p1), %s1868_s30, 4  ;;  %s2713_s24 = int_to_ptr.hbm [resolvable:$true] %s2712_s24 }
  0x3f   : >> { %v325_v19 = vpack.c.bf16 %v2985_v15, %v2982_v14  ;;  %v3011_v25 = vld [vmem:[%s2961_s16 + $0x58] sm:$0xff]  ;;  %v3014_v26 = vld [vmem:[%s2961_s16 + $0x70] sm:$0xff]  ;;  %v2174_v34 = vld [vmem:[#allocation5 + $0x68] sm:$0xff]  ;;  %p2719_p9 = scmp.lt.s32.totalorder (%p297_p1), %s2713_s24, %s3533_s5 }
  0x40   : >> { %v3017_v27 = vld [vmem:[%s2961_s16 + $0x78] sm:$0xff]  ;;  %v324_v30 = vpack.c.bf16 %v3011_v25, %v3008_v24  ;;  %v2175_v33 = vld [vmem:[#allocation5 + $0x70] sm:$0xff]  ;;  %v2173_v35 = vld [vmem:[#allocation5 + $0x60] sm:$0xff]  ;;  %s2714_s16 = scalar_lea.hbm (%p297_p1), %s2713_s24, 256 }
  0x41   : >> { %395 = vmatpush.bf16.msra.mxu0 %v2166_v2  ;;  %2208 = vmatpush.bf16.msra.mxu1 %v2166_v2  ;;  %v326_v31 = vpack.c.bf16 %v3017_v27, %v3014_v26  ;;  %v2176_v32 = vld [vmem:[#allocation5 + $0x78] sm:$0xff]  ;;  %v2171_v37 = vld [vmem:[#allocation5 + $0x50] sm:$0xff]  ;;  %v2170_v38 = vld [vmem:[#allocation5 + $0x48] sm:$0xff]  ;;  %p2715_p4 = scmp.ne.s32.totalorder (%p297_p1), %s2713_s24, %s2714_s16  ;;  %p2720_p2 = scmp.lt.s32.totalorder (%p297_p1), %s2718_s22, %s2714_s16 }
  0x42   : >> { %2209 = vmatpush.bf16.msra.mxu2 %v2166_v2  ;;  %2210 = vmatpush.bf16.msra.mxu3 %v2166_v2  ;;  %v2172_v36 = vld [vmem:[#allocation5 + $0x58] sm:$0xff]  ;;  %v3027_v39 = vld [vmem:[#allocation7] ss:$0 sm:$0xff] }
  0x43   : >> { %v2169_v41 = vld [vmem:[#allocation5 + $0x40] sm:$0xff]  ;;  %p2716_p8 = pnand (%p297_p1), %p2715_p4, %p2904_p7  ;;  %p2721_p10 = por (%p297_p1), %p2720_p2, %p2719_p9 }
  0x45   : >> { %396 = vmatpush.bf16.msra.mxu0 %v2165_v3  ;;  %2211 = vmatpush.bf16.msra.mxu1 %v2165_v3  ;;  %p2717_p11 = pneg (%p297_p1), %p2716_p8 }
  0x46   : >> { %2212 = vmatpush.bf16.msra.mxu2 %v2165_v3  ;;  %2213 = vmatpush.bf16.msra.mxu3 %v2165_v3 }
  0x47   : > { %p2722_p12 = pnand (%p297_p1), %p2721_p10, %p2717_p11 }
  0x49   : >> { %397 = vmatpush.bf16.msra.mxu0 %v2164_v4  ;;  %2214 = vmatpush.bf16.msra.mxu1 %v2164_v4 }
  0x4a   : >> { %2215 = vmatpush.bf16.msra.mxu2 %v2164_v4  ;;  %2216 = vmatpush.bf16.msra.mxu3 %v2164_v4 }
  0x4d   : >> { %398 = vmatpush.bf16.msra.mxu0 %v2163_v5  ;;  %2217 = vmatpush.bf16.msra.mxu1 %v2163_v5 }
  0x4e   : >> { %2218 = vmatpush.bf16.msra.mxu2 %v2163_v5  ;;  %2219 = vmatpush.bf16.msra.mxu3 %v2163_v5 }
  0x51   : >> { %399 = vmatpush.bf16.msra.mxu0 %v2162_v6  ;;  %2220 = vmatpush.bf16.msra.mxu1 %v2162_v6 }
  0x52   : >> { %2221 = vmatpush.bf16.msra.mxu2 %v2162_v6  ;;  %2222 = vmatpush.bf16.msra.mxu3 %v2162_v6 }
  0x55   : >> { %400 = vmatpush.bf16.msra.mxu0 %v2161_v7  ;;  %2223 = vmatpush.bf16.msra.mxu1 %v2161_v7 }
  0x56   : >> { %2224 = vmatpush.bf16.msra.mxu2 %v2161_v7  ;;  %2225 = vmatpush.bf16.msra.mxu3 %v2161_v7 }
  0x58   : >> { %401 = vmatmul.bf16.vlgmr.msra.gmra.mxu0 %v319_v16  ;;  %411 = vmatmul.bf16.vlgmr.msra.gmra.mxu1 %v321_v17 }
  0x59   : >> { %421 = vmatmul.bf16.vlgmr.msra.gmra.mxu2 %v323_v18  ;;  %431 = vmatmul.bf16.vlgmr.msra.gmra.mxu3 %v325_v19 }
  0x5a   : >> { %741 = vmatpush.bf16.msrb.mxu1 %v2176_v32 }
  0x5e   : >> { %742 = vmatpush.bf16.msrb.mxu1 %v2175_v33 }
  0x62   : >> { %743 = vmatpush.bf16.msrb.mxu1 %v2174_v34 }
  0x66   : >> { %744 = vmatpush.bf16.msrb.mxu1 %v2173_v35 }
  0x68   : >> { %406 = vmatmul.bf16.gmra.mxu0 %v320_v28  ;;  %416 = vmatmul.bf16.gmra.mxu1 %v322_v29 }
  0x69   : >> { %426 = vmatmul.bf16.gmra.mxu2 %v324_v30  ;;  %436 = vmatmul.bf16.gmra.mxu3 %v326_v31 }
  0x6a   : >> { %745 = vmatpush.bf16.msrb.mxu1 %v2172_v36 }
  0x6e   : >> { %746 = vmatpush.bf16.msrb.mxu1 %v2171_v37 }
  0x72   : >> { %747 = vmatpush.bf16.msrb.mxu1 %v2170_v38 }
  0x76   : >> { %748 = vmatpush.bf16.msrb.mxu1 %v2169_v41 }
  0xd5   : >> { %v402_v40 = vpop.f32.mrf.mxu0  ;;  %v412_v44 = vpop.f32.mrf.mxu1 }
  0xd6   : >> { %v403_v42 = vadd.f32 %v3027_v39, %v402_v40  ;;  %v3036_v57 = vadd.f32 %v3027_v39, %v412_v44 }
  0xd8   : >> { %v458_v43 = vmul.f32 1.442695, %v403_v42  ;;  %v466_v0 = vmul.f32 1.442695, %v3036_v57  ;;  %vm442_vm1 = vcmp.gt.f32.partialorder %v403_v42, 20.0  ;;  %vm446_vm10 = vcmp.gt.f32.partialorder %v3036_v57, 20.0 }
  0xda   : >> { %2322 = vpow2.f32 %v458_v43 }
  0xdd   : >> { %v404_v45 = vpop.f32.mrf.mxu0  ;;  %v414_v50 = vpop.f32.mrf.mxu1 }
  0xde   : >> { %v405_v46 = vadd.f32 %v3027_v39, %v404_v45  ;;  %v3039_v62 = vadd.f32 %v3027_v39, %v414_v50 }
  0xe0   : >> { %v2323_v47 = vpop.eup %2322  ;;  %v460_v48 = vmul.f32 1.442695, %v405_v46  ;;  %v468_v6 = vmul.f32 1.442695, %v3039_v62  ;;  %vm443_vm3 = vcmp.gt.f32.partialorder %v405_v46, 20.0  ;;  %vm447_vm11 = vcmp.gt.f32.partialorder %v3039_v62, 20.0 }
  0xe1   : >> { %v490_v49 = vadd.f32 1.0, %v2323_v47  ;;  %v493_v52 = vmul.f32 -0.5, %v2323_v47  ;;  %v496_v61 = vand.u32 2147483647, %v2323_v47 }
  0xe2   : >> { %2324 = vpow2.f32 %v460_v48 }
  0xe3   : >> { %2326 = vlog2.f32 %v490_v49  ;;  %v494_v59 = vadd.f32 1.0, %v493_v52  ;;  %vm497_vm0 = vcmp.lt.f32.partialorder %v496_v61, 0.0004427343 }
  0xe5   : >> { %v407_v51 = vpop.f32.mrf.mxu0  ;;  %v495_v2 = vmul.f32 %v2323_v47, %v494_v59  ;;  %v417_v7 = vpop.f32.mrf.mxu1 }
  0xe6   : >> { %v3032_v53 = vadd.f32 %v3027_v39, %v407_v51 }
  0xe8   : >> { %v2325_v54 = vpop.eup %2324  ;;  %v462_v55 = vmul.f32 1.442695, %v3032_v53  ;;  %vm444_vm5 = vcmp.gt.f32.partialorder %v3032_v53, 20.0 }
  0xe9   : >> { %v2327_v56 = vpop.eup %2326  ;;  %v499_v58 = vadd.f32 1.0, %v2325_v54  ;;  %v502_v60 = vmul.f32 -0.5, %v2325_v54  ;;  %v505_v5 = vand.u32 2147483647, %v2325_v54 }
  0xea   : >> { %2328 = vpow2.f32 %v462_v55  ;;  %v492_v63 = vmul.f32 0.6931472, %v2327_v56 }
  0xeb   : >> { %2330 = vlog2.f32 %v499_v58  ;;  %v503_v3 = vadd.f32 1.0, %v502_v60  ;;  %vm506_vm2 = vcmp.lt.f32.partialorder %v505_v5, 0.0004427343 }
  0xec   : >> { %v498_v17 = vsel %vm497_vm0, %v495_v2, %v492_v63  ;;  %2332 = vpow2.f32 %v466_v0 }
  0xed   : >> { %v409_v1 = vpop.f32.mrf.mxu0  ;;  %v504_v30 = vmul.f32 %v2325_v54, %v503_v3  ;;  %v634_v31 = vsel %vm442_vm1, %v403_v42, %v498_v17  ;;  %v419_v42 = vpop.f32.mrf.mxu1 }
  0xee   : >> { %v3043_v4 = vadd.f32 %v3027_v39, %v409_v1  ;;  %v3048_v34 = vadd.f32 %v634_v31, %v2964_v8  ;;  %v422_v8 = vpop.f32.mrf.mxu2 }
  0xf0   : >> { %v2329_v16 = vpop.eup %2328  ;;  %v464_v18 = vmul.f32 1.442695, %v3043_v4  ;;  %vm445_vm7 = vcmp.gt.f32.partialorder %v3043_v4, 20.0 }
  0xf1   : >> { %v2331_v19 = vpop.eup %2330  ;;  %v508_v28 = vadd.f32 1.0, %v2329_v16  ;;  %v511_v36 = vmul.f32 -0.5, %v2329_v16  ;;  %v514_v48 = vand.u32 2147483647, %v2329_v16 }
  0xf2   : >> { %v501_v29 = vmul.f32 0.6931472, %v2331_v19  ;;  %2334 = vpow2.f32 %v464_v18  ;;  %v2333_v37 = vpop.eup %2332 }
  0xf3   : >> { %2336 = vpow2.f32 %v468_v6  ;;  %v512_v45 = vadd.f32 1.0, %v511_v36  ;;  %v526_v50 = vadd.f32 1.0, %v2333_v37  ;;  %vm515_vm4 = vcmp.lt.f32.partialorder %v514_v48, 0.0004427343 }
  0xf4   : >> { %v507_v32 = vsel %vm506_vm2, %v504_v30, %v501_v29  ;;  %2338 = vlog2.f32 %v508_v28  ;;  %v529_v61 = vmul.f32 -0.5, %v2333_v37  ;;  %v532_v29 = vand.u32 2147483647, %v2333_v37 }
  0xf5   : >> { %v635_v33 = vsel %vm443_vm3, %v405_v46, %v507_v32  ;;  %v3056_v46 = vadd.f32 %v3027_v39, %v417_v7  ;;  %v513_v52 = vmul.f32 %v2329_v16, %v512_v45 }
  0xf6   : >> { %v3051_v35 = vadd.f32 %v635_v33, %v2967_v9  ;;  %v3059_v9 = vadd.f32 %v3027_v39, %v419_v42  ;;  %v424_v5 = vpop.f32.mrf.mxu2  ;;  %v530_v18 = vadd.f32 1.0, %v529_v61  ;;  %vm533_vm8 = vcmp.lt.f32.partialorder %v532_v29, 0.0004427343 }
  0xf7   : >> { %v470_v55 = vmul.f32 1.442695, %v3056_v46  ;;  %vm448_vm14 = vcmp.gt.f32.partialorder %v3056_v46, 20.0 }
  0xf8   : >> { %v2335_v38 = vpop.eup %2334  ;;  %v666_v40 = vpack.c.bf16 %v3051_v35, %v3048_v34  ;;  %v472_v58 = vmul.f32 1.442695, %v3059_v9  ;;  %vm449_vm15 = vcmp.gt.f32.partialorder %v3059_v9, 20.0 }
  0xf9   : >> { %v2337_v41 = vpop.eup %2336  ;;  %v517_v43 = vadd.f32 1.0, %v2335_v38  ;;  %v520_v47 = vmul.f32 -0.5, %v2335_v38  ;;  %v523_v56 = vand.u32 2147483647, %v2335_v38 }
  0xfa   : >> { %v2339_v44 = vpop.eup %2338  ;;  %749 = vmatmul.bf16.vlgmr.msrb.gmra.mxu1 %v666_v40  ;;  %v535_v51 = vadd.f32 1.0, %v2337_v41  ;;  %v538_v1 = vmul.f32 -0.5, %v2337_v41  ;;  %v541_v30 = vand.u32 2147483647, %v2337_v41 }
  0xfb   : >> { %2340 = vlog2.f32 %v517_v43  ;;  %v510_v49 = vmul.f32 0.6931472, %v2339_v44  ;;  %v521_v54 = vadd.f32 1.0, %v520_v47  ;;  %vm524_vm6 = vcmp.lt.f32.partialorder %v523_v56, 0.0004427343 }
  0xfc   : >> { %2342 = vlog2.f32 %v526_v50  ;;  %v539_v19 = vadd.f32 1.0, %v538_v1  ;;  %vm542_vm9 = vcmp.lt.f32.partialorder %v541_v30, 0.0004427343 }
  0xfd   : >> { %v516_v59 = vsel %vm515_vm4, %v513_v52, %v510_v49  ;;  %2344 = vlog2.f32 %v535_v51  ;;  %v522_v0 = vmul.f32 %v2335_v38, %v521_v54 }
  0xfe   : >> { %2346 = vpow2.f32 %v470_v55  ;;  %v636_v2 = vsel %vm444_vm5, %v3032_v53, %v516_v59  ;;  %v540_v38 = vmul.f32 %v2337_v41, %v539_v19  ;;  %v427_v45 = vpop.f32.mrf.mxu2 }
  0xff   : >> { %2348 = vpow2.f32 %v472_v58  ;;  %v3068_v16 = vadd.f32 %v636_v2, %v2996_v20  ;;  %v3076_v20 = vadd.f32 %v3027_v39, %v422_v8  ;;  %v432_v2 = vpop.f32.mrf.mxu3 }
 0x101   : >> { %v2341_v60 = vpop.eup %2340  ;;  %vm450_vm2 = vcmp.gt.f32.partialorder %v3076_v20, 20.0 }
 0x102   : >> { %v519_v63 = vmul.f32 0.6931472, %v2341_v60  ;;  %v2343_v7 = vpop.eup %2342 }
 0x103   : >> { %v2345_v28 = vpop.eup %2344  ;;  %v528_v33 = vmul.f32 0.6931472, %v2343_v7 }
 0x104   : >> { %v525_v3 = vsel %vm524_vm6, %v522_v0, %v519_v63  ;;  %v2347_v31 = vpop.eup %2346  ;;  %v537_v36 = vmul.f32 0.6931472, %v2345_v28 }
 0x105   : >> { %v637_v6 = vsel %vm445_vm7, %v3043_v4, %v525_v3  ;;  %v2349_v32 = vpop.eup %2348  ;;  %v531_v4 = vmul.f32 %v2333_v37, %v530_v18  ;;  %v544_v40 = vadd.f32 1.0, %v2347_v31  ;;  %v474_v37 = vmul.f32 1.442695, %v3076_v20 }
 0x106   : >> { %v3071_v17 = vadd.f32 %v637_v6, %v2999_v21  ;;  %v3079_v21 = vadd.f32 %v3027_v39, %v424_v5  ;;  %v553_v42 = vadd.f32 1.0, %v2349_v32  ;;  %v543_v44 = vsel %vm542_vm9, %v540_v38, %v537_v36  ;;  %v429_v60 = vpop.f32.mrf.mxu2 }
 0x107   : >> { %v534_v43 = vsel %vm533_vm8, %v531_v4, %v528_v33  ;;  %2350 = vlog2.f32 %v544_v40  ;;  %v639_v8 = vsel %vm447_vm11, %v3039_v62, %v543_v44  ;;  %v547_v48 = vmul.f32 -0.5, %v2347_v31  ;;  %v434_v4 = vpop.f32.mrf.mxu3 }
 0x108   : >> { %v667_v53 = vpack.c.bf16 %v3071_v17, %v3068_v16  ;;  %v476_v41 = vmul.f32 1.442695, %v3079_v21  ;;  %v638_v47 = vsel %vm446_vm10, %v3036_v57, %v534_v43  ;;  %2352 = vlog2.f32 %v553_v42 }
 0x109   : >> { %v556_v49 = vmul.f32 -0.5, %v2349_v32  ;;  %2354 = vpow2.f32 %v474_v37  ;;  %v3088_v50 = vadd.f32 %v638_v47, %v2970_v10  ;;  %v3091_v51 = vadd.f32 %v639_v8, %v2973_v11 }
 0x10a   : >> { %754 = vmatmul.bf16.gmra.mxu1 %v667_v53  ;;  %2356 = vpow2.f32 %v476_v41  ;;  %v548_v54 = vadd.f32 1.0, %v547_v48  ;;  %v550_v58 = vand.u32 2147483647, %v2347_v31  ;;  %v559_v59 = vand.u32 2147483647, %v2349_v32 }
 0x10b   : >> { %v557_v55 = vadd.f32 1.0, %v556_v49  ;;  %v668_v57 = vpack.c.bf16 %v3091_v51, %v3088_v50  ;;  %v3096_v11 = vadd.f32 %v3027_v39, %v427_v45  ;;  %v3099_v3 = vadd.f32 %v3027_v39, %v429_v60 }
 0x10c   : >> { %v549_v0 = vmul.f32 %v2347_v31, %v548_v54  ;;  %vm551_vm12 = vcmp.lt.f32.partialorder %v550_v58, 0.0004427343  ;;  %vm560_vm13 = vcmp.lt.f32.partialorder %v559_v59, 0.0004427343  ;;  %v3119_v8 = vadd.f32 %v3027_v39, %v434_v4 }
 0x10d   : >> { %v2351_v52 = vpop.eup %2350  ;;  %v558_v1 = vmul.f32 %v2349_v32, %v557_v55  ;;  %v478_v19 = vmul.f32 1.442695, %v3096_v11  ;;  %v480_v28 = vmul.f32 1.442695, %v3099_v3  ;;  %vm451_vm3 = vcmp.gt.f32.partialorder %v3079_v21, 20.0 }
 0x10e   : >> { %v2353_v56 = vpop.eup %2352  ;;  %v546_v63 = vmul.f32 0.6931472, %v2351_v52  ;;  %v484_v58 = vmul.f32 1.442695, %v3119_v8  ;;  %vm452_vm6 = vcmp.gt.f32.partialorder %v3096_v11, 20.0  ;;  %vm453_vm7 = vcmp.gt.f32.partialorder %v3099_v3, 20.0 }
 0x10f   : >> { %v2355_v62 = vpop.eup %2354  ;;  %v555_v10 = vmul.f32 0.6931472, %v2353_v56  ;;  %v437_v56 = vpop.f32.mrf.mxu3  ;;  %vm455_vm11 = vcmp.gt.f32.partialorder %v3119_v8, 20.0 }
 0x110   : >> { %v2357_v61 = vpop.eup %2356  ;;  %v562_v5 = vadd.f32 1.0, %v2355_v62  ;;  %v552_v7 = vsel %vm551_vm12, %v549_v0, %v546_v63  ;;  %v565_v53 = vmul.f32 -0.5, %v2355_v62  ;;  %v568_v43 = vand.u32 2147483647, %v2355_v62 }
 0x111   : >> { %v571_v6 = vadd.f32 1.0, %v2357_v61  ;;  %v561_v18 = vsel %vm560_vm13, %v558_v1, %v555_v10  ;;  %v640_v29 = vsel %vm448_vm14, %v3056_v46, %v552_v7  ;;  %v574_v31 = vmul.f32 -0.5, %v2357_v61 }
 0x112   : >> { %2358 = vlog2.f32 %v562_v5  ;;  %v641_v30 = vsel %vm449_vm15, %v3059_v9, %v561_v18  ;;  %v3108_v32 = vadd.f32 %v640_v29, %v3002_v22  ;;  %v566_v38 = vadd.f32 1.0, %v565_v53 }
 0x113   : >> { %2360 = vlog2.f32 %v571_v6  ;;  %v3111_v33 = vadd.f32 %v641_v30, %v3005_v23  ;;  %v575_v40 = vadd.f32 1.0, %v574_v31  ;;  %v577_v46 = vand.u32 2147483647, %v2357_v61 }
 0x114   : >> { %2362 = vpow2.f32 %v478_v19  ;;  %v567_v41 = vmul.f32 %v2355_v62, %v566_v38  ;;  %v3116_v23 = vadd.f32 %v3027_v39, %v432_v2  ;;  %vm569_vm0 = vcmp.lt.f32.partialorder %v568_v43, 0.0004427343 }
 0x115   : >> { %2364 = vpow2.f32 %v480_v28  ;;  %v669_v9 = vpack.c.bf16 %v3111_v33, %v3108_v32  ;;  %v576_v47 = vmul.f32 %v2357_v61, %v575_v40  ;;  %vm578_vm1 = vcmp.lt.f32.partialorder %v577_v46, 0.0004427343 }
 0x116   : >> { %v482_v55 = vmul.f32 1.442695, %v3116_v23  ;;  %vm454_vm10 = vcmp.gt.f32.partialorder %v3116_v23, 20.0 }
 0x117   : >> { %v439_v7 = vpop.f32.mrf.mxu3 }
 0x118   : >> { %v2359_v36 = vpop.eup %2358  ;;  %v3139_v30 = vadd.f32 %v3027_v39, %v439_v7 }
 0x119   : >> { %v2361_v42 = vpop.eup %2360  ;;  %v564_v45 = vmul.f32 0.6931472, %v2359_v36 }
 0x11a   : >> { %759 = vmatmul.bf16.gmra.mxu1 %v668_v57  ;;  %v2363_v44 = vpop.eup %2362  ;;  %v573_v22 = vmul.f32 0.6931472, %v2361_v42  ;;  %v488_v40 = vmul.f32 1.442695, %v3139_v30  ;;  %vm457_vm15 = vcmp.gt.f32.partialorder %v3139_v30, 20.0 }
 0x11b   : >> { %v2365_v37 = vpop.eup %2364  ;;  %v580_v48 = vadd.f32 1.0, %v2363_v44  ;;  %v570_v52 = vsel %vm569_vm0, %v567_v41, %v564_v45  ;;  %v583_v62 = vmul.f32 -0.5, %v2363_v44  ;;  %v586_v5 = vand.u32 2147483647, %v2363_v44 }
 0x11c   : >> { %v589_v49 = vadd.f32 1.0, %v2365_v37  ;;  %v579_v54 = vsel %vm578_vm1, %v576_v47, %v573_v22  ;;  %v642_v59 = vsel %vm450_vm2, %v3076_v20, %v570_v52  ;;  %v592_v60 = vmul.f32 -0.5, %v2365_v37 }
 0x11d   : >> { %2366 = vlog2.f32 %v580_v48  ;;  %v643_v57 = vsel %vm451_vm3, %v3079_v21, %v579_v54  ;;  %v3128_v61 = vadd.f32 %v642_v59, %v2976_v12  ;;  %v584_v10 = vadd.f32 1.0, %v583_v62 }
 0x11e   : >> { %2368 = vlog2.f32 %v589_v49  ;;  %v3131_v63 = vadd.f32 %v643_v57, %v2979_v13  ;;  %v593_v1 = vadd.f32 1.0, %v592_v60  ;;  %v595_v6 = vand.u32 2147483647, %v2365_v37 }
 0x11f   : >> { %2370 = vpow2.f32 %v482_v55  ;;  %v585_v28 = vmul.f32 %v2363_v44, %v584_v10  ;;  %v3136_v13 = vadd.f32 %v3027_v39, %v437_v56  ;;  %vm587_vm4 = vcmp.lt.f32.partialorder %v586_v5, 0.0004427343 }
 0x120   : >> { %2372 = vpow2.f32 %v484_v58  ;;  %v670_v20 = vpack.c.bf16 %v3131_v63, %v3128_v61  ;;  %v594_v29 = vmul.f32 %v2365_v37, %v593_v1  ;;  %vm596_vm5 = vcmp.lt.f32.partialorder %v595_v6, 0.0004427343 }
 0x121   : >> { %v486_v38 = vmul.f32 1.442695, %v3136_v13  ;;  %vm456_vm14 = vcmp.gt.f32.partialorder %v3136_v13, 20.0 }
 0x123   : >> { %v2367_v0 = vpop.eup %2366 }
 0x124   : >> { %v2369_v2 = vpop.eup %2368  ;;  %v582_v19 = vmul.f32 0.6931472, %v2367_v0 }
 0x125   : >> { %v2371_v21 = vpop.eup %2370  ;;  %v591_v12 = vmul.f32 0.6931472, %v2369_v2 }
 0x126   : >> { %v2373_v18 = vpop.eup %2372  ;;  %v598_v53 = vadd.f32 1.0, %v2371_v21  ;;  %v588_v4 = vsel %vm587_vm4, %v585_v28, %v582_v19  ;;  %v601_v39 = vmul.f32 -0.5, %v2371_v21  ;;  %v604_v47 = vand.u32 2147483647, %v2371_v21 }
 0x127   : >> { %v607_v31 = vadd.f32 1.0, %v2373_v18  ;;  %v597_v36 = vsel %vm596_vm5, %v594_v29, %v591_v12  ;;  %v644_v42 = vsel %vm452_vm6, %v3096_v11, %v588_v4  ;;  %v610_v46 = vmul.f32 -0.5, %v2373_v18  ;;  %v2184_v12 = vld [vmem:[#allocation5 + $0xb8] sm:$0xff] }
 0x128   : >> { %2374 = vlog2.f32 %v598_v53  ;;  %v645_v43 = vsel %vm453_vm7, %v3099_v3, %v597_v36  ;;  %v602_v45 = vadd.f32 1.0, %v601_v39  ;;  %v613_v48 = vand.u32 2147483647, %v2373_v18  ;;  %1089 = vmatpush.bf16.msrb.mxu2 %v2184_v12 }
 0x129   : >> { %2376 = vlog2.f32 %v607_v31  ;;  %v3151_v44 = vadd.f32 %v645_v43, %v3011_v25  ;;  %v611_v41 = vadd.f32 1.0, %v610_v46  ;;  %vm605_vm8 = vcmp.lt.f32.partialorder %v604_v47, 0.0004427343  ;;  %v2183_v31 = vld [vmem:[#allocation5 + $0xb0] sm:$0xff]  ;;  %v2180_v43 = vld [vmem:[#allocation5 + $0x98] sm:$0xff] }
 0x12a   : >> { %764 = vmatmul.bf16.gmra.mxu1 %v669_v9  ;;  %2378 = vpow2.f32 %v486_v38  ;;  %v3148_v9 = vadd.f32 %v644_v42, %v3008_v24  ;;  %v603_v54 = vmul.f32 %v2371_v21, %v602_v45  ;;  %vm614_vm9 = vcmp.lt.f32.partialorder %v613_v48, 0.0004427343  ;;  %v2182_v38 = vld [vmem:[#allocation5 + $0xa8] sm:$0xff]  ;;  %v2181_v42 = vld [vmem:[#allocation5 + $0xa0] sm:$0xff] }
 0x12b   : >> { %2380 = vpow2.f32 %v488_v40  ;;  %v612_v24 = vmul.f32 %v2373_v18, %v611_v41 }
 0x12c   : >> { %v671_v11 = vpack.c.bf16 %v3151_v44, %v3148_v9  ;;  %1090 = vmatpush.bf16.msrb.mxu2 %v2183_v31 }
 0x12e   : >> { %v2375_v37 = vpop.eup %2374 }
 0x12f   : >> { %v2377_v22 = vpop.eup %2376  ;;  %v600_v52 = vmul.f32 0.6931472, %v2375_v37  ;;  %v2177_v37 = vld [vmem:[#allocation5 + $0x80] sm:$0xff] }
 0x130   : >> { %v2379_v3 = vpop.eup %2378  ;;  %v609_v55 = vmul.f32 0.6931472, %v2377_v22  ;;  %1091 = vmatpush.bf16.msrb.mxu2 %v2182_v38 }
 0x131   : >> { %v2381_v49 = vpop.eup %2380  ;;  %v616_v25 = vadd.f32 1.0, %v2379_v3  ;;  %v606_v58 = vsel %vm605_vm8, %v603_v54, %v600_v52  ;;  %v619_v60 = vmul.f32 -0.5, %v2379_v3  ;;  %v622_v21 = vand.u32 2147483647, %v2379_v3 }
 0x132   : >> { %v625_v56 = vadd.f32 1.0, %v2381_v49  ;;  %v615_v59 = vsel %vm614_vm9, %v612_v24, %v609_v55  ;;  %v646_v57 = vsel %vm454_vm10, %v3116_v23, %v606_v58  ;;  %v628_v0 = vmul.f32 -0.5, %v2381_v49 }
 0x133   : >> { %2382 = vlog2.f32 %v616_v25  ;;  %v647_v62 = vsel %vm455_vm11, %v3119_v8, %v615_v59  ;;  %v3160_v10 = vadd.f32 %v646_v57, %v2982_v14  ;;  %v620_v5 = vadd.f32 1.0, %v619_v60 }
 0x134   : >> { %2384 = vlog2.f32 %v625_v56  ;;  %v3163_v1 = vadd.f32 %v647_v62, %v2985_v15  ;;  %v629_v6 = vadd.f32 1.0, %v628_v0  ;;  %v631_v7 = vand.u32 2147483647, %v2381_v49  ;;  %1092 = vmatpush.bf16.msrb.mxu2 %v2181_v42 }
 0x135   : >> { %v621_v18 = vmul.f32 %v2379_v3, %v620_v5  ;;  %vm623_vm12 = vcmp.lt.f32.partialorder %v622_v21, 0.0004427343 }
 0x136   : >> { %v672_v23 = vpack.c.bf16 %v3163_v1, %v3160_v10  ;;  %v630_v28 = vmul.f32 %v2381_v49, %v629_v6  ;;  %vm632_vm13 = vcmp.lt.f32.partialorder %v631_v7, 0.0004427343 }
 0x138   : >> { %1093 = vmatpush.bf16.msrb.mxu2 %v2180_v43 }
 0x139   : >> { %v2383_v2 = vpop.eup %2382 }
 0x13a   : >> { %769 = vmatmul.bf16.gmra.mxu1 %v670_v20  ;;  %v2385_v20 = vpop.eup %2384  ;;  %v618_v8 = vmul.f32 0.6931472, %v2383_v2 }
 0x13b   : >> { %v627_v19 = vmul.f32 0.6931472, %v2385_v20 }
 0x13c   : >> { %v624_v14 = vsel %vm623_vm12, %v621_v18, %v618_v8 }
 0x13d   : >> { %v633_v15 = vsel %vm632_vm13, %v630_v28, %v627_v19  ;;  %v648_v29 = vsel %vm456_vm14, %v3136_v13, %v624_v14  ;;  %v2179_v13 = vld [vmem:[#allocation5 + $0x90] sm:$0xff] }
 0x13e   : >> { %v649_v53 = vsel %vm457_vm15, %v3139_v30, %v633_v15  ;;  %v3172_v4 = vadd.f32 %v648_v29, %v3014_v26  ;;  %v3179_v30 = vld [vmem:[#allocation7 + $0x1] ss:$0 sm:$0xff]  ;;  %1094 = vmatpush.bf16.msrb.mxu2 %v2179_v13  ;;  %v2178_v26 = vld [vmem:[#allocation5 + $0x88] sm:$0xff] }
 0x13f   : >> { %v3175_v36 = vadd.f32 %v649_v53, %v3017_v27 }
 0x141   : >> { %v673_v40 = vpack.c.bf16 %v3175_v36, %v3172_v4 }
 0x142   : >> { %1095 = vmatpush.bf16.msrb.mxu2 %v2178_v26 }
 0x146   : >> { %1096 = vmatpush.bf16.msrb.mxu2 %v2177_v37 }
 0x14a   : >> { %774 = vmatmul.bf16.gmra.mxu1 %v671_v11 }
 0x15a   : >> { %779 = vmatmul.bf16.gmra.mxu1 %v672_v23 }
 0x16a   : >> { %784 = vmatmul.bf16.gmra.mxu1 %v673_v40 }
 0x177   : >> { %v750_v39 = vpop.f32.mrf.mxu1 }
 0x178   : >> { %v751_v27 = vadd.f32 %v3179_v30, %v750_v39 }
 0x17a   : >> { %v806_v46 = vmul.f32 1.442695, %v751_v27  ;;  %vm790_vm1 = vcmp.gt.f32.partialorder %v751_v27, 20.0 }
 0x17c   : >> { %2386 = vpow2.f32 %v806_v46 }
 0x17f   : >> { %v752_v45 = vpop.f32.mrf.mxu1 }
 0x180   : >> { %v753_v41 = vadd.f32 %v3179_v30, %v752_v45 }
 0x182   : >> { %v2387_v22 = vpop.eup %2386  ;;  %v808_v47 = vmul.f32 1.442695, %v753_v41  ;;  %vm791_vm3 = vcmp.gt.f32.partialorder %v753_v41, 20.0 }
 0x183   : >> { %v838_v48 = vadd.f32 1.0, %v2387_v22  ;;  %v841_v3 = vmul.f32 -0.5, %v2387_v22  ;;  %v844_v58 = vand.u32 2147483647, %v2387_v22 }
 0x184   : >> { %2388 = vpow2.f32 %v808_v47 }
 0x185   : >> { %2390 = vlog2.f32 %v838_v48  ;;  %v842_v25 = vadd.f32 1.0, %v841_v3  ;;  %vm845_vm0 = vcmp.lt.f32.partialorder %v844_v58, 0.0004427343 }
 0x187   : >> { %v755_v11 = vpop.f32.mrf.mxu1  ;;  %v843_v62 = vmul.f32 %v2387_v22, %v842_v25 }
 0x188   : >> { %v3184_v49 = vadd.f32 %v3179_v30, %v755_v11 }
 0x18a   : >> { %v2389_v52 = vpop.eup %2388  ;;  %v810_v54 = vmul.f32 1.442695, %v3184_v49  ;;  %vm792_vm5 = vcmp.gt.f32.partialorder %v3184_v49, 20.0 }
 0x18b   : >> { %v2391_v55 = vpop.eup %2390  ;;  %v847_v24 = vadd.f32 1.0, %v2389_v52  ;;  %v850_v56 = vmul.f32 -0.5, %v2389_v52  ;;  %v853_v2 = vand.u32 2147483647, %v2389_v52 }
 0x18c   : >> { %2392 = vpow2.f32 %v810_v54  ;;  %v840_v59 = vmul.f32 0.6931472, %v2391_v55 }
 0x18d   : >> { %2394 = vlog2.f32 %v847_v24  ;;  %v851_v60 = vadd.f32 1.0, %v850_v56  ;;  %vm854_vm2 = vcmp.lt.f32.partialorder %v853_v2, 0.0004427343 }
 0x18e   : >> { %v846_v6 = vsel %vm845_vm0, %v843_v62, %v840_v59 }
 0x18f   : >> { %v757_v57 = vpop.f32.mrf.mxu1  ;;  %v852_v8 = vmul.f32 %v2389_v52, %v851_v60  ;;  %v982_v18 = vsel %vm790_vm1, %v751_v27, %v846_v6 }
 0x190   : >> { %v758_v0 = vadd.f32 %v3179_v30, %v757_v57  ;;  %v3192_v12 = vadd.f32 %v982_v18, %v3048_v34 }
 0x192   : >> { %v2393_v5 = vpop.eup %2392  ;;  %v812_v20 = vmul.f32 1.442695, %v758_v0  ;;  %vm793_vm7 = vcmp.gt.f32.partialorder %v758_v0, 20.0 }
 0x193   : >> { %v2395_v21 = vpop.eup %2394  ;;  %v856_v7 = vadd.f32 1.0, %v2393_v5  ;;  %v859_v53 = vmul.f32 -0.5, %v2393_v5  ;;  %v862_v39 = vand.u32 2147483647, %v2393_v5 }
 0x194   : >> { %v849_v23 = vmul.f32 0.6931472, %v2395_v21  ;;  %2396 = vpow2.f32 %v812_v20 }
 0x195   : >> { %2398 = vlog2.f32 %v856_v7  ;;  %v860_v13 = vadd.f32 1.0, %v859_v53  ;;  %vm863_vm4 = vcmp.lt.f32.partialorder %v862_v39, 0.0004427343 }
 0x196   : >> { %v855_v19 = vsel %vm854_vm2, %v852_v8, %v849_v23 }
 0x197   : >> { %v983_v28 = vsel %vm791_vm3, %v753_v41, %v855_v19  ;;  %v760_v14 = vpop.f32.mrf.mxu1  ;;  %v861_v46 = vmul.f32 %v2393_v5, %v860_v13 }
 0x198   : >> { %v3189_v15 = vadd.f32 %v3179_v30, %v760_v14  ;;  %v3195_v29 = vadd.f32 %v983_v28, %v3051_v35 }
 0x19a   : >> { %v2397_v31 = vpop.eup %2396  ;;  %v814_v38 = vmul.f32 1.442695, %v3189_v15  ;;  %v1014_v40 = vpack.c.bf16 %v3195_v29, %v3192_v12  ;;  %vm794_vm9 = vcmp.gt.f32.partialorder %v3189_v15, 20.0 }
 0x19b   : >> { %v2399_v42 = vpop.eup %2398  ;;  %v865_v43 = vadd.f32 1.0, %v2397_v31  ;;  %v868_v26 = vmul.f32 -0.5, %v2397_v31  ;;  %v871_v45 = vand.u32 2147483647, %v2397_v31 }
 0x19c   : >> { %2400 = vpow2.f32 %v814_v38  ;;  %1097 = vmatmul.bf16.vlgmr.msrb.gmra.mxu2 %v1014_v40  ;;  %v858_v34 = vmul.f32 0.6931472, %v2399_v42 }
 0x19d   : >> { %2402 = vlog2.f32 %v865_v43  ;;  %v869_v37 = vadd.f32 1.0, %v868_v26  ;;  %vm872_vm6 = vcmp.lt.f32.partialorder %v871_v45, 0.0004427343 }
 0x19e   : >> { %v864_v47 = vsel %vm863_vm4, %v861_v46, %v858_v34 }
 0x19f   : >> { %v762_v27 = vpop.f32.mrf.mxu1  ;;  %v870_v52 = vmul.f32 %v2397_v31, %v869_v37  ;;  %v984_v54 = vsel %vm792_vm5, %v3184_v49, %v864_v47 }
 0x1a0   : >> { %v763_v35 = vadd.f32 %v3179_v30, %v762_v27  ;;  %v3207_v58 = vadd.f32 %v984_v54, %v3068_v16 }
 0x1a2   : >> { %v2401_v41 = vpop.eup %2400  ;;  %v816_v22 = vmul.f32 1.442695, %v763_v35  ;;  %vm795_vm11 = vcmp.gt.f32.partialorder %v763_v35, 20.0 }
 0x1a3   : >> { %v2403_v48 = vpop.eup %2402  ;;  %v874_v11 = vadd.f32 1.0, %v2401_v41  ;;  %v877_v57 = vmul.f32 -0.5, %v2401_v41  ;;  %v880_v20 = vand.u32 2147483647, %v2401_v41 }
 0x1a4   : >> { %2404 = vpow2.f32 %v816_v22  ;;  %v867_v3 = vmul.f32 0.6931472, %v2403_v48 }
 0x1a5   : >> { %2406 = vlog2.f32 %v874_v11  ;;  %vm881_vm8 = vcmp.lt.f32.partialorder %v880_v20, 0.0004427343 }
 0x1a6   : >> { %v873_v55 = vsel %vm872_vm6, %v870_v52, %v867_v3 }
 0x1a7   : >> { %v765_v24 = vpop.f32.mrf.mxu1  ;;  %v985_v25 = vsel %vm793_vm7, %v758_v0, %v873_v55  ;;  %v878_v0 = vadd.f32 1.0, %v877_v57 }
 0x1a8   : >> { %v3204_v56 = vadd.f32 %v3179_v30, %v765_v24  ;;  %v3210_v59 = vadd.f32 %v985_v25, %v3071_v17 }
 0x1a9   : >> { %v879_v7 = vmul.f32 %v2401_v41, %v878_v0 }
 0x1aa   : >> { %v2405_v62 = vpop.eup %2404  ;;  %v818_v60 = vmul.f32 1.442695, %v3204_v56  ;;  %v1015_v49 = vpack.c.bf16 %v3210_v59, %v3207_v58  ;;  %vm796_vm13 = vcmp.gt.f32.partialorder %v3204_v56, 20.0 }
 0x1ab   : >> { %v2407_v2 = vpop.eup %2406  ;;  %v883_v5 = vadd.f32 1.0, %v2405_v62  ;;  %v886_v6 = vmul.f32 -0.5, %v2405_v62  ;;  %v889_v8 = vand.u32 2147483647, %v2405_v62 }
 0x1ac   : >> { %2408 = vpow2.f32 %v818_v60  ;;  %1102 = vmatmul.bf16.gmra.mxu2 %v1015_v49  ;;  %v876_v16 = vmul.f32 0.6931472, %v2407_v2 }
 0x1ad   : >> { %2410 = vlog2.f32 %v883_v5  ;;  %v887_v23 = vadd.f32 1.0, %v886_v6  ;;  %vm890_vm10 = vcmp.lt.f32.partialorder %v889_v8, 0.0004427343 }
 0x1ae   : >> { %v882_v28 = vsel %vm881_vm8, %v879_v7, %v876_v16 }
 0x1af   : >> { %v767_v21 = vpop.f32.mrf.mxu1  ;;  %v888_v38 = vmul.f32 %v2405_v62, %v887_v23  ;;  %v986_v40 = vsel %vm794_vm9, %v3189_v15, %v882_v28 }
 0x1b0   : >> { %v768_v17 = vadd.f32 %v3179_v30, %v767_v21  ;;  %v3222_v39 = vadd.f32 %v986_v40, %v3088_v50 }
 0x1b2   : >> { %v2409_v18 = vpop.eup %2408  ;;  %v820_v19 = vmul.f32 1.442695, %v768_v17  ;;  %vm797_vm15 = vcmp.gt.f32.partialorder %v768_v17, 20.0 }
 0x1b3   : >> { %v2411_v14 = vpop.eup %2410  ;;  %v892_v53 = vadd.f32 1.0, %v2409_v18  ;;  %v895_v27 = vmul.f32 -0.5, %v2409_v18  ;;  %v898_v47 = vand.u32 2147483647, %v2409_v18 }
 0x1b4   : >> { %2412 = vpow2.f32 %v820_v19  ;;  %v885_v31 = vmul.f32 0.6931472, %v2411_v14 }
 0x1b5   : >> { %2414 = vlog2.f32 %v892_v53  ;;  %vm899_vm12 = vcmp.lt.f32.partialorder %v898_v47, 0.0004427343 }
 0x1b6   : >> { %v891_v42 = vsel %vm890_vm10, %v888_v38, %v885_v31 }
 0x1b7   : >> { %v770_v43 = vpop.f32.mrf.mxu1  ;;  %v987_v13 = vsel %vm795_vm11, %v763_v35, %v891_v42  ;;  %v896_v35 = vadd.f32 1.0, %v895_v27 }
 0x1b8   : >> { %v3219_v26 = vadd.f32 %v3179_v30, %v770_v43  ;;  %v3225_v34 = vadd.f32 %v987_v13, %v3091_v51 }
 0x1b9   : >> { %v897_v11 = vmul.f32 %v2409_v18, %v896_v35 }
 0x1ba   : >> { %v2413_v46 = vpop.eup %2412  ;;  %v822_v37 = vmul.f32 1.442695, %v3219_v26  ;;  %v1016_v15 = vpack.c.bf16 %v3225_v34, %v3222_v39  ;;  %vm798_vm1 = vcmp.gt.f32.partialorder %v3219_v26, 20.0 }
 0x1bb   : >> { %v2415_v45 = vpop.eup %2414  ;;  %v901_v41 = vadd.f32 1.0, %v2413_v46  ;;  %v904_v22 = vmul.f32 -0.5, %v2413_v46  ;;  %v907_v52 = vand.u32 2147483647, %v2413_v46 }
 0x1bc   : >> { %2416 = vpow2.f32 %v822_v37  ;;  %1107 = vmatmul.bf16.gmra.mxu2 %v1016_v15  ;;  %v894_v50 = vmul.f32 0.6931472, %v2415_v45 }
 0x1bd   : >> { %2418 = vlog2.f32 %v901_v41  ;;  %v905_v3 = vadd.f32 1.0, %v904_v22  ;;  %vm908_vm14 = vcmp.lt.f32.partialorder %v907_v52, 0.0004427343 }
 0x1be   : >> { %v900_v24 = vsel %vm899_vm12, %v897_v11, %v894_v50 }
 0x1bf   : >> { %v772_v48 = vpop.f32.mrf.mxu1  ;;  %v906_v60 = vmul.f32 %v2413_v46, %v905_v3  ;;  %v988_v49 = vsel %vm796_vm13, %v3204_v56, %v900_v24 }
 0x1c0   : >> { %v773_v51 = vadd.f32 %v3179_v30, %v772_v48  ;;  %v3237_v20 = vadd.f32 %v988_v49, %v3108_v32 }
 0x1c2   : >> { %v2417_v54 = vpop.eup %2416  ;;  %v824_v55 = vmul.f32 1.442695, %v773_v51  ;;  %vm799_vm3 = vcmp.gt.f32.partialorder %v773_v51, 20.0 }
 0x1c3   : >> { %v2419_v25 = vpop.eup %2418  ;;  %v910_v57 = vadd.f32 1.0, %v2417_v54  ;;  %v913_v21 = vmul.f32 -0.5, %v2417_v54  ;;  %v916_v28 = vand.u32 2147483647, %v2417_v54 }
 0x1c4   : >> { %2420 = vpow2.f32 %v824_v55  ;;  %v903_v62 = vmul.f32 0.6931472, %v2419_v25 }
 0x1c5   : >> { %2422 = vlog2.f32 %v910_v57  ;;  %vm917_vm0 = vcmp.lt.f32.partialorder %v916_v28, 0.0004427343 }
 0x1c6   : >> { %v909_v2 = vsel %vm908_vm14, %v906_v60, %v903_v62 }
 0x1c7   : >> { %v775_v5 = vpop.f32.mrf.mxu1  ;;  %v989_v0 = vsel %vm797_vm15, %v768_v17, %v909_v2  ;;  %v914_v17 = vadd.f32 1.0, %v913_v21 }
 0x1c8   : >> { %v3234_v6 = vadd.f32 %v3179_v30, %v775_v5  ;;  %v3240_v16 = vadd.f32 %v989_v0, %v3111_v33 }
 0x1c9   : >> { %v915_v53 = vmul.f32 %v2417_v54, %v914_v17 }
 0x1ca   : >> { %v2421_v7 = vpop.eup %2420  ;;  %v826_v23 = vmul.f32 1.442695, %v3234_v6  ;;  %v1017_v56 = vpack.c.bf16 %v3240_v16, %v3237_v20  ;;  %vm800_vm5 = vcmp.gt.f32.partialorder %v3234_v6, 20.0 }
 0x1cb   : >> { %v2423_v8 = vpop.eup %2422  ;;  %v919_v18 = vadd.f32 1.0, %v2421_v7  ;;  %v922_v19 = vmul.f32 -0.5, %v2421_v7  ;;  %v925_v38 = vand.u32 2147483647, %v2421_v7 }
 0x1cc   : >> { %2424 = vpow2.f32 %v826_v23  ;;  %1112 = vmatmul.bf16.gmra.mxu2 %v1017_v56  ;;  %v912_v32 = vmul.f32 0.6931472, %v2423_v8 }
 0x1cd   : >> { %2426 = vlog2.f32 %v919_v18  ;;  %v923_v31 = vadd.f32 1.0, %v922_v19  ;;  %vm926_vm2 = vcmp.lt.f32.partialorder %v925_v38, 0.0004427343 }
 0x1ce   : >> { %v918_v43 = vsel %vm917_vm0, %v915_v53, %v912_v32 }
 0x1cf   : >> { %v777_v14 = vpop.f32.mrf.mxu1  ;;  %v924_v37 = vmul.f32 %v2421_v7, %v923_v31  ;;  %v990_v15 = vsel %vm798_vm1, %v3219_v26, %v918_v43 }
 0x1d0   : >> { %v778_v33 = vadd.f32 %v3179_v30, %v777_v14  ;;  %v3252_v47 = vadd.f32 %v990_v15, %v3128_v61 }
 0x1d2   : >> { %v2425_v40 = vpop.eup %2424  ;;  %v828_v42 = vmul.f32 1.442695, %v778_v33  ;;  %vm801_vm7 = vcmp.gt.f32.partialorder %v778_v33, 20.0 }
 0x1d3   : >> { %v2427_v13 = vpop.eup %2426  ;;  %v928_v27 = vadd.f32 1.0, %v2425_v40  ;;  %v931_v48 = vmul.f32 -0.5, %v2425_v40  ;;  %v934_v24 = vand.u32 2147483647, %v2425_v40 }
 0x1d4   : >> { %2428 = vpow2.f32 %v828_v42  ;;  %v921_v46 = vmul.f32 0.6931472, %v2427_v13 }
 0x1d5   : >> { %2430 = vlog2.f32 %v928_v27  ;;  %vm935_vm4 = vcmp.lt.f32.partialorder %v934_v24, 0.0004427343 }
 0x1d6   : >> { %v927_v45 = vsel %vm926_vm2, %v924_v37, %v921_v46 }
 0x1d7   : >> { %v780_v41 = vpop.f32.mrf.mxu1  ;;  %v991_v35 = vsel %vm799_vm3, %v773_v51, %v927_v45  ;;  %v932_v51 = vadd.f32 1.0, %v931_v48 }
 0x1d8   : >> { %v3249_v22 = vadd.f32 %v3179_v30, %v780_v41  ;;  %v3255_v50 = vadd.f32 %v991_v35, %v3131_v63 }
 0x1d9   : >> { %v933_v57 = vmul.f32 %v2425_v40, %v932_v51 }
 0x1da   : >> { %v2429_v11 = vpop.eup %2428  ;;  %v830_v3 = vmul.f32 1.442695, %v3249_v22  ;;  %v1018_v26 = vpack.c.bf16 %v3255_v50, %v3252_v47  ;;  %vm802_vm9 = vcmp.gt.f32.partialorder %v3249_v22, 20.0 }
 0x1db   : >> { %v2431_v52 = vpop.eup %2430  ;;  %v937_v54 = vadd.f32 1.0, %v2429_v11  ;;  %v940_v55 = vmul.f32 -0.5, %v2429_v11  ;;  %v943_v60 = vand.u32 2147483647, %v2429_v11 }
 0x1dc   : >> { %2432 = vpow2.f32 %v830_v3  ;;  %1117 = vmatmul.bf16.gmra.mxu2 %v1018_v26  ;;  %v930_v61 = vmul.f32 0.6931472, %v2431_v52 }
 0x1dd   : >> { %2434 = vlog2.f32 %v937_v54  ;;  %v941_v62 = vadd.f32 1.0, %v940_v55  ;;  %vm944_vm6 = vcmp.lt.f32.partialorder %v943_v60, 0.0004427343 }
 0x1de   : >> { %v936_v5 = vsel %vm935_vm4, %v933_v57, %v930_v61 }
 0x1df   : >> { %v782_v25 = vpop.f32.mrf.mxu1  ;;  %v942_v23 = vmul.f32 %v2429_v11, %v941_v62  ;;  %v992_v56 = vsel %vm800_vm5, %v3234_v6, %v936_v5 }
 0x1e0   : >> { %v783_v63 = vadd.f32 %v3179_v30, %v782_v25  ;;  %v3265_v28 = vadd.f32 %v992_v56, %v3148_v9  ;;  %v2192_v56 = vld [vmem:[#allocation5 + $0xf8] sm:$0xff] }
 0x1e1   : >> { %1437 = vmatpush.bf16.msrb.mxu3 %v2192_v56 }
 0x1e2   : >> { %v2433_v49 = vpop.eup %2432  ;;  %v832_v2 = vmul.f32 1.442695, %v783_v63  ;;  %vm803_vm11 = vcmp.gt.f32.partialorder %v783_v63, 20.0 }
 0x1e3   : >> { %v2435_v0 = vpop.eup %2434  ;;  %v946_v21 = vadd.f32 1.0, %v2433_v49  ;;  %v949_v14 = vmul.f32 -0.5, %v2433_v49  ;;  %v952_v43 = vand.u32 2147483647, %v2433_v49 }
 0x1e4   : >> { %2436 = vpow2.f32 %v832_v2  ;;  %v939_v7 = vmul.f32 0.6931472, %v2435_v0 }
 0x1e5   : >> { %2438 = vlog2.f32 %v946_v21  ;;  %v950_v42 = vadd.f32 1.0, %v949_v14  ;;  %vm953_vm8 = vcmp.lt.f32.partialorder %v952_v43, 0.0004427343  ;;  %v2185_v43 = vld [vmem:[#allocation5 + $0xc0] sm:$0xff] }
 0x1e6   : >> { %v945_v8 = vsel %vm944_vm6, %v942_v23, %v939_v7 }
 0x1e7   : >> { %v785_v18 = vpop.f32.mrf.mxu1  ;;  %v993_v17 = vsel %vm801_vm7, %v778_v33, %v945_v8 }
 0x1e8   : >> { %v786_v19 = vadd.f32 %v3179_v30, %v785_v18  ;;  %v3268_v32 = vadd.f32 %v993_v17, %v3151_v44  ;;  %v951_v44 = vmul.f32 %v2433_v49, %v950_v42 }
 0x1ea   : >> { %v2437_v53 = vpop.eup %2436  ;;  %v834_v31 = vmul.f32 1.442695, %v786_v19  ;;  %v1019_v38 = vpack.c.bf16 %v3268_v32, %v3265_v28  ;;  %vm804_vm13 = vcmp.gt.f32.partialorder %v786_v19, 20.0 }
 0x1eb   : >> { %v2439_v6 = vpop.eup %2438  ;;  %v955_v40 = vadd.f32 1.0, %v2437_v53  ;;  %v958_v33 = vmul.f32 -0.5, %v2437_v53  ;;  %v961_v37 = vand.u32 2147483647, %v2437_v53 }
 0x1ec   : >> { %2440 = vpow2.f32 %v834_v31  ;;  %1122 = vmatmul.bf16.gmra.mxu2 %v1019_v38  ;;  %v948_v13 = vmul.f32 0.6931472, %v2439_v6  ;;  %v2190_v31 = vld [vmem:[#allocation5 + $0xe8] sm:$0xff]  ;;  %v2188_v38 = vld [vmem:[#allocation5 + $0xd8] sm:$0xff]  ;;  %v2187_v6 = vld [vmem:[#allocation5 + $0xd0] sm:$0xff] }
 0x1ed   : >> { %2442 = vlog2.f32 %v955_v40  ;;  %v959_v46 = vadd.f32 1.0, %v958_v33  ;;  %vm962_vm10 = vcmp.lt.f32.partialorder %v961_v37, 0.0004427343  ;;  %v3291_v40 = vld [vmem:[#allocation7 + $0x2] ss:$0 sm:$0xff] }
 0x1ee   : >> { %v954_v41 = vsel %vm953_vm8, %v951_v44, %v948_v13 }
 0x1ef   : >> { %v787_v9 = vpop.f32.mrf.mxu1  ;;  %v960_v3 = vmul.f32 %v2437_v53, %v959_v46  ;;  %v994_v26 = vsel %vm802_vm9, %v3249_v22, %v954_v41  ;;  %v2191_v53 = vld [vmem:[#allocation5 + $0xf0] sm:$0xff] }
 0x1f0   : >> { %v788_v27 = vadd.f32 %v3179_v30, %v787_v9  ;;  %v3276_v54 = vadd.f32 %v994_v26, %v3160_v10  ;;  %1438 = vmatpush.bf16.msrb.mxu3 %v2191_v53 }
 0x1f2   : >> { %v2441_v15 = vpop.eup %2440  ;;  %v836_v45 = vmul.f32 1.442695, %v788_v27  ;;  %vm805_vm15 = vcmp.gt.f32.partialorder %v788_v27, 20.0 }
 0x1f3   : >> { %v2443_v35 = vpop.eup %2442  ;;  %v964_v48 = vadd.f32 1.0, %v2441_v15  ;;  %v967_v55 = vmul.f32 -0.5, %v2441_v15  ;;  %v970_v60 = vand.u32 2147483647, %v2441_v15 }
 0x1f4   : >> { %2444 = vpow2.f32 %v836_v45  ;;  %v957_v11 = vmul.f32 0.6931472, %v2443_v35  ;;  %1439 = vmatpush.bf16.msrb.mxu3 %v2190_v31 }
 0x1f5   : >> { %2446 = vlog2.f32 %v964_v48  ;;  %v968_v62 = vadd.f32 1.0, %v967_v55  ;;  %vm971_vm12 = vcmp.lt.f32.partialorder %v970_v60, 0.0004427343 }
 0x1f6   : >> { %v963_v30 = vsel %vm962_vm10, %v960_v3, %v957_v11 }
 0x1f7   : >> { %v995_v52 = vsel %vm803_vm11, %v783_v63, %v963_v30  ;;  %v969_v63 = vmul.f32 %v2441_v15, %v968_v62 }
 0x1f8   : >> { %v3279_v51 = vadd.f32 %v995_v52, %v3163_v1 }
 0x1fa   : >> { %v2445_v24 = vpop.eup %2444  ;;  %v1020_v61 = vpack.c.bf16 %v3279_v51, %v3276_v54 }
 0x1fb   : >> { %v2447_v25 = vpop.eup %2446  ;;  %v973_v57 = vadd.f32 1.0, %v2445_v24  ;;  %v976_v22 = vmul.f32 -0.5, %v2445_v24  ;;  %v979_v10 = vand.u32 2147483647, %v2445_v24 }
 0x1fc   : >> { %1127 = vmatmul.bf16.gmra.mxu2 %v1020_v61  ;;  %v966_v49 = vmul.f32 0.6931472, %v2447_v25 }
 0x1fd   : >> { %2448 = vlog2.f32 %v973_v57  ;;  %v977_v2 = vadd.f32 1.0, %v976_v22  ;;  %vm980_vm14 = vcmp.lt.f32.partialorder %v979_v10, 0.0004427343 }
 0x1fe   : >> { %v972_v5 = vsel %vm971_vm12, %v969_v63, %v966_v49 }
 0x1ff   : >> { %v978_v21 = vmul.f32 %v2445_v24, %v977_v2  ;;  %v996_v7 = vsel %vm804_vm13, %v786_v19, %v972_v5  ;;  %v2189_v19 = vld [vmem:[#allocation5 + $0xe0] sm:$0xff] }
 0x200   : >> { %v3284_v18 = vadd.f32 %v996_v7, %v3172_v4  ;;  %1440 = vmatpush.bf16.msrb.mxu3 %v2189_v19  ;;  %v2186_v4 = vld [vmem:[#allocation5 + $0xc8] sm:$0xff] }
 0x203   : >> { %v2449_v1 = vpop.eup %2448 }
 0x204   : >> { %v975_v0 = vmul.f32 0.6931472, %v2449_v1  ;;  %1441 = vmatpush.bf16.msrb.mxu3 %v2188_v38 }
 0x206   : >> { %v981_v23 = vsel %vm980_vm14, %v978_v21, %v975_v0 }
 0x207   : >> { %v997_v8 = vsel %vm805_vm15, %v788_v27, %v981_v23 }
 0x208   : >> { %v3287_v17 = vadd.f32 %v997_v8, %v3175_v36  ;;  %1442 = vmatpush.bf16.msrb.mxu3 %v2187_v6 }
 0x20a   : >> { %v1021_v14 = vpack.c.bf16 %v3287_v17, %v3284_v18 }
 0x20c   : >> { %1132 = vmatmul.bf16.gmra.mxu2 %v1021_v14  ;;  %1443 = vmatpush.bf16.msrb.mxu3 %v2186_v4 }
 0x210   : >> { %1444 = vmatpush.bf16.msrb.mxu3 %v2185_v43 }
 0x21f   : >> { %v1098_v36 = vpop.f32.mrf.mxu2 }
 0x220   : >> { %v1099_v42 = vadd.f32 %v3291_v40, %v1098_v36 }
 0x222   : >> { %v1154_v33 = vmul.f32 1.442695, %v1099_v42  ;;  %vm1138_vm1 = vcmp.gt.f32.partialorder %v1099_v42, 20.0 }
 0x224   : >> { %2450 = vpow2.f32 %v1154_v33 }
 0x227   : >> { %v1100_v13 = vpop.f32.mrf.mxu2 }
 0x228   : >> { %v1101_v9 = vadd.f32 %v3291_v40, %v1100_v13 }
 0x22a   : >> { %v2451_v27 = vpop.eup %2450  ;;  %v1156_v44 = vmul.f32 1.442695, %v1101_v9  ;;  %vm1139_vm3 = vcmp.gt.f32.partialorder %v1101_v9, 20.0 }
 0x22b   : >> { %v1186_v46 = vadd.f32 1.0, %v2451_v27  ;;  %v1189_v15 = vmul.f32 -0.5, %v2451_v27  ;;  %v1192_v30 = vand.u32 2147483647, %v2451_v27 }
 0x22c   : >> { %2452 = vpow2.f32 %v1156_v44 }
 0x22d   : >> { %2454 = vlog2.f32 %v1186_v46  ;;  %v1190_v3 = vadd.f32 1.0, %v1189_v15  ;;  %vm1193_vm0 = vcmp.lt.f32.partialorder %v1192_v30, 0.0004427343 }
 0x22f   : >> { %v1103_v37 = vpop.f32.mrf.mxu2  ;;  %v1191_v24 = vmul.f32 %v2451_v27, %v1190_v3 }
 0x230   : >> { %v3296_v45 = vadd.f32 %v3291_v40, %v1103_v37 }
 0x232   : >> { %v2453_v41 = vpop.eup %2452  ;;  %v1158_v35 = vmul.f32 1.442695, %v3296_v45  ;;  %vm1140_vm5 = vcmp.gt.f32.partialorder %v3296_v45, 20.0 }
 0x233   : >> { %v2455_v48 = vpop.eup %2454  ;;  %v1195_v11 = vadd.f32 1.0, %v2453_v41  ;;  %v1198_v26 = vmul.f32 -0.5, %v2453_v41  ;;  %v1201_v57 = vand.u32 2147483647, %v2453_v41 }
 0x234   : >> { %2456 = vpow2.f32 %v1158_v35  ;;  %v1188_v52 = vmul.f32 0.6931472, %v2455_v48 }
 0x235   : >> { %2458 = vlog2.f32 %v1195_v11  ;;  %v1199_v61 = vadd.f32 1.0, %v1198_v26  ;;  %vm1202_vm2 = vcmp.lt.f32.partialorder %v1201_v57, 0.0004427343 }
 0x236   : >> { %v1194_v22 = vsel %vm1193_vm0, %v1191_v24, %v1188_v52 }
 0x237   : >> { %v1105_v55 = vpop.f32.mrf.mxu2  ;;  %v1200_v10 = vmul.f32 %v2453_v41, %v1199_v61  ;;  %v1330_v5 = vsel %vm1138_vm1, %v1099_v42, %v1194_v22 }
 0x238   : >> { %v1106_v25 = vadd.f32 %v3291_v40, %v1105_v55  ;;  %v3304_v23 = vadd.f32 %v1330_v5, %v3192_v12 }
 0x23a   : >> { %v2457_v62 = vpop.eup %2456  ;;  %v1160_v60 = vmul.f32 1.442695, %v1106_v25  ;;  %vm1141_vm7 = vcmp.gt.f32.partialorder %v1106_v25, 20.0 }
 0x23b   : >> { %v2459_v49 = vpop.eup %2458  ;;  %v1204_v63 = vadd.f32 1.0, %v2457_v62  ;;  %v1207_v8 = vmul.f32 -0.5, %v2457_v62  ;;  %v1210_v36 = vand.u32 2147483647, %v2457_v62 }
 0x23c   : >> { %v1197_v2 = vmul.f32 0.6931472, %v2459_v49  ;;  %2460 = vpow2.f32 %v1160_v60 }
 0x23d   : >> { %2462 = vlog2.f32 %v1204_v63  ;;  %v1208_v6 = vadd.f32 1.0, %v1207_v8  ;;  %vm1211_vm4 = vcmp.lt.f32.partialorder %v1210_v36, 0.0004427343 }
 0x23e   : >> { %v1203_v1 = vsel %vm1202_vm2, %v1200_v10, %v1197_v2 }
 0x23f   : >> { %v1331_v0 = vsel %vm1139_vm3, %v1101_v9, %v1203_v1  ;;  %v1108_v21 = vpop.f32.mrf.mxu2  ;;  %v1209_v33 = vmul.f32 %v2457_v62, %v1208_v6 }
 0x240   : >> { %v3301_v7 = vadd.f32 %v3291_v40, %v1108_v21  ;;  %v3307_v56 = vadd.f32 %v1331_v0, %v3195_v29 }
 0x242   : >> { %v2461_v14 = vpop.eup %2460  ;;  %v1162_v53 = vmul.f32 1.442695, %v3301_v7  ;;  %v1362_v31 = vpack.c.bf16 %v3307_v56, %v3304_v23  ;;  %vm1142_vm9 = vcmp.gt.f32.partialorder %v3301_v7, 20.0 }
 0x243   : >> { %v2463_v19 = vpop.eup %2462  ;;  %v1213_v38 = vadd.f32 1.0, %v2461_v14  ;;  %v1216_v4 = vmul.f32 -0.5, %v2461_v14  ;;  %v1219_v13 = vand.u32 2147483647, %v2461_v14 }
 0x244   : >> { %2464 = vpow2.f32 %v1162_v53  ;;  %1445 = vmatmul.bf16.vlgmr.msrb.gmra.mxu3 %v1362_v31  ;;  %v1206_v12 = vmul.f32 0.6931472, %v2463_v19 }
 0x245   : >> { %2466 = vlog2.f32 %v1213_v38  ;;  %v1217_v43 = vadd.f32 1.0, %v1216_v4  ;;  %vm1220_vm6 = vcmp.lt.f32.partialorder %v1219_v13, 0.0004427343 }
 0x246   : >> { %v1212_v44 = vsel %vm1211_vm4, %v1209_v33, %v1206_v12 }
 0x247   : >> { %v1110_v42 = vpop.f32.mrf.mxu2  ;;  %v1218_v41 = vmul.f32 %v2461_v14, %v1217_v43  ;;  %v1332_v35 = vsel %vm1140_vm5, %v3296_v45, %v1212_v44 }
 0x248   : >> { %v1111_v29 = vadd.f32 %v3291_v40, %v1110_v42  ;;  %v3319_v30 = vadd.f32 %v1332_v35, %v3207_v58 }
 0x24a   : >> { %v2465_v9 = vpop.eup %2464  ;;  %v1164_v27 = vmul.f32 1.442695, %v1111_v29  ;;  %vm1143_vm11 = vcmp.gt.f32.partialorder %v1111_v29, 20.0 }
 0x24b   : >> { %v2467_v46 = vpop.eup %2466  ;;  %v1222_v37 = vadd.f32 1.0, %v2465_v9  ;;  %v1225_v55 = vmul.f32 -0.5, %v2465_v9  ;;  %v1228_v60 = vand.u32 2147483647, %v2465_v9 }
 0x24c   : >> { %2468 = vpow2.f32 %v1164_v27  ;;  %v1215_v15 = vmul.f32 0.6931472, %v2467_v46 }
 0x24d   : >> { %2470 = vlog2.f32 %v1222_v37  ;;  %vm1229_vm8 = vcmp.lt.f32.partialorder %v1228_v60, 0.0004427343 }
 0x24e   : >> { %v1221_v48 = vsel %vm1220_vm6, %v1218_v41, %v1215_v15 }
 0x24f   : >> { %v1113_v11 = vpop.f32.mrf.mxu2  ;;  %v1333_v3 = vsel %vm1141_vm7, %v1106_v25, %v1221_v48  ;;  %v1226_v25 = vadd.f32 1.0, %v1225_v55 }
 0x250   : >> { %v3316_v26 = vadd.f32 %v3291_v40, %v1113_v11  ;;  %v3322_v52 = vadd.f32 %v1333_v3, %v3210_v59 }
 0x251   : >> { %v1227_v63 = vmul.f32 %v2465_v9, %v1226_v25 }
 0x252   : >> { %v2469_v24 = vpop.eup %2468  ;;  %v1166_v61 = vmul.f32 1.442695, %v3316_v26  ;;  %v1363_v45 = vpack.c.bf16 %v3322_v52, %v3319_v30  ;;  %vm1144_vm13 = vcmp.gt.f32.partialorder %v3316_v26, 20.0 }
 0x253   : >> { %v2471_v57 = vpop.eup %2470  ;;  %v1231_v62 = vadd.f32 1.0, %v2469_v24  ;;  %v1234_v22 = vmul.f32 -0.5, %v2469_v24  ;;  %v1237_v10 = vand.u32 2147483647, %v2469_v24 }
 0x254   : >> { %2472 = vpow2.f32 %v1166_v61  ;;  %1450 = vmatmul.bf16.gmra.mxu3 %v1363_v45  ;;  %v1224_v58 = vmul.f32 0.6931472, %v2471_v57 }
 0x255   : >> { %2474 = vlog2.f32 %v1231_v62  ;;  %v1235_v2 = vadd.f32 1.0, %v1234_v22  ;;  %vm1238_vm10 = vcmp.lt.f32.partialorder %v1237_v10, 0.0004427343 }
 0x256   : >> { %v1230_v0 = vsel %vm1229_vm8, %v1227_v63, %v1224_v58 }
 0x257   : >> { %v1115_v49 = vpop.f32.mrf.mxu2  ;;  %v1236_v53 = vmul.f32 %v2469_v24, %v1235_v2  ;;  %v1334_v31 = vsel %vm1142_vm9, %v3301_v7, %v1230_v0 }
 0x258   : >> { %v1116_v59 = vadd.f32 %v3291_v40, %v1115_v49  ;;  %v3334_v36 = vadd.f32 %v1334_v31, %v3222_v39 }
 0x25a   : >> { %v2473_v5 = vpop.eup %2472  ;;  %v1168_v1 = vmul.f32 1.442695, %v1116_v59  ;;  %vm1145_vm15 = vcmp.gt.f32.partialorder %v1116_v59, 20.0 }
 0x25b   : >> { %v2475_v21 = vpop.eup %2474  ;;  %v1240_v8 = vadd.f32 1.0, %v2473_v5  ;;  %v1243_v42 = vmul.f32 -0.5, %v2473_v5  ;;  %v1246_v44 = vand.u32 2147483647, %v2473_v5 }
 0x25c   : >> { %2476 = vpow2.f32 %v1168_v1  ;;  %v1233_v14 = vmul.f32 0.6931472, %v2475_v21 }
 0x25d   : >> { %2478 = vlog2.f32 %v1240_v8  ;;  %vm1247_vm12 = vcmp.lt.f32.partialorder %v1246_v44, 0.0004427343 }
 0x25e   : >> { %v1239_v19 = vsel %vm1238_vm10, %v1236_v53, %v1233_v14 }
 0x25f   : >> { %v1118_v38 = vpop.f32.mrf.mxu2  ;;  %v1335_v6 = vsel %vm1143_vm11, %v1111_v29, %v1239_v19  ;;  %v1244_v29 = vadd.f32 1.0, %v1243_v42 }
 0x260   : >> { %v3331_v4 = vadd.f32 %v3291_v40, %v1118_v38  ;;  %v3337_v12 = vadd.f32 %v1335_v6, %v3225_v34 }
 0x261   : >> { %v1245_v37 = vmul.f32 %v2473_v5, %v1244_v29 }
 0x262   : >> { %v2477_v33 = vpop.eup %2476  ;;  %v1170_v43 = vmul.f32 1.442695, %v3331_v4  ;;  %v1364_v7 = vpack.c.bf16 %v3337_v12, %v3334_v36  ;;  %vm1146_vm1 = vcmp.gt.f32.partialorder %v3331_v4, 20.0 }
 0x263   : >> { %v2479_v13 = vpop.eup %2478  ;;  %v1249_v9 = vadd.f32 1.0, %v2477_v33  ;;  %v1252_v27 = vmul.f32 -0.5, %v2477_v33  ;;  %v1255_v41 = vand.u32 2147483647, %v2477_v33 }
 0x264   : >> { %2480 = vpow2.f32 %v1170_v43  ;;  %1455 = vmatmul.bf16.gmra.mxu3 %v1364_v7  ;;  %v1242_v39 = vmul.f32 0.6931472, %v2479_v13 }
 0x265   : >> { %2482 = vlog2.f32 %v1249_v9  ;;  %v1253_v15 = vadd.f32 1.0, %v1252_v27  ;;  %vm1256_vm14 = vcmp.lt.f32.partialorder %v1255_v41, 0.0004427343 }
 0x266   : >> { %v1248_v11 = vsel %vm1247_vm12, %v1245_v37, %v1242_v39 }
 0x267   : >> { %v1120_v46 = vpop.f32.mrf.mxu2  ;;  %v1254_v61 = vmul.f32 %v2477_v33, %v1253_v15  ;;  %v1336_v45 = vsel %vm1144_vm13, %v3316_v26, %v1248_v11 }
 0x268   : >> { %v1121_v34 = vadd.f32 %v3291_v40, %v1120_v46  ;;  %v3349_v60 = vadd.f32 %v1336_v45, %v3237_v20 }
 0x26a   : >> { %v2481_v35 = vpop.eup %2480  ;;  %v1172_v48 = vmul.f32 1.442695, %v1121_v34  ;;  %vm1147_vm3 = vcmp.gt.f32.partialorder %v1121_v34, 20.0 }
 0x26b   : >> { %v2483_v3 = vpop.eup %2482  ;;  %v1258_v55 = vadd.f32 1.0, %v2481_v35  ;;  %v1261_v49 = vmul.f32 -0.5, %v2481_v35  ;;  %v1264_v0 = vand.u32 2147483647, %v2481_v35 }
 0x26c   : >> { %2484 = vpow2.f32 %v1172_v48  ;;  %v1251_v24 = vmul.f32 0.6931472, %v2483_v3 }
 0x26d   : >> { %2486 = vlog2.f32 %v1258_v55  ;;  %vm1265_vm0 = vcmp.lt.f32.partialorder %v1264_v0, 0.0004427343 }
 0x26e   : >> { %v1257_v57 = vsel %vm1256_vm14, %v1254_v61, %v1251_v24 }
 0x26f   : >> { %v1123_v62 = vpop.f32.mrf.mxu2  ;;  %v1337_v25 = vsel %vm1145_vm15, %v1116_v59, %v1257_v57  ;;  %v1262_v59 = vadd.f32 1.0, %v1261_v49 }
 0x270   : >> { %v3346_v22 = vadd.f32 %v3291_v40, %v1123_v62  ;;  %v3352_v58 = vadd.f32 %v1337_v25, %v3240_v16 }
 0x271   : >> { %v1263_v8 = vmul.f32 %v2481_v35, %v1262_v59 }
 0x272   : >> { %v2485_v63 = vpop.eup %2484  ;;  %v1174_v2 = vmul.f32 1.442695, %v3346_v22  ;;  %v1365_v26 = vpack.c.bf16 %v3352_v58, %v3349_v60  ;;  %vm1148_vm5 = vcmp.gt.f32.partialorder %v3346_v22, 20.0 }
 0x273   : >> { %v2487_v10 = vpop.eup %2486  ;;  %v1267_v5 = vadd.f32 1.0, %v2485_v63  ;;  %v1270_v1 = vmul.f32 -0.5, %v2485_v63  ;;  %v1273_v53 = vand.u32 2147483647, %v2485_v63 }
 0x274   : >> { %2488 = vpow2.f32 %v1174_v2  ;;  %1460 = vmatmul.bf16.gmra.mxu3 %v1365_v26  ;;  %v1260_v20 = vmul.f32 0.6931472, %v2487_v10 }
 0x275   : >> { %2490 = vlog2.f32 %v1267_v5  ;;  %v1271_v14 = vadd.f32 1.0, %v1270_v1  ;;  %vm1274_vm2 = vcmp.lt.f32.partialorder %v1273_v53, 0.0004427343 }
 0x276   : >> { %v1266_v38 = vsel %vm1265_vm0, %v1263_v8, %v1260_v20 }
 0x277   : >> { %v1125_v21 = vpop.f32.mrf.mxu2  ;;  %v1272_v43 = vmul.f32 %v2485_v63, %v1271_v14  ;;  %v1338_v7 = vsel %vm1146_vm1, %v3331_v4, %v1266_v38 }
 0x278   : >> { %v1126_v16 = vadd.f32 %v3291_v40, %v1125_v21  ;;  %v3364_v44 = vadd.f32 %v1338_v7, %v3252_v47 }
 0x27a   : >> { %v2489_v31 = vpop.eup %2488  ;;  %v1176_v19 = vmul.f32 1.442695, %v1126_v16  ;;  %vm1149_vm7 = vcmp.gt.f32.partialorder %v1126_v16, 20.0 }
 0x27b   : >> { %v2491_v6 = vpop.eup %2490  ;;  %v1276_v42 = vadd.f32 1.0, %v2489_v31  ;;  %v1279_v46 = vmul.f32 -0.5, %v2489_v31  ;;  %v1282_v11 = vand.u32 2147483647, %v2489_v31 }
 0x27c   : >> { %2492 = vpow2.f32 %v1176_v19  ;;  %v1269_v33 = vmul.f32 0.6931472, %v2491_v6 }
 0x27d   : >> { %2494 = vlog2.f32 %v1276_v42  ;;  %vm1283_vm4 = vcmp.lt.f32.partialorder %v1282_v11, 0.0004427343 }
 0x27e   : >> { %v1275_v13 = vsel %vm1274_vm2, %v1272_v43, %v1269_v33 }
 0x27f   : >> { %v1128_v9 = vpop.f32.mrf.mxu2  ;;  %v1339_v29 = vsel %vm1147_vm3, %v1121_v34, %v1275_v13  ;;  %v1280_v34 = vadd.f32 1.0, %v1279_v46 }
 0x280   : >> { %v3361_v27 = vadd.f32 %v3291_v40, %v1128_v9  ;;  %v3367_v39 = vadd.f32 %v1339_v29, %v3255_v50 }
 0x281   : >> { %v1281_v55 = vmul.f32 %v2489_v31, %v1280_v34 }
 0x282   : >> { %v2493_v37 = vpop.eup %2492  ;;  %v1178_v15 = vmul.f32 1.442695, %v3361_v27  ;;  %v1366_v4 = vpack.c.bf16 %v3367_v39, %v3364_v44  ;;  %vm1150_vm9 = vcmp.gt.f32.partialorder %v3361_v27, 20.0 }
 0x283   : >> { %v2495_v41 = vpop.eup %2494  ;;  %v1285_v35 = vadd.f32 1.0, %v2493_v37  ;;  %v1288_v48 = vmul.f32 -0.5, %v2493_v37  ;;  %v1291_v61 = vand.u32 2147483647, %v2493_v37 }
 0x284   : >> { %2496 = vpow2.f32 %v1178_v15  ;;  %1465 = vmatmul.bf16.gmra.mxu3 %v1366_v4  ;;  %v1278_v47 = vmul.f32 0.6931472, %v2495_v41 }
 0x285   : >> { %2498 = vlog2.f32 %v1285_v35  ;;  %v1289_v24 = vadd.f32 1.0, %v1288_v48  ;;  %vm1292_vm6 = vcmp.lt.f32.partialorder %v1291_v61, 0.0004427343 }
 0x286   : >> { %v1284_v62 = vsel %vm1283_vm4, %v1281_v55, %v1278_v47 }
 0x287   : >> { %v1130_v3 = vpop.f32.mrf.mxu2  ;;  %v1290_v2 = vmul.f32 %v2493_v37, %v1289_v24  ;;  %v1340_v26 = vsel %vm1148_vm5, %v3346_v22, %v1284_v62 }
 0x288   : >> { %v1131_v50 = vadd.f32 %v3291_v40, %v1130_v3  ;;  %v3377_v0 = vadd.f32 %v1340_v26, %v3265_v28  ;;  %v2200_v26 = vld [vmem:[#allocation8 + $0x38] sm:$0xff] }
 0x289   : >> { %1786 = vmatpush.bf16.msrb.mxu0 %v2200_v26 }
 0x28a   : >> { %v2497_v45 = vpop.eup %2496  ;;  %v1180_v57 = vmul.f32 1.442695, %v1131_v50  ;;  %vm1151_vm11 = vcmp.gt.f32.partialorder %v1131_v50, 20.0 }
 0x28b   : >> { %v2499_v25 = vpop.eup %2498  ;;  %v1294_v49 = vadd.f32 1.0, %v2497_v45  ;;  %v1297_v21 = vmul.f32 -0.5, %v2497_v45  ;;  %v1300_v38 = vand.u32 2147483647, %v2497_v45 }
 0x28c   : >> { %2500 = vpow2.f32 %v1180_v57  ;;  %v1287_v63 = vmul.f32 0.6931472, %v2499_v25 }
 0x28d   : >> { %2502 = vlog2.f32 %v1294_v49  ;;  %v1298_v19 = vadd.f32 1.0, %v1297_v21  ;;  %vm1301_vm8 = vcmp.lt.f32.partialorder %v1300_v38, 0.0004427343  ;;  %v2193_v38 = vld [vmem:[#allocation8] sm:$0xff] }
 0x28e   : >> { %v1293_v10 = vsel %vm1292_vm6, %v1290_v2, %v1287_v63 }
 0x28f   : >> { %v1133_v5 = vpop.f32.mrf.mxu2  ;;  %v1341_v59 = vsel %vm1149_vm7, %v1126_v16, %v1293_v10 }
 0x290   : >> { %v1134_v1 = vadd.f32 %v3291_v40, %v1133_v5  ;;  %v3380_v20 = vadd.f32 %v1341_v59, %v3268_v32  ;;  %v1299_v32 = vmul.f32 %v2497_v45, %v1298_v19 }
 0x292   : >> { %v2501_v8 = vpop.eup %2500  ;;  %v1182_v14 = vmul.f32 1.442695, %v1134_v1  ;;  %v1367_v53 = vpack.c.bf16 %v3380_v20, %v3377_v0  ;;  %vm1152_vm13 = vcmp.gt.f32.partialorder %v1134_v1, 20.0 }
 0x293   : >> { %v2503_v22 = vpop.eup %2502  ;;  %v1303_v31 = vadd.f32 1.0, %v2501_v8  ;;  %v1306_v16 = vmul.f32 -0.5, %v2501_v8  ;;  %v1309_v43 = vand.u32 2147483647, %v2501_v8 }
 0x294   : >> { %2504 = vpow2.f32 %v1182_v14  ;;  %1470 = vmatmul.bf16.gmra.mxu3 %v1367_v53  ;;  %v1296_v6 = vmul.f32 0.6931472, %v2503_v22  ;;  %v2198_v14 = vld [vmem:[#allocation8 + $0x28] sm:$0xff]  ;;  %v2196_v53 = vld [vmem:[#allocation8 + $0x18] sm:$0xff]  ;;  %v2195_v22 = vld [vmem:[#allocation8 + $0x10] sm:$0xff] }
 0x295   : >> { %2506 = vlog2.f32 %v1303_v31  ;;  %v1307_v33 = vadd.f32 1.0, %v1306_v16  ;;  %vm1310_vm10 = vcmp.lt.f32.partialorder %v1309_v43, 0.0004427343  ;;  %v3403_v31 = vld [vmem:[#allocation7 + $0x3] ss:$0 sm:$0xff] }
 0x296   : >> { %v1302_v9 = vsel %vm1301_vm8, %v1299_v32, %v1296_v6 }
 0x297   : >> { %v1135_v28 = vpop.f32.mrf.mxu2  ;;  %v1308_v15 = vmul.f32 %v2501_v8, %v1307_v33  ;;  %v1342_v4 = vsel %vm1150_vm9, %v3361_v27, %v1302_v9  ;;  %v2199_v8 = vld [vmem:[#allocation8 + $0x30] sm:$0xff] }
 0x298   : >> { %v1136_v42 = vadd.f32 %v3291_v40, %v1135_v28  ;;  %v3388_v35 = vadd.f32 %v1342_v4, %v3276_v54  ;;  %1787 = vmatpush.bf16.msrb.mxu0 %v2199_v8 }
 0x29a   : >> { %v2505_v7 = vpop.eup %2504  ;;  %v1184_v13 = vmul.f32 1.442695, %v1136_v42  ;;  %vm1153_vm15 = vcmp.gt.f32.partialorder %v1136_v42, 20.0 }
 0x29b   : >> { %v2507_v29 = vpop.eup %2506  ;;  %v1312_v46 = vadd.f32 1.0, %v2505_v7  ;;  %v1315_v48 = vmul.f32 -0.5, %v2505_v7  ;;  %v1318_v61 = vand.u32 2147483647, %v2505_v7 }
 0x29c   : >> { %2508 = vpow2.f32 %v1184_v13  ;;  %v1305_v37 = vmul.f32 0.6931472, %v2507_v29  ;;  %1788 = vmatpush.bf16.msrb.mxu0 %v2198_v14 }
 0x29d   : >> { %2510 = vlog2.f32 %v1312_v46  ;;  %v1316_v24 = vadd.f32 1.0, %v1315_v48  ;;  %vm1319_vm12 = vcmp.lt.f32.partialorder %v1318_v61, 0.0004427343 }
 0x29e   : >> { %v1311_v40 = vsel %vm1310_vm10, %v1308_v15, %v1305_v37 }
 0x29f   : >> { %v1343_v41 = vsel %vm1151_vm11, %v1131_v50, %v1311_v40  ;;  %v1317_v50 = vmul.f32 %v2505_v7, %v1316_v24 }
 0x2a0   : >> { %v3391_v34 = vadd.f32 %v1343_v41, %v3279_v51 }
 0x2a2   : >> { %v2509_v11 = vpop.eup %2508  ;;  %v1368_v47 = vpack.c.bf16 %v3391_v34, %v3388_v35 }
 0x2a3   : >> { %v2511_v3 = vpop.eup %2510  ;;  %v1321_v55 = vadd.f32 1.0, %v2509_v11  ;;  %v1324_v27 = vmul.f32 -0.5, %v2509_v11  ;;  %v1327_v54 = vand.u32 2147483647, %v2509_v11 }
 0x2a4   : >> { %1475 = vmatmul.bf16.gmra.mxu3 %v1368_v47  ;;  %v1314_v45 = vmul.f32 0.6931472, %v2511_v3 }
 0x2a5   : >> { %2512 = vlog2.f32 %v1321_v55  ;;  %v1325_v57 = vadd.f32 1.0, %v1324_v27  ;;  %vm1328_vm14 = vcmp.lt.f32.partialorder %v1327_v54, 0.0004427343 }
 0x2a6   : >> { %v1320_v62 = vsel %vm1319_vm12, %v1317_v50, %v1314_v45 }
 0x2a7   : >> { %v1326_v49 = vmul.f32 %v2509_v11, %v1325_v57  ;;  %v1344_v63 = vsel %vm1152_vm13, %v1134_v1, %v1320_v62  ;;  %v2197_v1 = vld [vmem:[#allocation8 + $0x20] sm:$0xff] }
 0x2a8   : >> { %v3396_v5 = vadd.f32 %v1344_v63, %v3284_v18  ;;  %1789 = vmatpush.bf16.msrb.mxu0 %v2197_v1  ;;  %v2194_v18 = vld [vmem:[#allocation8 + $0x8] sm:$0xff] }
 0x2ab   : >> { %v2513_v51 = vpop.eup %2512 }
 0x2ac   : >> { %v1323_v25 = vmul.f32 0.6931472, %v2513_v51  ;;  %1790 = vmatpush.bf16.msrb.mxu0 %v2196_v53 }
 0x2ae   : >> { %v1329_v2 = vsel %vm1328_vm14, %v1326_v49, %v1323_v25 }
 0x2af   : >> { %v1345_v10 = vsel %vm1153_vm15, %v1136_v42, %v1329_v2 }
 0x2b0   : >> { %v3399_v59 = vadd.f32 %v1345_v10, %v3287_v17  ;;  %1791 = vmatpush.bf16.msrb.mxu0 %v2195_v22 }
 0x2b2   : >> { %v1369_v21 = vpack.c.bf16 %v3399_v59, %v3396_v5 }
 0x2b4   : >> { %1480 = vmatmul.bf16.gmra.mxu3 %v1369_v21  ;;  %1792 = vmatpush.bf16.msrb.mxu0 %v2194_v18 }
 0x2b8   : >> { %1793 = vmatpush.bf16.msrb.mxu0 %v2193_v38 }
 0x2c7   : >> { %v1446_v17 = vpop.f32.mrf.mxu3 }
 0x2c8   : >> { %v1447_v19 = vadd.f32 %v3403_v31, %v1446_v17 }
 0x2ca   : >> { %v1502_v16 = vmul.f32 1.442695, %v1447_v19  ;;  %vm1486_vm1 = vcmp.gt.f32.partialorder %v1447_v19, 20.0 }
 0x2cc   : >> { %2514 = vpow2.f32 %v1502_v16 }
 0x2cf   : >> { %v1448_v6 = vpop.f32.mrf.mxu3 }
 0x2d0   : >> { %v1449_v28 = vadd.f32 %v3403_v31, %v1448_v6 }
 0x2d2   : >> { %v2515_v42 = vpop.eup %2514  ;;  %v1504_v32 = vmul.f32 1.442695, %v1449_v28  ;;  %vm1487_vm3 = vcmp.gt.f32.partialorder %v1449_v28, 20.0 }
 0x2d3   : >> { %v1534_v33 = vadd.f32 1.0, %v2515_v42  ;;  %v1537_v7 = vmul.f32 -0.5, %v2515_v42  ;;  %v1540_v40 = vand.u32 2147483647, %v2515_v42 }
 0x2d4   : >> { %2516 = vpow2.f32 %v1504_v32 }
 0x2d5   : >> { %2518 = vlog2.f32 %v1534_v33  ;;  %v1538_v15 = vadd.f32 1.0, %v1537_v7  ;;  %vm1541_vm0 = vcmp.lt.f32.partialorder %v1540_v40, 0.0004427343 }
 0x2d7   : >> { %v1451_v43 = vpop.f32.mrf.mxu3  ;;  %v1539_v11 = vmul.f32 %v2515_v42, %v1538_v15 }
 0x2d8   : >> { %v3408_v13 = vadd.f32 %v3403_v31, %v1451_v43 }
 0x2da   : >> { %v2517_v9 = vpop.eup %2516  ;;  %v1506_v29 = vmul.f32 1.442695, %v3408_v13  ;;  %vm1488_vm5 = vcmp.gt.f32.partialorder %v3408_v13, 20.0 }
 0x2db   : >> { %v2519_v46 = vpop.eup %2518  ;;  %v1543_v37 = vadd.f32 1.0, %v2517_v9  ;;  %v1546_v4 = vmul.f32 -0.5, %v2517_v9  ;;  %v1549_v55 = vand.u32 2147483647, %v2517_v9 }
 0x2dc   : >> { %2520 = vpow2.f32 %v1506_v29  ;;  %v1536_v41 = vmul.f32 0.6931472, %v2519_v46 }
 0x2dd   : >> { %2522 = vlog2.f32 %v1543_v37  ;;  %v1547_v47 = vadd.f32 1.0, %v1546_v4  ;;  %vm1550_vm2 = vcmp.lt.f32.partialorder %v1549_v55, 0.0004427343 }
 0x2de   : >> { %v1542_v27 = vsel %vm1541_vm0, %v1539_v11, %v1536_v41 }
 0x2df   : >> { %v1453_v48 = vpop.f32.mrf.mxu3  ;;  %v1548_v54 = vmul.f32 %v2517_v9, %v1547_v47  ;;  %v1678_v62 = vsel %vm1486_vm1, %v1447_v19, %v1542_v27 }
 0x2e0   : >> { %v1454_v3 = vadd.f32 %v3403_v31, %v1453_v48  ;;  %v1694_v2 = vadd.f32 %v1678_v62, %v3304_v23 }
 0x2e2   : >> { %v2521_v24 = vpop.eup %2520  ;;  %v1508_v61 = vmul.f32 1.442695, %v1454_v3  ;;  %vm1489_vm7 = vcmp.gt.f32.partialorder %v1454_v3, 20.0 }
 0x2e3   : >> { %v2523_v45 = vpop.eup %2522  ;;  %v1552_v50 = vadd.f32 1.0, %v2521_v24  ;;  %v1555_v10 = vmul.f32 -0.5, %v2521_v24  ;;  %v1558_v17 = vand.u32 2147483647, %v2521_v24 }
 0x2e4   : >> { %v1545_v57 = vmul.f32 0.6931472, %v2523_v45  ;;  %2524 = vpow2.f32 %v1508_v61 }
 0x2e5   : >> { %2526 = vlog2.f32 %v1552_v50  ;;  %v1556_v22 = vadd.f32 1.0, %v1555_v10  ;;  %vm1559_vm4 = vcmp.lt.f32.partialorder %v1558_v17, 0.0004427343 }
 0x2e6   : >> { %v1551_v51 = vsel %vm1550_vm2, %v1548_v54, %v1545_v57 }
 0x2e7   : >> { %v1679_v25 = vsel %vm1487_vm3, %v1449_v28, %v1551_v51  ;;  %v1456_v49 = vpop.f32.mrf.mxu3  ;;  %v1557_v23 = vmul.f32 %v2521_v24, %v1556_v22 }
 0x2e8   : >> { %v3413_v63 = vadd.f32 %v3403_v31, %v1456_v49  ;;  %v1695_v26 = vadd.f32 %v1679_v25, %v3307_v56 }
 0x2ea   : >> { %v2525_v21 = vpop.eup %2524  ;;  %v1510_v8 = vmul.f32 1.442695, %v3413_v63  ;;  %v1710_v14 = vpack.c.bf16 %v1695_v26, %v1694_v2  ;;  %vm1490_vm9 = vcmp.gt.f32.partialorder %v3413_v63, 20.0 }
 0x2eb   : >> { %v2527_v1 = vpop.eup %2526  ;;  %v1561_v53 = vadd.f32 1.0, %v2525_v21  ;;  %v1564_v18 = vmul.f32 -0.5, %v2525_v21  ;;  %v1567_v56 = vand.u32 2147483647, %v2525_v21 }
 0x2ec   : >> { %2528 = vpow2.f32 %v1510_v8  ;;  %1794 = vmatmul.bf16.vlgmr.msrb.gmra.mxu0 %v1710_v14  ;;  %v1554_v19 = vmul.f32 0.6931472, %v2527_v1 }
 0x2ed   : >> { %2530 = vlog2.f32 %v1561_v53  ;;  %v1565_v6 = vadd.f32 1.0, %v1564_v18  ;;  %vm1568_vm6 = vcmp.lt.f32.partialorder %v1567_v56, 0.0004427343 }
 0x2ee   : >> { %v1560_v32 = vsel %vm1559_vm4, %v1557_v23, %v1554_v19 }
 0x2ef   : >> { %v1458_v16 = vpop.f32.mrf.mxu3  ;;  %v1566_v9 = vmul.f32 %v2525_v21, %v1565_v6  ;;  %v1680_v29 = vsel %vm1488_vm5, %v3408_v13, %v1560_v32 }
 0x2f0   : >> { %v1459_v38 = vadd.f32 %v3403_v31, %v1458_v16  ;;  %v1696_v40 = vadd.f32 %v1680_v29, %v3319_v30 }
 0x2f2   : >> { %v2529_v28 = vpop.eup %2528  ;;  %v1512_v42 = vmul.f32 1.442695, %v1459_v38  ;;  %vm1491_vm11 = vcmp.gt.f32.partialorder %v1459_v38, 20.0 }
 0x2f3   : >> { %v2531_v33 = vpop.eup %2530  ;;  %v1570_v43 = vadd.f32 1.0, %v2529_v28  ;;  %v1573_v48 = vmul.f32 -0.5, %v2529_v28  ;;  %v1576_v45 = vand.u32 2147483647, %v2529_v28 }
 0x2f4   : >> { %2532 = vpow2.f32 %v1512_v42  ;;  %v1563_v7 = vmul.f32 0.6931472, %v2531_v33 }
 0x2f5   : >> { %2534 = vlog2.f32 %v1570_v43  ;;  %v1574_v13 = vadd.f32 1.0, %v1573_v48  ;;  %vm1577_vm8 = vcmp.lt.f32.partialorder %v1576_v45, 0.0004427343 }
 0x2f6   : >> { %v1569_v46 = vsel %vm1568_vm6, %v1566_v9, %v1563_v7 }
 0x2f7   : >> { %v1461_v37 = vpop.f32.mrf.mxu3  ;;  %v1681_v15 = vsel %vm1489_vm7, %v1454_v3, %v1569_v46  ;;  %v1575_v30 = vmul.f32 %v2529_v28, %v1574_v13 }
 0x2f8   : >> { %v3422_v4 = vadd.f32 %v3403_v31, %v1461_v37  ;;  %v1697_v41 = vadd.f32 %v1681_v15, %v3322_v52 }
 0x2fa   : >> { %v2533_v11 = vpop.eup %2532  ;;  %v1514_v47 = vmul.f32 1.442695, %v3422_v4  ;;  %v1711_v55 = vpack.c.bf16 %v1697_v41, %v1696_v40  ;;  %vm1492_vm13 = vcmp.gt.f32.partialorder %v3422_v4, 20.0 }
 0x2fb   : >> { %v2535_v24 = vpop.eup %2534  ;;  %v1579_v27 = vadd.f32 1.0, %v2533_v11  ;;  %v1582_v61 = vmul.f32 -0.5, %v2533_v11  ;;  %v1585_v52 = vand.u32 2147483647, %v2533_v11 }
 0x2fc   : >> { %2536 = vpow2.f32 %v1514_v47  ;;  %1799 = vmatmul.bf16.gmra.mxu0 %v1711_v55  ;;  %v1572_v3 = vmul.f32 0.6931472, %v2535_v24 }
 0x2fd   : >> { %2538 = vlog2.f32 %v1579_v27  ;;  %v1583_v54 = vadd.f32 1.0, %v1582_v61  ;;  %vm1586_vm10 = vcmp.lt.f32.partialorder %v1585_v52, 0.0004427343 }
 0x2fe   : >> { %v1578_v25 = vsel %vm1577_vm8, %v1575_v30, %v1572_v3 }
 0x2ff   : >> { %v1463_v50 = vpop.f32.mrf.mxu3  ;;  %v1584_v10 = vmul.f32 %v2533_v11, %v1583_v54  ;;  %v1682_v21 = vsel %vm1490_vm9, %v3413_v63, %v1578_v25 }
 0x300   : >> { %v1464_v57 = vadd.f32 %v3403_v31, %v1463_v50  ;;  %v1698_v22 = vadd.f32 %v1682_v21, %v3334_v36 }
 0x302   : >> { %v2537_v62 = vpop.eup %2536  ;;  %v1516_v51 = vmul.f32 1.442695, %v1464_v57  ;;  %vm1493_vm15 = vcmp.gt.f32.partialorder %v1464_v57, 20.0 }
 0x303   : >> { %v2539_v49 = vpop.eup %2538  ;;  %v1588_v2 = vadd.f32 1.0, %v2537_v62  ;;  %v1591_v17 = vmul.f32 -0.5, %v2537_v62  ;;  %v1594_v42 = vand.u32 2147483647, %v2537_v62 }
 0x304   : >> { %2540 = vpow2.f32 %v1516_v51  ;;  %v1581_v26 = vmul.f32 0.6931472, %v2539_v49 }
 0x305   : >> { %2542 = vlog2.f32 %v1588_v2  ;;  %v1592_v63 = vadd.f32 1.0, %v1591_v17  ;;  %vm1595_vm12 = vcmp.lt.f32.partialorder %v1594_v42, 0.0004427343 }
 0x306   : >> { %v1587_v8 = vsel %vm1586_vm10, %v1584_v10, %v1581_v26 }
 0x307   : >> { %v1466_v14 = vpop.f32.mrf.mxu3  ;;  %v1683_v1 = vsel %vm1491_vm11, %v1459_v38, %v1587_v8  ;;  %v1593_v36 = vmul.f32 %v2537_v62, %v1592_v63 }
 0x308   : >> { %v3431_v53 = vadd.f32 %v3403_v31, %v1466_v14  ;;  %v1699_v18 = vadd.f32 %v1683_v1, %v3337_v12 }
 0x30a   : >> { %v2541_v19 = vpop.eup %2540  ;;  %v1518_v16 = vmul.f32 1.442695, %v3431_v53  ;;  %v1712_v23 = vpack.c.bf16 %v1699_v18, %v1698_v22  ;;  %vm1494_vm1 = vcmp.gt.f32.partialorder %v3431_v53, 20.0 }
 0x30b   : >> { %v2543_v6 = vpop.eup %2542  ;;  %v1597_v56 = vadd.f32 1.0, %v2541_v19  ;;  %v1600_v28 = vmul.f32 -0.5, %v2541_v19  ;;  %v1603_v12 = vand.u32 2147483647, %v2541_v19 }
 0x30c   : >> { %2544 = vpow2.f32 %v1518_v16  ;;  %1804 = vmatmul.bf16.gmra.mxu0 %v1712_v23  ;;  %v1590_v38 = vmul.f32 0.6931472, %v2543_v6 }
 0x30d   : >> { %2546 = vlog2.f32 %v1597_v56  ;;  %v1601_v43 = vadd.f32 1.0, %v1600_v28  ;;  %vm1604_vm14 = vcmp.lt.f32.partialorder %v1603_v12, 0.0004427343 }
 0x30e   : >> { %v1596_v29 = vsel %vm1595_vm12, %v1593_v36, %v1590_v38 }
 0x30f   : >> { %v1468_v32 = vpop.f32.mrf.mxu3  ;;  %v1602_v40 = vmul.f32 %v2541_v19, %v1601_v43  ;;  %v1684_v41 = vsel %vm1492_vm13, %v3422_v4, %v1596_v29 }
 0x310   : >> { %v1469_v33 = vadd.f32 %v3403_v31, %v1468_v32  ;;  %v1700_v24 = vadd.f32 %v1684_v41, %v3349_v60 }
 0x312   : >> { %v2545_v7 = vpop.eup %2544  ;;  %v1520_v9 = vmul.f32 1.442695, %v1469_v33  ;;  %vm1495_vm3 = vcmp.gt.f32.partialorder %v1469_v33, 20.0 }
 0x313   : >> { %v2547_v46 = vpop.eup %2546  ;;  %v1606_v37 = vadd.f32 1.0, %v2545_v7  ;;  %v1609_v13 = vmul.f32 -0.5, %v2545_v7  ;;  %v1612_v52 = vand.u32 2147483647, %v2545_v7 }
 0x314   : >> { %2548 = vpow2.f32 %v1520_v9  ;;  %v1599_v15 = vmul.f32 0.6931472, %v2547_v46 }
 0x315   : >> { %2550 = vlog2.f32 %v1606_v37  ;;  %v1610_v4 = vadd.f32 1.0, %v1609_v13  ;;  %vm1613_vm0 = vcmp.lt.f32.partialorder %v1612_v52, 0.0004427343 }
 0x316   : >> { %v1605_v48 = vsel %vm1604_vm14, %v1602_v40, %v1599_v15 }
 0x317   : >> { %v1471_v11 = vpop.f32.mrf.mxu3  ;;  %v1685_v47 = vsel %vm1493_vm15, %v1464_v57, %v1605_v48  ;;  %v1611_v60 = vmul.f32 %v2545_v7, %v1610_v4 }
 0x318   : >> { %v3440_v55 = vadd.f32 %v3403_v31, %v1471_v11  ;;  %v1701_v27 = vadd.f32 %v1685_v47, %v3352_v58 }
 0x31a   : >> { %v2549_v61 = vpop.eup %2548  ;;  %v1522_v45 = vmul.f32 1.442695, %v3440_v55  ;;  %v1713_v3 = vpack.c.bf16 %v1701_v27, %v1700_v24  ;;  %vm1496_vm5 = vcmp.gt.f32.partialorder %v3440_v55, 20.0 }
 0x31b   : >> { %v2551_v50 = vpop.eup %2550  ;;  %v1615_v30 = vadd.f32 1.0, %v2549_v61  ;;  %v1618_v54 = vmul.f32 -0.5, %v2549_v61  ;;  %v1621_v58 = vand.u32 2147483647, %v2549_v61 }
 0x31c   : >> { %2552 = vpow2.f32 %v1522_v45  ;;  %1809 = vmatmul.bf16.gmra.mxu0 %v1713_v3  ;;  %v1608_v57 = vmul.f32 0.6931472, %v2551_v50 }
 0x31d   : >> { %2554 = vlog2.f32 %v1615_v30  ;;  %v1619_v25 = vadd.f32 1.0, %v1618_v54  ;;  %vm1622_vm2 = vcmp.lt.f32.partialorder %v1621_v58, 0.0004427343 }
 0x31e   : >> { %v1614_v26 = vsel %vm1613_vm0, %v1611_v60, %v1608_v57 }
 0x31f   : >> { %v1473_v62 = vpop.f32.mrf.mxu3  ;;  %v1620_v14 = vmul.f32 %v2549_v61, %v1619_v25  ;;  %v1686_v1 = vsel %vm1494_vm1, %v3431_v53, %v1614_v26 }
 0x320   : >> { %v1474_v51 = vadd.f32 %v3403_v31, %v1473_v62  ;;  %v1702_v16 = vadd.f32 %v1686_v1, %v3364_v44 }
 0x322   : >> { %v2553_v49 = vpop.eup %2552  ;;  %v1524_v2 = vmul.f32 1.442695, %v1474_v51  ;;  %vm1497_vm7 = vcmp.gt.f32.partialorder %v1474_v51, 20.0 }
 0x323   : >> { %v2555_v10 = vpop.eup %2554  ;;  %v1624_v21 = vadd.f32 1.0, %v2553_v49  ;;  %v1627_v6 = vmul.f32 -0.5, %v2553_v49  ;;  %v1630_v36 = vand.u32 2147483647, %v2553_v49 }
 0x324   : >> { %2556 = vpow2.f32 %v1524_v2  ;;  %v1617_v8 = vmul.f32 0.6931472, %v2555_v10 }
 0x325   : >> { %2558 = vlog2.f32 %v1624_v21  ;;  %v1628_v53 = vadd.f32 1.0, %v1627_v6  ;;  %vm1631_vm4 = vcmp.lt.f32.partialorder %v1630_v36, 0.0004427343 }
 0x326   : >> { %v1623_v22 = vsel %vm1622_vm2, %v1620_v14, %v1617_v8 }
 0x327   : >> { %v1476_v18 = vpop.f32.mrf.mxu3  ;;  %v1687_v17 = vsel %vm1495_vm3, %v1469_v33, %v1623_v22  ;;  %v1629_v44 = vmul.f32 %v2553_v49, %v1628_v53 }
 0x328   : >> { %v3449_v19 = vadd.f32 %v3403_v31, %v1476_v18  ;;  %v1703_v23 = vadd.f32 %v1687_v17, %v3367_v39 }
 0x32a   : >> { %v2557_v56 = vpop.eup %2556  ;;  %v1526_v63 = vmul.f32 1.442695, %v3449_v19  ;;  %v1714_v28 = vpack.c.bf16 %v1703_v23, %v1702_v16  ;;  %vm1498_vm9 = vcmp.gt.f32.partialorder %v3449_v19, 20.0 }
 0x32b   : >> { %v2559_v42 = vpop.eup %2558  ;;  %v1633_v38 = vadd.f32 1.0, %v2557_v56  ;;  %v1636_v32 = vmul.f32 -0.5, %v2557_v56  ;;  %v1639_v39 = vand.u32 2147483647, %v2557_v56 }
 0x32c   : >> { %2560 = vpow2.f32 %v1526_v63  ;;  %1814 = vmatmul.bf16.gmra.mxu0 %v1714_v28  ;;  %v1626_v33 = vmul.f32 0.6931472, %v2559_v42 }
 0x32d   : >> { %2562 = vlog2.f32 %v1633_v38  ;;  %v1637_v7 = vadd.f32 1.0, %v1636_v32  ;;  %vm1640_vm6 = vcmp.lt.f32.partialorder %v1639_v39, 0.0004427343 }
 0x32e   : >> { %v1632_v46 = vsel %vm1631_vm4, %v1629_v44, %v1626_v33 }
 0x32f   : >> { %v1478_v43 = vpop.f32.mrf.mxu3  ;;  %v1638_v41 = vmul.f32 %v2557_v56, %v1637_v7  ;;  %v1688_v48 = vsel %vm1496_vm5, %v3440_v55, %v1632_v46 }
 0x330   : >> { %v1479_v12 = vadd.f32 %v3403_v31, %v1478_v43  ;;  %v1704_v13 = vadd.f32 %v1688_v48, %v3377_v0 }
 0x332   : >> { %v2561_v9 = vpop.eup %2560  ;;  %v1528_v29 = vmul.f32 1.442695, %v1479_v12  ;;  %vm1499_vm11 = vcmp.gt.f32.partialorder %v1479_v12, 20.0 }
 0x333   : >> { %v2563_v37 = vpop.eup %2562  ;;  %v1642_v15 = vadd.f32 1.0, %v2561_v9  ;;  %v1645_v45 = vmul.f32 -0.5, %v2561_v9  ;;  %v1648_v57 = vand.u32 2147483647, %v2561_v9 }
 0x334   : >> { %2564 = vpow2.f32 %v1528_v29  ;;  %v1635_v40 = vmul.f32 0.6931472, %v2563_v37  ;;  %v2321_v29 = vld [vmem:[%s3532_s4] ss:$0 sm:$0xff] }
 0x335   : >> { %2566 = vlog2.f32 %v1642_v15  ;;  %v1646_v55 = vadd.f32 1.0, %v1645_v45  ;;  %vm1649_vm8 = vcmp.lt.f32.partialorder %v1648_v57, 0.0004427343 }
 0x336   : >> { %v1641_v11 = vsel %vm1640_vm6, %v1638_v41, %v1635_v40 }
 0x337   : >> { %v1481_v47 = vpop.f32.mrf.mxu3  ;;  %v1689_v24 = vsel %vm1497_vm7, %v1474_v51, %v1641_v11  ;;  %v1647_v25 = vmul.f32 %v2561_v9, %v1646_v55 }
 0x338   : >> { %v1482_v27 = vadd.f32 %v3403_v31, %v1481_v47  ;;  %v1705_v61 = vadd.f32 %v1689_v24, %v3380_v20 }
 0x33a   : >> { %v2565_v3 = vpop.eup %2564  ;;  %v1530_v50 = vmul.f32 1.442695, %v1482_v27  ;;  %v1715_v30 = vpack.c.bf16 %v1705_v61, %v1704_v13  ;;  %vm1500_vm13 = vcmp.gt.f32.partialorder %v1482_v27, 20.0 }
 0x33b   : >> { %v2567_v4 = vpop.eup %2566  ;;  %v1651_v54 = vadd.f32 1.0, %v2565_v3  ;;  %v1654_v52 = vmul.f32 -0.5, %v2565_v3  ;;  %v1657_v20 = vand.u32 2147483647, %v2565_v3 }
 0x33c   : >> { %2568 = vpow2.f32 %v1530_v50  ;;  %1819 = vmatmul.bf16.gmra.mxu0 %v1715_v30  ;;  %v1644_v62 = vmul.f32 0.6931472, %v2567_v4 }
 0x33d   : >> { %2570 = vlog2.f32 %v1651_v54  ;;  %v1655_v0 = vadd.f32 1.0, %v1654_v52  ;;  %vm1658_vm10 = vcmp.lt.f32.partialorder %v1657_v20, 0.0004427343 }
 0x33e   : >> { %v1650_v2 = vsel %vm1649_vm8, %v1647_v25, %v1644_v62 }
 0x33f   : >> { %v1483_v51 = vpop.f32.mrf.mxu3  ;;  %v1656_v8 = vmul.f32 %v2565_v3, %v1655_v0  ;;  %v1690_v14 = vsel %vm1498_vm9, %v3449_v19, %v1650_v2 }
 0x340   : >> { %v1484_v60 = vadd.f32 %v3403_v31, %v1483_v51  ;;  %v1706_v22 = vadd.f32 %v1690_v14, %v3388_v35 }
 0x342   : >> { %v2569_v58 = vpop.eup %2568  ;;  %v1532_v49 = vmul.f32 1.442695, %v1484_v60  ;;  %vm1501_vm15 = vcmp.gt.f32.partialorder %v1484_v60, 20.0 }
 0x343   : >> { %v2571_v26 = vpop.eup %2570  ;;  %v1660_v10 = vadd.f32 1.0, %v2569_v58  ;;  %v1663_v17 = vmul.f32 -0.5, %v2569_v58  ;;  %v1666_v42 = vand.u32 2147483647, %v2569_v58 }
 0x344   : >> { %2572 = vpow2.f32 %v1532_v49  ;;  %v1653_v21 = vmul.f32 0.6931472, %v2571_v26 }
 0x345   : >> { %2574 = vlog2.f32 %v1660_v10  ;;  %v1664_v63 = vadd.f32 1.0, %v1663_v17  ;;  %vm1667_vm12 = vcmp.lt.f32.partialorder %v1666_v42, 0.0004427343 }
 0x346   : >> { %v1659_v31 = vsel %vm1658_vm10, %v1656_v8, %v1653_v21 }
 0x347   : >> { %v1691_v1 = vsel %vm1499_vm11, %v1479_v12, %v1659_v31  ;;  %v1665_v19 = vmul.f32 %v2569_v58, %v1664_v63 }
 0x348   : >> { %v1707_v18 = vadd.f32 %v1691_v1, %v3391_v34 }
 0x34a   : >> { %v2573_v16 = vpop.eup %2572  ;;  %v1716_v23 = vpack.c.bf16 %v1707_v18, %v1706_v22 }
 0x34b   : >> { %v2575_v6 = vpop.eup %2574  ;;  %v1669_v56 = vadd.f32 1.0, %v2573_v16  ;;  %v1672_v28 = vmul.f32 -0.5, %v2573_v16  ;;  %v1675_v32 = vand.u32 2147483647, %v2573_v16 }
 0x34c   : >> { %1824 = vmatmul.bf16.gmra.mxu0 %v1716_v23  ;;  %v1662_v38 = vmul.f32 0.6931472, %v2575_v6 }
 0x34d   : >> { %2576 = vlog2.f32 %v1669_v56  ;;  %v1673_v53 = vadd.f32 1.0, %v1672_v28  ;;  %vm1676_vm14 = vcmp.lt.f32.partialorder %v1675_v32, 0.0004427343 }
 0x34e   : >> { %v1668_v36 = vsel %vm1667_vm12, %v1665_v19, %v1662_v38 }
 0x34f   : >> { %v1674_v33 = vmul.f32 %v2573_v16, %v1673_v53  ;;  %v1692_v43 = vsel %vm1500_vm13, %v1482_v27, %v1668_v36 }
 0x350   : >> { %v1708_v7 = vadd.f32 %v1692_v43, %v3396_v5 }
 0x353   : >> { %v2577_v35 = vpop.eup %2576 }
 0x354   : >> { %v1671_v34 = vmul.f32 0.6931472, %v2577_v35 }
 0x356   : >> { %v1677_v12 = vsel %vm1676_vm14, %v1674_v33, %v1671_v34 }
 0x357   : >> { %v1693_v44 = vsel %vm1501_vm15, %v1484_v60, %v1677_v12 }
 0x358   : >> { %v1709_v39 = vadd.f32 %v1693_v44, %v3399_v59 }
 0x35a   : >> { %v1717_v9 = vpack.c.bf16 %v1709_v39, %v1708_v7 }
 0x35c   : >> { %1829 = vmatmul.bf16.gmra.mxu0 %v1717_v9 }
 0x369   : >> { %v1795_v46 = vpop.f32.mrf.mxu0 }
 0x36a   : >> { %v1796_v37 = vadd.f32 %v2321_v29, %v1795_v46 }
 0x36c   : >> { %1836 = vst [vmem:[%s3473_s10] sm:$0xff] %v1796_v37 }
 0x371   : >> { %v1797_v5 = vpop.f32.mrf.mxu0 }
 0x372   : >> { %v1798_v59 = vadd.f32 %v2321_v29, %v1797_v5 }
 0x374   : >> { %1837 = vst [vmem:[%s3473_s10 + $0x8] sm:$0xff] %v1798_v59 }
 0x379   : >> { %v1800_v15 = vpop.f32.mrf.mxu0 }
 0x37a   : >> { %v1801_v40 = vadd.f32 %v2321_v29, %v1800_v15 }
 0x37c   : >> { %1838 = vst [vmem:[%s3473_s10 + $0x10] sm:$0xff] %v1801_v40 }
 0x381   : >> { %v1802_v41 = vpop.f32.mrf.mxu0 }
 0x382   : >> { %v1803_v48 = vadd.f32 %v2321_v29, %v1802_v41 }
 0x384   : >> { %1839 = vst [vmem:[%s3473_s10 + $0x18] sm:$0xff] %v1803_v48 }
 0x389   : >> { %v1805_v11 = vpop.f32.mrf.mxu0 }
 0x38a   : >> { %v1806_v47 = vadd.f32 %v2321_v29, %v1805_v11 }
 0x38c   : >> { %1840 = vst [vmem:[%s3473_s10 + $0x20] sm:$0xff] %v1806_v47 }
 0x391   : >> { %v1807_v24 = vpop.f32.mrf.mxu0 }
 0x392   : >> { %v1808_v27 = vadd.f32 %v2321_v29, %v1807_v24 }
 0x394   : >> { %1841 = vst [vmem:[%s3473_s10 + $0x28] sm:$0xff] %v1808_v27 }
 0x399   : >> { %v1810_v13 = vpop.f32.mrf.mxu0 }
 0x39a   : >> { %v1811_v61 = vadd.f32 %v2321_v29, %v1810_v13 }
 0x39c   : >> { %1842 = vst [vmem:[%s3473_s10 + $0x30] sm:$0xff] %v1811_v61 }
 0x3a1   : >> { %v1812_v45 = vpop.f32.mrf.mxu0 }
 0x3a2   : >> { %v1813_v3 = vadd.f32 %v2321_v29, %v1812_v45 }
 0x3a4   : >> { %1843 = vst [vmem:[%s3473_s10 + $0x38] sm:$0xff] %v1813_v3 }
 0x3a9   : >> { %v1815_v50 = vpop.f32.mrf.mxu0 }
 0x3aa   : >> { %v1816_v30 = vadd.f32 %v2321_v29, %v1815_v50 }
 0x3ac   : >> { %1844 = vst [vmem:[%s3473_s10 + $0x40] sm:$0xff] %v1816_v30 }
 0x3b1   : >> { %v1817_v4 = vpop.f32.mrf.mxu0 }
 0x3b2   : >> { %v1818_v54 = vadd.f32 %v2321_v29, %v1817_v4 }
 0x3b4   : >> { %1845 = vst [vmem:[%s3473_s10 + $0x48] sm:$0xff] %v1818_v54 }
 0x3b9   : >> { %v1820_v55 = vpop.f32.mrf.mxu0 }
 0x3ba   : >> { %v1821_v52 = vadd.f32 %v2321_v29, %v1820_v55 }
 0x3bc   : >> { %1846 = vst [vmem:[%s3473_s10 + $0x50] sm:$0xff] %v1821_v52 }
 0x3c1   : >> { %v1822_v57 = vpop.f32.mrf.mxu0 }
 0x3c2   : >> { %v1823_v62 = vadd.f32 %v2321_v29, %v1822_v57 }
 0x3c4   : >> { %1847 = vst [vmem:[%s3473_s10 + $0x58] sm:$0xff] %v1823_v62 }
 0x3c9   : >> { %v1825_v51 = vpop.f32.mrf.mxu0 }
 0x3ca   : >> { %v1826_v60 = vadd.f32 %v2321_v29, %v1825_v51 }
 0x3cc   : >> { %1848 = vst [vmem:[%s3473_s10 + $0x60] sm:$0xff] %v1826_v60 }
 0x3d1   : >> { %v1827_v25 = vpop.f32.mrf.mxu0 }
 0x3d2   : >> { %v1828_v0 = vadd.f32 %v2321_v29, %v1827_v25 }
 0x3d4   : >> { %1849 = vst [vmem:[%s3473_s10 + $0x68] sm:$0xff] %v1828_v0 }
 0x3d9   : >> { %v1830_v20 = vpop.f32.mrf.mxu0 }
 0x3da   : >> { %v1831_v58 = vadd.f32 %v2321_v29, %v1830_v20 }
 0x3dc   : >> { %1850 = vst [vmem:[%s3473_s10 + $0x70] sm:$0xff] %v1831_v58 }
 0x3e0   : > { %299 = sbr.rel (!%p297_p1) target bundleno = 56 (0x38), region = 109 }
 0x3e1   : >> { %v1832_v49 = vpop.f32.mrf.mxu0 }
 0x3e2   : >> { %v1833_v2 = vadd.f32 %v2321_v29, %v1832_v49 }
 0x3e4   : >> { %1851 = vst [vmem:[%s3473_s10 + $0x78] sm:$0xff] %v1833_v2 }
 0x3e5   : > { %2725 = shalt.err (!%p2722_p12)
}
 0x3e6   : > { %s2789_s15 = smov 128   ;;  %s2790_s29 = smov 8  }
 0x3e7   : > { %2240 = dma.vmem_to_hbm [thread:$0]  (%p2904_p7), %s1866_s12, 4096, %s1868_s30, %s1853_s26, %s2789_s15, %s2789_s15, %s2790_s29  }
 0x3e8 PF: > { %s1882_s10 = sand.u32 1, %s2764_s18   ;;  %p3540_p13 = scmp.ge.s32.totalorder %s2776_s21, 2 }
 0x3e9   : > { %s1883_s7 = scalar_lea.sflag [#allocation4], %s1882_s10 }
 0x3ea   : > { %p2257_p0 = pnand %p3540_p13, %p2856_p6 }
 0x3ec   : > { %p2258_p3 = pneg %p2257_p0 }
 0x3ee   : > { %2759 = dma.done.wait (%p2258_p3), %s1883_s7, 4096  }
 0x3ef   : > { %2761 = vsyncadd (%p2258_p3), %s1883_s7, 4294963200  ;;  %p20_p5 = scmp.ge.s32.totalorder %s2888_s27, 4   ;;  %s3541_s18 = smov %s2768_s19 }
 0x3f0   : > { %s3542_s19 = smov %s2772_s20  ;;  %s3543_s20 = smov %s2900_s6 }
 0x3f1   : > { %s3544_s21 = smov %s2888_s27  ;;  %22 = sbr.rel (!%p20_p5) target bundleno = 7 (0x7), region = 120 }
 0x3f6   :  { %1889 = vsyncpa [#allocation3], 1 }
 0x3f7   :  { %1891 = vsyncpa [#allocation3 + $0x1], 1 }
 0x3f8   :  { %1892 = vsyncpa [#allocation6], 1 }
 0x3f9   :  { %1893 = vsyncpa [#allocation9], 1 }
 0x3fa   :  { %1894 = vsyncpa [#allocation4], 1 }
 0x3fb   :  { %1896 = vsyncpa [#allocation4 + $0x1], 1 }

// kernel: tpu_custom_call.1
= control target key start
LH: loop header
LB: loop body
LE: loop exit
PB: predicated region body
PF: predicated region fallthrough
CT: control target
= control target key end

     0   :  { %10 = vsyncpa [#allocation3], 0  ;;  %s3528_s0 = inlined_call_operand.hbm [shape: f32[512,128], index: 0, kind: input, shape index: {}]   ;;  %s3529_s1 = inlined_call_operand.hbm [shape: bf16[4,128,128], index: 1, kind: input, shape index: {}]   ;;  %s3530_s2 = inlined_call_operand.hbm [shape: f32[4,128], index: 2, kind: input, shape index: {}]   ;;  %s3531_s3 = inlined_call_operand.hbm [shape: bf16[128,128], index: 3, kind: input, shape index: {}]   ;;  %s3532_s4 = inlined_call_operand.vmem [shape: f32[1,128], index: 4, kind: input, shape index: {}]   ;;  %s3533_s5 = inlined_call_operand.hbm [shape: f32[512,128], index: 5, kind: output, shape index: {}]  }
   0x1   :  { %12 = vsyncpa [#allocation3 + $0x1], 0 }
   0x2   :  { %13 = vsyncpa [#allocation6], 0 }
   0x3   :  { %14 = vsyncpa [#allocation9], 0 }
   0x4   :  { %15 = vsyncpa [#allocation4], 0 }
   0x5   :  { %17 = vsyncpa [#allocation4 + $0x1], 0  ;;  %s2821_s18 = smov 0   ;;  %s2823_s19 = smov 0  }
   0x6   :  { %s2825_s20 = smov 0   ;;  %s2827_s21 = smov 0  }
   0x7 LB: > { %s2842_s22 = sadd.s32 4294967295, %s2776_s21   ;;  %s1979_s23 = sadd.s32 4294967294, %s2776_s21   ;;  %s2776_s21 = sphi %s2827_s21, %s3544_s21   ;;  %s2772_s20 = sphi %s2825_s20, %s3543_s20   ;;  %s2768_s19 = sphi %s2823_s19, %s3542_s19   ;;  %s2764_s18 = sphi %s2821_s18, %s3541_s18  }
   0x8   : > { %p43_p0 = scmp.ne.s32.totalorder %s2768_s19, %s2764_s18  ;;  %p44_p1 = scmp.eq.s32.totalorder %s2842_s22, 0 }
   0x9   : > { %p151_p2 = scmp.eq.s32.totalorder %s2842_s22, 1  ;;  %p157_p3 = scmp.eq.s32.totalorder %s1979_s23, 1 }
   0xa   : > { %p2851_p4 = por %p44_p1, %p43_p0  ;;  %p1980_p5 = scmp.ge.s32.totalorder %s2776_s21, 1 }
   0xb   : > { %p2856_p6 = por %p157_p3, %p43_p0  ;;  %p164_p7 = scmp.lt.s32.totalorder %s2776_s21, 3 }
   0xc   : > { %s175_s28 = sshll.u32 %s3529_s1, 4  ;;  %s2782_s30 = smov [#allocation5]   ;;  %s176_s28 = int_to_ptr.hbm [resolvable:$true] %s175_s28 }
   0xd   : > { %p2864_p8 = pnand %p1980_p5, %p164_p7  ;;  %s177_s6 = sshll.u32 %s2782_s30, 4  ;;  %s178_s6 = int_to_ptr.vmem [resolvable:$true] %s177_s6 }
   0xe   : > { %s190_s10 = sshll.u32 %s3530_s2, 4  ;;  %s2783_s11 = smov 64   ;;  %s191_s10 = int_to_ptr.hbm [resolvable:$true] %s190_s10 }
   0xf   : > { %p2242_p9 = pneg %p2864_p8  ;;  %s2784_s12 = smov 4  }
  0x10   : > { %s2785_s13 = smov [#allocation7]   ;;  %s201_s17 = sshll.u32 %s3531_s3, 4  ;;  %s202_s17 = int_to_ptr.hbm [resolvable:$true] %s201_s17 }
  0x11   : > { %p2872_p10 = pnand %p2242_p9, %p44_p1  ;;  %s192_s14 = sshll.u32 %s2785_s13, 4  ;;  %s193_s14 = int_to_ptr.vmem [resolvable:$true] %s192_s14 }
  0x12   : > { %s2786_s23 = smov [#allocation8]   ;;  %s2888_s27 = sadd.s32 1, %s2776_s21  }
  0x13   : > { %2245 = dma.hbm_to_vmem [thread:$0]  (!%p2872_p10), %s176_s28, 4096, %s178_s6, [#allocation6], %s2783_s11, %s2783_s11, %s2784_s12  }
  0x14   : > { %2248 = dma.hbm_to_vmem [thread:$0]  (!%p2872_p10), %s191_s10, 64, %s193_s14, [#allocation6]  }
  0x15   : > { %s203_s26 = sshll.u32 %s2786_s23, 4  ;;  %s27_s28 = ssub.s32 %s2776_s21, %s2888_s27  ;;  %s204_s26 = int_to_ptr.vmem [resolvable:$true] %s203_s26 }
  0x16   : > { %2251 = dma.hbm_to_vmem [thread:$0]  (!%p2872_p10), %s202_s17, 1024, %s204_s26, [#allocation9], %s2783_s11, %s2783_s11, %s2784_s12  }
  0x17   : > { %s30_s30 = sadd.s32 1, %s2772_s20  ;;  %p28_p12 = scmp.eq.s32.totalorder %s27_s28, 0 }
  0x18   : > { %p37_p13 = scmp.ne.s32.totalorder %s2772_s20, %s2768_s19  ;;  %p38_p0 = scmp.eq.s32.totalorder %s2776_s21, 0 }
  0x19   : > { %p2263_p3 = scmp.lt.s32.totalorder %s2776_s21, 2  ;;  %s220_s9 = sand.u32 1, %s2772_s20  }
  0x1a   : > { %s2900_s6 = scalar_select %p28_p12, %s2772_s20, %s30_s30  }
  0x1b   : > { %p39_p5 = por %p38_p0, %p37_p13  ;;  %p2904_p7 = por %p151_p2, %p37_p13 }
  0x1c   : > { %s2160_s10 = sshll.u32 %s2776_s21, 8  ;;  %s1985_s7 = sshll.u32 %s220_s9, 8 }
  0x1d   : > { %s229_s12 = scalar_lea.hbm %s3528_s0, %s2160_s10  ;;  %s224_s15 = scalar_lea.vmem [#allocation2], %s1985_s7 }
  0x1e   : > { %s230_s14 = sshll.u32 %s229_s12, 4  ;;  %s232_s16 = sshll.u32 %s224_s15, 4  ;;  %s231_s14 = int_to_ptr.hbm [resolvable:$true] %s230_s14  ;;  %s233_s16 = int_to_ptr.vmem [resolvable:$true] %s232_s16 }
  0x1f   : > { %p2915_p9 = pnand %p2263_p3, %p39_p5  ;;  %s221_s23 = scalar_lea.sflag [#allocation3], %s220_s9 }
  0x20   : > { %s2668_s26 = sshra.s32 %s231_s14, 4  ;;  %s2675_s7 = scalar_lea.hbm %s3528_s0, 512  ;;  %s2669_s26 = int_to_ptr.hbm [resolvable:$true] %s2668_s26 }
  0x21   : > { %s2670_s28 = scalar_lea.hbm %s2669_s26, 256  ;;  %p2672_p10 = pneg %p2915_p9 }
  0x22   : > { %p2671_p2 = scmp.ne.s32.totalorder %s2669_s26, %s2670_s28  ;;  %p2676_p0 = scmp.lt.s32.totalorder %s2669_s26, %s3528_s0 }
  0x23   : > { %p2677_p3 = scmp.lt.s32.totalorder %s2675_s7, %s2670_s28 }
  0x24   : > { %p2673_p12 = pnand %p2672_p10, %p2671_p2 }
  0x25   : > { %p2678_p5 = por %p2677_p3, %p2676_p0 }
  0x26   : > { %p2674_p13 = pneg %p2673_p12 }
  0x28   : > { %p2679_p11 = pnand %p2678_p5, %p2674_p13 }
  0x2a   : > { %2682 = shalt.err (!%p2679_p11)
}
  0x2b   : > { %s2787_s9 = smov 128   ;;  %s2788_s12 = smov 8  }
  0x2c   : > { %2255 = dma.hbm_to_vmem [thread:$0]  (!%p2915_p9), %s231_s14, 4096, %s233_s16, %s221_s23, %s2787_s9, %s2787_s9, %s2788_s12  }
  0x2d   : > { %244 = sbr.rel (%p2864_p8) target bundleno = 1000 (0x3e8), region = 40  ;;  %s2932_s15 = sand.u32 (!%p2864_p8), 1, %s2768_s19  }
  0x2e   : > { %s1989_s30 = sshll.u32 (!%p2864_p8), %s2932_s15, 8  ;;  %s247_s26 = scalar_lea.sflag (!%p2864_p8), [#allocation3], %s2932_s15 }
  0x2f   : > { %s2936_s28 = scalar_lea.vmem (!%p2864_p8), [#allocation2], %s1989_s30 }
  0x32   : > { %2747 = dma.done.wait (%p2851_p4), %s247_s26, 4096  }
  0x33   : > { %2749 = vsyncadd (%p2851_p4), %s247_s26, 4294963200 }
  0x34   : > { %2751 = dma.done.wait (%p44_p1), [#allocation6], 4160  }
  0x35   : > { %2753 = vsyncadd (%p44_p1), [#allocation6], 4294963136 }
  0x36   : > { %2755 = dma.done.wait (%p44_p1), [#allocation9], 1024  }
  0x37   : > { %2757 = vsyncadd (%p44_p1), [#allocation9], 4294966272  ;;  %s2950_s29 = scalar_lea.vmem [#allocation10], %s1989_s30  ;;  %s2952_s14 = smov 0  }
  0x38 LB: >> { %v2168_v0 = vld [vmem:[#allocation5 + $0x38] sm:$0xff]  ;;  %v2167_v1 = vld [vmem:[#allocation5 + $0x30] sm:$0xff]  ;;  %v2166_v2 = vld [vmem:[#allocation5 + $0x28] sm:$0xff]  ;;  %s1994_s24 = sshll.u32 %s2780_s14, 7  ;;  %s300_s14 = sadd.s32 1, %s2780_s14   ;;  %s2780_s14 = sphi %s2952_s14, %s300_s14  }
  0x39   : >> { %393 = vmatpush.bf16.msra.mxu0 %v2168_v0  ;;  %2202 = vmatpush.bf16.msra.mxu1 %v2168_v0  ;;  %v2165_v3 = vld [vmem:[#allocation5 + $0x20] sm:$0xff]  ;;  %v2164_v4 = vld [vmem:[#allocation5 + $0x18] sm:$0xff]  ;;  %v2163_v5 = vld [vmem:[#allocation5 + $0x10] sm:$0xff]  ;;  %s2961_s16 = scalar_lea.vmem %s2936_s28, %s1994_s24 [#allocation2]  ;;  %s3473_s10 = scalar_lea.vmem %s2950_s29, %s1994_s24 [#allocation10] }
  0x3a   : >> { %2203 = vmatpush.bf16.msra.mxu2 %v2168_v0  ;;  %2204 = vmatpush.bf16.msra.mxu3 %v2168_v0  ;;  %v2162_v6 = vld [vmem:[#allocation5 + $0x8] sm:$0xff]  ;;  %v2161_v7 = vld [vmem:[#allocation5] sm:$0xff]  ;;  %v2996_v20 = vld [vmem:[%s2961_s16 + $0x10] sm:$0xff]  ;;  %p297_p1 = scmp.ge.s32.totalorder %s300_s14, 2  }
  0x3b   : >> { %v2964_v8 = vld [vmem:[%s2961_s16] sm:$0xff]  ;;  %v2967_v9 = vld [vmem:[%s2961_s16 + $0x8] sm:$0xff]  ;;  %v2999_v21 = vld [vmem:[%s2961_s16 + $0x18] sm:$0xff]  ;;  %s2201_s7 = sshll.u32 (%p297_p1), %s2842_s22, 8  ;;  %s1865_s12 = sshll.u32 (%p297_p1), %s2950_s29, 4  ;;  %s1866_s12 = int_to_ptr.vmem [resolvable:$true] %s1865_s12 }
  0x3c   : >> { %v2970_v10 = vld [vmem:[%s2961_s16 + $0x20] sm:$0xff]  ;;  %v2973_v11 = vld [vmem:[%s2961_s16 + $0x28] sm:$0xff]  ;;  %v319_v16 = vpack.c.bf16 %v2967_v9, %v2964_v8  ;;  %v3002_v22 = vld [vmem:[%s2961_s16 + $0x30] sm:$0xff]  ;;  %v320_v28 = vpack.c.bf16 %v2999_v21, %v2996_v20  ;;  %s1864_s9 = scalar_lea.hbm (%p297_p1), %s3533_s5, %s2201_s7  ;;  %s1853_s26 = scalar_lea.sflag (%p297_p1), [#allocation4], %s2932_s15 }
  0x3d   : >> { %394 = vmatpush.bf16.msra.mxu0 %v2167_v1  ;;  %2205 = vmatpush.bf16.msra.mxu1 %v2167_v1  ;;  %v2976_v12 = vld [vmem:[%s2961_s16 + $0x40] sm:$0xff]  ;;  %v2979_v13 = vld [vmem:[%s2961_s16 + $0x48] sm:$0xff]  ;;  %v321_v17 = vpack.c.bf16 %v2973_v11, %v2970_v10  ;;  %v3005_v23 = vld [vmem:[%s2961_s16 + $0x38] sm:$0xff]  ;;  %s1867_s30 = sshll.u32 (%p297_p1), %s1864_s9, 4  ;;  %s2718_s22 = scalar_lea.hbm (%p297_p1), %s3533_s5, 512  ;;  %s1868_s30 = int_to_ptr.hbm [resolvable:$true] %s1867_s30 }
  0x3e   : >> { %2206 = vmatpush.bf16.msra.mxu2 %v2167_v1  ;;  %2207 = vmatpush.bf16.msra.mxu3 %v2167_v1  ;;  %v2982_v14 = vld [vmem:[%s2961_s16 + $0x60] sm:$0xff]  ;;  %v2985_v15 = vld [vmem:[%s2961_s16 + $0x68] sm:$0xff]  ;;  %v323_v18 = vpack.c.bf16 %v2979_v13, %v2976_v12  ;;  %v3008_v24 = vld [vmem:[%s2961_s16 + $0x50] sm:$0xff]  ;;  %v322_v29 = vpack.c.bf16 %v3005_v23, %v3002_v22  ;;  %s2712_s24 = sshra.s32 (%p297_p1), %s1868_s30, 4  ;;  %s2713_s24 = int_to_ptr.hbm [resolvable:$true] %s2712_s24 }
  0x3f   : >> { %v325_v19 = vpack.c.bf16 %v2985_v15, %v2982_v14  ;;  %v3011_v25 = vld [vmem:[%s2961_s16 + $0x58] sm:$0xff]  ;;  %v3014_v26 = vld [vmem:[%s2961_s16 + $0x70] sm:$0xff]  ;;  %v2174_v34 = vld [vmem:[#allocation5 + $0x68] sm:$0xff]  ;;  %p2719_p9 = scmp.lt.s32.totalorder (%p297_p1), %s2713_s24, %s3533_s5 }
  0x40   : >> { %v3017_v27 = vld [vmem:[%s2961_s16 + $0x78] sm:$0xff]  ;;  %v324_v30 = vpack.c.bf16 %v3011_v25, %v3008_v24  ;;  %v2175_v33 = vld [vmem:[#allocation5 + $0x70] sm:$0xff]  ;;  %v2173_v35 = vld [vmem:[#allocation5 + $0x60] sm:$0xff]  ;;  %s2714_s16 = scalar_lea.hbm (%p297_p1), %s2713_s24, 256 }
  0x41   : >> { %395 = vmatpush.bf16.msra.mxu0 %v2166_v2  ;;  %2208 = vmatpush.bf16.msra.mxu1 %v2166_v2  ;;  %v326_v31 = vpack.c.bf16 %v3017_v27, %v3014_v26  ;;  %v2176_v32 = vld [vmem:[#allocation5 + $0x78] sm:$0xff]  ;;  %v2171_v37 = vld [vmem:[#allocation5 + $0x50] sm:$0xff]  ;;  %v2170_v38 = vld [vmem:[#allocation5 + $0x48] sm:$0xff]  ;;  %p2715_p4 = scmp.ne.s32.totalorder (%p297_p1), %s2713_s24, %s2714_s16  ;;  %p2720_p2 = scmp.lt.s32.totalorder (%p297_p1), %s2718_s22, %s2714_s16 }
  0x42   : >> { %2209 = vmatpush.bf16.msra.mxu2 %v2166_v2  ;;  %2210 = vmatpush.bf16.msra.mxu3 %v2166_v2  ;;  %v2172_v36 = vld [vmem:[#allocation5 + $0x58] sm:$0xff]  ;;  %v3027_v39 = vld [vmem:[#allocation7] ss:$0 sm:$0xff] }
  0x43   : >> { %v2169_v41 = vld [vmem:[#allocation5 + $0x40] sm:$0xff]  ;;  %p2716_p8 = pnand (%p297_p1), %p2715_p4, %p2904_p7  ;;  %p2721_p10 = por (%p297_p1), %p2720_p2, %p2719_p9 }
  0x45   : >> { %396 = vmatpush.bf16.msra.mxu0 %v2165_v3  ;;  %2211 = vmatpush.bf16.msra.mxu1 %v2165_v3  ;;  %p2717_p11 = pneg (%p297_p1), %p2716_p8 }
  0x46   : >> { %2212 = vmatpush.bf16.msra.mxu2 %v2165_v3  ;;  %2213 = vmatpush.bf16.msra.mxu3 %v2165_v3 }
  0x47   : > { %p2722_p12 = pnand (%p297_p1), %p2721_p10, %p2717_p11 }
  0x49   : >> { %397 = vmatpush.bf16.msra.mxu0 %v2164_v4  ;;  %2214 = vmatpush.bf16.msra.mxu1 %v2164_v4 }
  0x4a   : >> { %2215 = vmatpush.bf16.msra.mxu2 %v2164_v4  ;;  %2216 = vmatpush.bf16.msra.mxu3 %v2164_v4 }
  0x4d   : >> { %398 = vmatpush.bf16.msra.mxu0 %v2163_v5  ;;  %2217 = vmatpush.bf16.msra.mxu1 %v2163_v5 }
  0x4e   : >> { %2218 = vmatpush.bf16.msra.mxu2 %v2163_v5  ;;  %2219 = vmatpush.bf16.msra.mxu3 %v2163_v5 }
  0x51   : >> { %399 = vmatpush.bf16.msra.mxu0 %v2162_v6  ;;  %2220 = vmatpush.bf16.msra.mxu1 %v2162_v6 }
  0x52   : >> { %2221 = vmatpush.bf16.msra.mxu2 %v2162_v6  ;;  %2222 = vmatpush.bf16.msra.mxu3 %v2162_v6 }
  0x55   : >> { %400 = vmatpush.bf16.msra.mxu0 %v2161_v7  ;;  %2223 = vmatpush.bf16.msra.mxu1 %v2161_v7 }
  0x56   : >> { %2224 = vmatpush.bf16.msra.mxu2 %v2161_v7  ;;  %2225 = vmatpush.bf16.msra.mxu3 %v2161_v7 }
  0x58   : >> { %401 = vmatmul.bf16.vlgmr.msra.gmra.mxu0 %v319_v16  ;;  %411 = vmatmul.bf16.vlgmr.msra.gmra.mxu1 %v321_v17 }
  0x59   : >> { %421 = vmatmul.bf16.vlgmr.msra.gmra.mxu2 %v323_v18  ;;  %431 = vmatmul.bf16.vlgmr.msra.gmra.mxu3 %v325_v19 }
  0x5a   : >> { %741 = vmatpush.bf16.msrb.mxu1 %v2176_v32 }
  0x5e   : >> { %742 = vmatpush.bf16.msrb.mxu1 %v2175_v33 }
  0x62   : >> { %743 = vmatpush.bf16.msrb.mxu1 %v2174_v34 }
  0x66   : >> { %744 = vmatpush.bf16.msrb.mxu1 %v2173_v35 }
  0x68   : >> { %406 = vmatmul.bf16.gmra.mxu0 %v320_v28  ;;  %416 = vmatmul.bf16.gmra.mxu1 %v322_v29 }
  0x69   : >> { %426 = vmatmul.bf16.gmra.mxu2 %v324_v30  ;;  %436 = vmatmul.bf16.gmra.mxu3 %v326_v31 }
  0x6a   : >> { %745 = vmatpush.bf16.msrb.mxu1 %v2172_v36 }
  0x6e   : >> { %746 = vmatpush.bf16.msrb.mxu1 %v2171_v37 }
  0x72   : >> { %747 = vmatpush.bf16.msrb.mxu1 %v2170_v38 }
  0x76   : >> { %748 = vmatpush.bf16.msrb.mxu1 %v2169_v41 }
  0xd5   : >> { %v402_v40 = vpop.f32.mrf.mxu0  ;;  %v412_v44 = vpop.f32.mrf.mxu1 }
  0xd6   : >> { %v403_v42 = vadd.f32 %v3027_v39, %v402_v40  ;;  %v3036_v57 = vadd.f32 %v3027_v39, %v412_v44 }
  0xd8   : >> { %v458_v43 = vmul.f32 1.442695, %v403_v42  ;;  %v466_v0 = vmul.f32 1.442695, %v3036_v57  ;;  %vm442_vm1 = vcmp.gt.f32.partialorder %v403_v42, 20.0  ;;  %vm446_vm10 = vcmp.gt.f32.partialorder %v3036_v57, 20.0 }
  0xda   : >> { %2322 = vpow2.f32 %v458_v43 }
  0xdd   : >> { %v404_v45 = vpop.f32.mrf.mxu0  ;;  %v414_v50 = vpop.f32.mrf.mxu1 }
  0xde   : >> { %v405_v46 = vadd.f32 %v3027_v39, %v404_v45  ;;  %v3039_v62 = vadd.f32 %v3027_v39, %v414_v50 }
  0xe0   : >> { %v2323_v47 = vpop.eup %2322  ;;  %v460_v48 = vmul.f32 1.442695, %v405_v46  ;;  %v468_v6 = vmul.f32 1.442695, %v3039_v62  ;;  %vm443_vm3 = vcmp.gt.f32.partialorder %v405_v46, 20.0  ;;  %vm447_vm11 = vcmp.gt.f32.partialorder %v3039_v62, 20.0 }
  0xe1   : >> { %v490_v49 = vadd.f32 1.0, %v2323_v47  ;;  %v493_v52 = vmul.f32 -0.5, %v2323_v47  ;;  %v496_v61 = vand.u32 2147483647, %v2323_v47 }
  0xe2   : >> { %2324 = vpow2.f32 %v460_v48 }
  0xe3   : >> { %2326 = vlog2.f32 %v490_v49  ;;  %v494_v59 = vadd.f32 1.0, %v493_v52  ;;  %vm497_vm0 = vcmp.lt.f32.partialorder %v496_v61, 0.0004427343 }
  0xe5   : >> { %v407_v51 = vpop.f32.mrf.mxu0  ;;  %v495_v2 = vmul.f32 %v2323_v47, %v494_v59  ;;  %v417_v7 = vpop.f32.mrf.mxu1 }
  0xe6   : >> { %v3032_v53 = vadd.f32 %v3027_v39, %v407_v51 }
  0xe8   : >> { %v2325_v54 = vpop.eup %2324  ;;  %v462_v55 = vmul.f32 1.442695, %v3032_v53  ;;  %vm444_vm5 = vcmp.gt.f32.partialorder %v3032_v53, 20.0 }
  0xe9   : >> { %v2327_v56 = vpop.eup %2326  ;;  %v499_v58 = vadd.f32 1.0, %v2325_v54  ;;  %v502_v60 = vmul.f32 -0.5, %v2325_v54  ;;  %v505_v5 = vand.u32 2147483647, %v2325_v54 }
  0xea   : >> { %2328 = vpow2.f32 %v462_v55  ;;  %v492_v63 = vmul.f32 0.6931472, %v2327_v56 }
  0xeb   : >> { %2330 = vlog2.f32 %v499_v58  ;;  %v503_v3 = vadd.f32 1.0, %v502_v60  ;;  %vm506_vm2 = vcmp.lt.f32.partialorder %v505_v5, 0.0004427343 }
  0xec   : >> { %v498_v17 = vsel %vm497_vm0, %v495_v2, %v492_v63  ;;  %2332 = vpow2.f32 %v466_v0 }
  0xed   : >> { %v409_v1 = vpop.f32.mrf.mxu0  ;;  %v504_v30 = vmul.f32 %v2325_v54, %v503_v3  ;;  %v634_v31 = vsel %vm442_vm1, %v403_v42, %v498_v17  ;;  %v419_v42 = vpop.f32.mrf.mxu1 }
  0xee   : >> { %v3043_v4 = vadd.f32 %v3027_v39, %v409_v1  ;;  %v3048_v34 = vadd.f32 %v634_v31, %v2964_v8  ;;  %v422_v8 = vpop.f32.mrf.mxu2 }
  0xf0   : >> { %v2329_v16 = vpop.eup %2328  ;;  %v464_v18 = vmul.f32 1.442695, %v3043_v4  ;;  %vm445_vm7 = vcmp.gt.f32.partialorder %v3043_v4, 20.0 }
  0xf1   : >> { %v2331_v19 = vpop.eup %2330  ;;  %v508_v28 = vadd.f32 1.0, %v2329_v16  ;;  %v511_v36 = vmul.f32 -0.5, %v2329_v16  ;;  %v514_v48 = vand.u32 2147483647, %v2329_v16 }
  0xf2   : >> { %v501_v29 = vmul.f32 0.6931472, %v2331_v19  ;;  %2334 = vpow2.f32 %v464_v18  ;;  %v2333_v37 = vpop.eup %2332 }
  0xf3   : >> { %2336 = vpow2.f32 %v468_v6  ;;  %v512_v45 = vadd.f32 1.0, %v511_v36  ;;  %v526_v50 = vadd.f32 1.0, %v2333_v37  ;;  %vm515_vm4 = vcmp.lt.f32.partialorder %v514_v48, 0.0004427343 }
  0xf4   : >> { %v507_v32 = vsel %vm506_vm2, %v504_v30, %v501_v29  ;;  %2338 = vlog2.f32 %v508_v28  ;;  %v529_v61 = vmul.f32 -0.5, %v2333_v37  ;;  %v532_v29 = vand.u32 2147483647, %v2333_v37 }
  0xf5   : >> { %v635_v33 = vsel %vm443_vm3, %v405_v46, %v507_v32  ;;  %v3056_v46 = vadd.f32 %v3027_v39, %v417_v7  ;;  %v513_v52 = vmul.f32 %v2329_v16, %v512_v45 }
  0xf6   : >> { %v3051_v35 = vadd.f32 %v635_v33, %v2967_v9  ;;  %v3059_v9 = vadd.f32 %v3027_v39, %v419_v42  ;;  %v424_v5 = vpop.f32.mrf.mxu2  ;;  %v530_v18 = vadd.f32 1.0, %v529_v61  ;;  %vm533_vm8 = vcmp.lt.f32.partialorder %v532_v29, 0.0004427343 }
  0xf7   : >> { %v470_v55 = vmul.f32 1.442695, %v3056_v46  ;;  %vm448_vm14 = vcmp.gt.f32.partialorder %v3056_v46, 20.0 }
  0xf8   : >> { %v2335_v38 = vpop.eup %2334  ;;  %v666_v40 = vpack.c.bf16 %v3051_v35, %v3048_v34  ;;  %v472_v58 = vmul.f32 1.442695, %v3059_v9  ;;  %vm449_vm15 = vcmp.gt.f32.partialorder %v3059_v9, 20.0 }
  0xf9   : >> { %v2337_v41 = vpop.eup %2336  ;;  %v517_v43 = vadd.f32 1.0, %v2335_v38  ;;  %v520_v47 = vmul.f32 -0.5, %v2335_v38  ;;  %v523_v56 = vand.u32 2147483647, %v2335_v38 }
  0xfa   : >> { %v2339_v44 = vpop.eup %2338  ;;  %749 = vmatmul.bf16.vlgmr.msrb.gmra.mxu1 %v666_v40  ;;  %v535_v51 = vadd.f32 1.0, %v2337_v41  ;;  %v538_v1 = vmul.f32 -0.5, %v2337_v41  ;;  %v541_v30 = vand.u32 2147483647, %v2337_v41 }
  0xfb   : >> { %2340 = vlog2.f32 %v517_v43  ;;  %v510_v49 = vmul.f32 0.6931472, %v2339_v44  ;;  %v521_v54 = vadd.f32 1.0, %v520_v47  ;;  %vm524_vm6 = vcmp.lt.f32.partialorder %v523_v56, 0.0004427343 }
  0xfc   : >> { %2342 = vlog2.f32 %v526_v50  ;;  %v539_v19 = vadd.f32 1.0, %v538_v1  ;;  %vm542_vm9 = vcmp.lt.f32.partialorder %v541_v30, 0.0004427343 }
  0xfd   : >> { %v516_v59 = vsel %vm515_vm4, %v513_v52, %v510_v49  ;;  %2344 = vlog2.f32 %v535_v51  ;;  %v522_v0 = vmul.f32 %v2335_v38, %v521_v54 }
  0xfe   : >> { %2346 = vpow2.f32 %v470_v55  ;;  %v636_v2 = vsel %vm444_vm5, %v3032_v53, %v516_v59  ;;  %v540_v38 = vmul.f32 %v2337_v41, %v539_v19  ;;  %v427_v45 = vpop.f32.mrf.mxu2 }
  0xff   : >> { %2348 = vpow2.f32 %v472_v58  ;;  %v3068_v16 = vadd.f32 %v636_v2, %v2996_v20  ;;  %v3076_v20 = vadd.f32 %v3027_v39, %v422_v8  ;;  %v432_v2 = vpop.f32.mrf.mxu3 }
 0x101   : >> { %v2341_v60 = vpop.eup %2340  ;;  %vm450_vm2 = vcmp.gt.f32.partialorder %v3076_v20, 20.0 }
 0x102   : >> { %v519_v63 = vmul.f32 0.6931472, %v2341_v60  ;;  %v2343_v7 = vpop.eup %2342 }
 0x103   : >> { %v2345_v28 = vpop.eup %2344  ;;  %v528_v33 = vmul.f32 0.6931472, %v2343_v7 }
 0x104   : >> { %v525_v3 = vsel %vm524_vm6, %v522_v0, %v519_v63  ;;  %v2347_v31 = vpop.eup %2346  ;;  %v537_v36 = vmul.f32 0.6931472, %v2345_v28 }
 0x105   : >> { %v637_v6 = vsel %vm445_vm7, %v3043_v4, %v525_v3  ;;  %v2349_v32 = vpop.eup %2348  ;;  %v531_v4 = vmul.f32 %v2333_v37, %v530_v18  ;;  %v544_v40 = vadd.f32 1.0, %v2347_v31  ;;  %v474_v37 = vmul.f32 1.442695, %v3076_v20 }
 0x106   : >> { %v3071_v17 = vadd.f32 %v637_v6, %v2999_v21  ;;  %v3079_v21 = vadd.f32 %v3027_v39, %v424_v5  ;;  %v553_v42 = vadd.f32 1.0, %v2349_v32  ;;  %v543_v44 = vsel %vm542_vm9, %v540_v38, %v537_v36  ;;  %v429_v60 = vpop.f32.mrf.mxu2 }
 0x107   : >> { %v534_v43 = vsel %vm533_vm8, %v531_v4, %v528_v33  ;;  %2350 = vlog2.f32 %v544_v40  ;;  %v639_v8 = vsel %vm447_vm11, %v3039_v62, %v543_v44  ;;  %v547_v48 = vmul.f32 -0.5, %v2347_v31  ;;  %v434_v4 = vpop.f32.mrf.mxu3 }
 0x108   : >> { %v667_v53 = vpack.c.bf16 %v3071_v17, %v3068_v16  ;;  %v476_v41 = vmul.f32 1.442695, %v3079_v21  ;;  %v638_v47 = vsel %vm446_vm10, %v3036_v57, %v534_v43  ;;  %2352 = vlog2.f32 %v553_v42 }
 0x109   : >> { %v556_v49 = vmul.f32 -0.5, %v2349_v32  ;;  %2354 = vpow2.f32 %v474_v37  ;;  %v3088_v50 = vadd.f32 %v638_v47, %v2970_v10  ;;  %v3091_v51 = vadd.f32 %v639_v8, %v2973_v11 }
 0x10a   : >> { %754 = vmatmul.bf16.gmra.mxu1 %v667_v53  ;;  %2356 = vpow2.f32 %v476_v41  ;;  %v548_v54 = vadd.f32 1.0, %v547_v48  ;;  %v550_v58 = vand.u32 2147483647, %v2347_v31  ;;  %v559_v59 = vand.u32 2147483647, %v2349_v32 }
 0x10b   : >> { %v557_v55 = vadd.f32 1.0, %v556_v49  ;;  %v668_v57 = vpack.c.bf16 %v3091_v51, %v3088_v50  ;;  %v3096_v11 = vadd.f32 %v3027_v39, %v427_v45  ;;  %v3099_v3 = vadd.f32 %v3027_v39, %v429_v60 }
 0x10c   : >> { %v549_v0 = vmul.f32 %v2347_v31, %v548_v54  ;;  %vm551_vm12 = vcmp.lt.f32.partialorder %v550_v58, 0.0004427343  ;;  %vm560_vm13 = vcmp.lt.f32.partialorder %v559_v59, 0.0004427343  ;;  %v3119_v8 = vadd.f32 %v3027_v39, %v434_v4 }
 0x10d   : >> { %v2351_v52 = vpop.eup %2350  ;;  %v558_v1 = vmul.f32 %v2349_v32, %v557_v55  ;;  %v478_v19 = vmul.f32 1.442695, %v3096_v11  ;;  %v480_v28 = vmul.f32 1.442695, %v3099_v3  ;;  %vm451_vm3 = vcmp.gt.f32.partialorder %v3079_v21, 20.0 }
 0x10e   : >> { %v2353_v56 = vpop.eup %2352  ;;  %v546_v63 = vmul.f32 0.6931472, %v2351_v52  ;;  %v484_v58 = vmul.f32 1.442695, %v3119_v8  ;;  %vm452_vm6 = vcmp.gt.f32.partialorder %v3096_v11, 20.0  ;;  %vm453_vm7 = vcmp.gt.f32.partialorder %v3099_v3, 20.0 }
 0x10f   : >> { %v2355_v62 = vpop.eup %2354  ;;  %v555_v10 = vmul.f32 0.6931472, %v2353_v56  ;;  %v437_v56 = vpop.f32.mrf.mxu3  ;;  %vm455_vm11 = vcmp.gt.f32.partialorder %v3119_v8, 20.0 }
 0x110   : >> { %v2357_v61 = vpop.eup %2356  ;;  %v562_v5 = vadd.f32 1.0, %v2355_v62  ;;  %v552_v7 = vsel %vm551_vm12, %v549_v0, %v546_v63  ;;  %v565_v53 = vmul.f32 -0.5, %v2355_v62  ;;  %v568_v43 = vand.u32 2147483647, %v2355_v62 }
 0x111   : >> { %v571_v6 = vadd.f32 1.0, %v2357_v61  ;;  %v561_v18 = vsel %vm560_vm13, %v558_v1, %v555_v10  ;;  %v640_v29 = vsel %vm448_vm14, %v3056_v46, %v552_v7  ;;  %v574_v31 = vmul.f32 -0.5, %v2357_v61 }
 0x112   : >> { %2358 = vlog2.f32 %v562_v5  ;;  %v641_v30 = vsel %vm449_vm15, %v3059_v9, %v561_v18  ;;  %v3108_v32 = vadd.f32 %v640_v29, %v3002_v22  ;;  %v566_v38 = vadd.f32 1.0, %v565_v53 }
 0x113   : >> { %2360 = vlog2.f32 %v571_v6  ;;  %v3111_v33 = vadd.f32 %v641_v30, %v3005_v23  ;;  %v575_v40 = vadd.f32 1.0, %v574_v31  ;;  %v577_v46 = vand.u32 2147483647, %v2357_v61 }
 0x114   : >> { %2362 = vpow2.f32 %v478_v19  ;;  %v567_v41 = vmul.f32 %v2355_v62, %v566_v38  ;;  %v3116_v23 = vadd.f32 %v3027_v39, %v432_v2  ;;  %vm569_vm0 = vcmp.lt.f32.partialorder %v568_v43, 0.0004427343 }
 0x115   : >> { %2364 = vpow2.f32 %v480_v28  ;;  %v669_v9 = vpack.c.bf16 %v3111_v33, %v3108_v32  ;;  %v576_v47 = vmul.f32 %v2357_v61, %v575_v40  ;;  %vm578_vm1 = vcmp.lt.f32.partialorder %v577_v46, 0.0004427343 }
 0x116   : >> { %v482_v55 = vmul.f32 1.442695, %v3116_v23  ;;  %vm454_vm10 = vcmp.gt.f32.partialorder %v3116_v23, 20.0 }
 0x117   : >> { %v439_v7 = vpop.f32.mrf.mxu3 }
 0x118   : >> { %v2359_v36 = vpop.eup %2358  ;;  %v3139_v30 = vadd.f32 %v3027_v39, %v439_v7 }
 0x119   : >> { %v2361_v42 = vpop.eup %2360  ;;  %v564_v45 = vmul.f32 0.6931472, %v2359_v36 }
 0x11a   : >> { %759 = vmatmul.bf16.gmra.mxu1 %v668_v57  ;;  %v2363_v44 = vpop.eup %2362  ;;  %v573_v22 = vmul.f32 0.6931472, %v2361_v42  ;;  %v488_v40 = vmul.f32 1.442695, %v3139_v30  ;;  %vm457_vm15 = vcmp.gt.f32.partialorder %v3139_v30, 20.0 }
 0x11b   : >> { %v2365_v37 = vpop.eup %2364  ;;  %v580_v48 = vadd.f32 1.0, %v2363_v44  ;;  %v570_v52 = vsel %vm569_vm0, %v567_v41, %v564_v45  ;;  %v583_v62 = vmul.f32 -0.5, %v2363_v44  ;;  %v586_v5 = vand.u32 2147483647, %v2363_v44 }
 0x11c   : >> { %v589_v49 = vadd.f32 1.0, %v2365_v37  ;;  %v579_v54 = vsel %vm578_vm1, %v576_v47, %v573_v22  ;;  %v642_v59 = vsel %vm450_vm2, %v3076_v20, %v570_v52  ;;  %v592_v60 = vmul.f32 -0.5, %v2365_v37 }
 0x11d   : >> { %2366 = vlog2.f32 %v580_v48  ;;  %v643_v57 = vsel %vm451_vm3, %v3079_v21, %v579_v54  ;;  %v3128_v61 = vadd.f32 %v642_v59, %v2976_v12  ;;  %v584_v10 = vadd.f32 1.0, %v583_v62 }
 0x11e   : >> { %2368 = vlog2.f32 %v589_v49  ;;  %v3131_v63 = vadd.f32 %v643_v57, %v2979_v13  ;;  %v593_v1 = vadd.f32 1.0, %v592_v60  ;;  %v595_v6 = vand.u32 2147483647, %v2365_v37 }
 0x11f   : >> { %2370 = vpow2.f32 %v482_v55  ;;  %v585_v28 = vmul.f32 %v2363_v44, %v584_v10  ;;  %v3136_v13 = vadd.f32 %v3027_v39, %v437_v56  ;;  %vm587_vm4 = vcmp.lt.f32.partialorder %v586_v5, 0.0004427343 }
 0x120   : >> { %2372 = vpow2.f32 %v484_v58  ;;  %v670_v20 = vpack.c.bf16 %v3131_v63, %v3128_v61  ;;  %v594_v29 = vmul.f32 %v2365_v37, %v593_v1  ;;  %vm596_vm5 = vcmp.lt.f32.partialorder %v595_v6, 0.0004427343 }
 0x121   : >> { %v486_v38 = vmul.f32 1.442695, %v3136_v13  ;;  %vm456_vm14 = vcmp.gt.f32.partialorder %v3136_v13, 20.0 }
 0x123   : >> { %v2367_v0 = vpop.eup %2366 }
 0x124   : >> { %v2369_v2 = vpop.eup %2368  ;;  %v582_v19 = vmul.f32 0.6931472, %v2367_v0 }
 0x125   : >> { %v2371_v21 = vpop.eup %2370  ;;  %v591_v12 = vmul.f32 0.6931472, %v2369_v2 }
 0x126   : >> { %v2373_v18 = vpop.eup %2372  ;;  %v598_v53 = vadd.f32 1.0, %v2371_v21  ;;  %v588_v4 = vsel %vm587_vm4, %v585_v28, %v582_v19  ;;  %v601_v39 = vmul.f32 -0.5, %v2371_v21  ;;  %v604_v47 = vand.u32 2147483647, %v2371_v21 }
 0x127   : >> { %v607_v31 = vadd.f32 1.0, %v2373_v18  ;;  %v597_v36 = vsel %vm596_vm5, %v594_v29, %v591_v12  ;;  %v644_v42 = vsel %vm452_vm6, %v3096_v11, %v588_v4  ;;  %v610_v46 = vmul.f32 -0.5, %v2373_v18  ;;  %v2184_v12 = vld [vmem:[#allocation5 + $0xb8] sm:$0xff] }
 0x128   : >> { %2374 = vlog2.f32 %v598_v53  ;;  %v645_v43 = vsel %vm453_vm7, %v3099_v3, %v597_v36  ;;  %v602_v45 = vadd.f32 1.0, %v601_v39  ;;  %v613_v48 = vand.u32 2147483647, %v2373_v18  ;;  %1089 = vmatpush.bf16.msrb.mxu2 %v2184_v12 }
 0x129   : >> { %2376 = vlog2.f32 %v607_v31  ;;  %v3151_v44 = vadd.f32 %v645_v43, %v3011_v25  ;;  %v611_v41 = vadd.f32 1.0, %v610_v46  ;;  %vm605_vm8 = vcmp.lt.f32.partialorder %v604_v47, 0.0004427343  ;;  %v2183_v31 = vld [vmem:[#allocation5 + $0xb0] sm:$0xff]  ;;  %v2180_v43 = vld [vmem:[#allocation5 + $0x98] sm:$0xff] }
 0x12a   : >> { %764 = vmatmul.bf16.gmra.mxu1 %v669_v9  ;;  %2378 = vpow2.f32 %v486_v38  ;;  %v3148_v9 = vadd.f32 %v644_v42, %v3008_v24  ;;  %v603_v54 = vmul.f32 %v2371_v21, %v602_v45  ;;  %vm614_vm9 = vcmp.lt.f32.partialorder %v613_v48, 0.0004427343  ;;  %v2182_v38 = vld [vmem:[#allocation5 + $0xa8] sm:$0xff]  ;;  %v2181_v42 = vld [vmem:[#allocation5 + $0xa0] sm:$0xff] }
 0x12b   : >> { %2380 = vpow2.f32 %v488_v40  ;;  %v612_v24 = vmul.f32 %v2373_v18, %v611_v41 }
 0x12c   : >> { %v671_v11 = vpack.c.bf16 %v3151_v44, %v3148_v9  ;;  %1090 = vmatpush.bf16.msrb.mxu2 %v2183_v31 }
 0x12e   : >> { %v2375_v37 = vpop.eup %2374 }
 0x12f   : >> { %v2377_v22 = vpop.eup %2376  ;;  %v600_v52 = vmul.f32 0.6931472, %v2375_v37  ;;  %v2177_v37 = vld [vmem:[#allocation5 + $0x80] sm:$0xff] }
 0x130   : >> { %v2379_v3 = vpop.eup %2378  ;;  %v609_v55 = vmul.f32 0.6931472, %v2377_v22  ;;  %1091 = vmatpush.bf16.msrb.mxu2 %v2182_v38 }
 0x131   : >> { %v2381_v49 = vpop.eup %2380  ;;  %v616_v25 = vadd.f32 1.0, %v2379_v3  ;;  %v606_v58 = vsel %vm605_vm8, %v603_v54, %v600_v52  ;;  %v619_v60 = vmul.f32 -0.5, %v2379_v3  ;;  %v622_v21 = vand.u32 2147483647, %v2379_v3 }
 0x132   : >> { %v625_v56 = vadd.f32 1.0, %v2381_v49  ;;  %v615_v59 = vsel %vm614_vm9, %v612_v24, %v609_v55  ;;  %v646_v57 = vsel %vm454_vm10, %v3116_v23, %v606_v58  ;;  %v628_v0 = vmul.f32 -0.5, %v2381_v49 }
 0x133   : >> { %2382 = vlog2.f32 %v616_v25  ;;  %v647_v62 = vsel %vm455_vm11, %v3119_v8, %v615_v59  ;;  %v3160_v10 = vadd.f32 %v646_v57, %v2982_v14  ;;  %v620_v5 = vadd.f32 1.0, %v619_v60 }
 0x134   : >> { %2384 = vlog2.f32 %v625_v56  ;;  %v3163_v1 = vadd.f32 %v647_v62, %v2985_v15  ;;  %v629_v6 = vadd.f32 1.0, %v628_v0  ;;  %v631_v7 = vand.u32 2147483647, %v2381_v49  ;;  %1092 = vmatpush.bf16.msrb.mxu2 %v2181_v42 }
 0x135   : >> { %v621_v18 = vmul.f32 %v2379_v3, %v620_v5  ;;  %vm623_vm12 = vcmp.lt.f32.partialorder %v622_v21, 0.0004427343 }
 0x136   : >> { %v672_v23 = vpack.c.bf16 %v3163_v1, %v3160_v10  ;;  %v630_v28 = vmul.f32 %v2381_v49, %v629_v6  ;;  %vm632_vm13 = vcmp.lt.f32.partialorder %v631_v7, 0.0004427343 }
 0x138   : >> { %1093 = vmatpush.bf16.msrb.mxu2 %v2180_v43 }
 0x139   : >> { %v2383_v2 = vpop.eup %2382 }
 0x13a   : >> { %769 = vmatmul.bf16.gmra.mxu1 %v670_v20  ;;  %v2385_v20 = vpop.eup %2384  ;;  %v618_v8 = vmul.f32 0.6931472, %v2383_v2 }
 0x13b   : >> { %v627_v19 = vmul.f32 0.6931472, %v2385_v20 }
 0x13c   : >> { %v624_v14 = vsel %vm623_vm12, %v621_v18, %v618_v8 }
 0x13d   : >> { %v633_v15 = vsel %vm632_vm13, %v630_v28, %v627_v19  ;;  %v648_v29 = vsel %vm456_vm14, %v3136_v13, %v624_v14  ;;  %v2179_v13 = vld [vmem:[#allocation5 + $0x90] sm:$0xff] }
 0x13e   : >> { %v649_v53 = vsel %vm457_vm15, %v3139_v30, %v633_v15  ;;  %v3172_v4 = vadd.f32 %v648_v29, %v3014_v26  ;;  %v3179_v30 = vld [vmem:[#allocation7 + $0x1] ss:$0 sm:$0xff]  ;;  %1094 = vmatpush.bf16.msrb.mxu2 %v2179_v13  ;;  %v2178_v26 = vld [vmem:[#allocation5 + $0x88] sm:$0xff] }
 0x13f   : >> { %v3175_v36 = vadd.f32 %v649_v53, %v3017_v27 }
 0x141   : >> { %v673_v40 = vpack.c.bf16 %v3175_v36, %v3172_v4 }
 0x142   : >> { %1095 = vmatpush.bf16.msrb.mxu2 %v2178_v26 }
 0x146   : >> { %1096 = vmatpush.bf16.msrb.mxu2 %v2177_v37 }
 0x14a   : >> { %774 = vmatmul.bf16.gmra.mxu1 %v671_v11 }
 0x15a   : >> { %779 = vmatmul.bf16.gmra.mxu1 %v672_v23 }
 0x16a   : >> { %784 = vmatmul.bf16.gmra.mxu1 %v673_v40 }
 0x177   : >> { %v750_v39 = vpop.f32.mrf.mxu1 }
 0x178   : >> { %v751_v27 = vadd.f32 %v3179_v30, %v750_v39 }
 0x17a   : >> { %v806_v46 = vmul.f32 1.442695, %v751_v27  ;;  %vm790_vm1 = vcmp.gt.f32.partialorder %v751_v27, 20.0 }
 0x17c   : >> { %2386 = vpow2.f32 %v806_v46 }
 0x17f   : >> { %v752_v45 = vpop.f32.mrf.mxu1 }
 0x180   : >> { %v753_v41 = vadd.f32 %v3179_v30, %v752_v45 }
 0x182   : >> { %v2387_v22 = vpop.eup %2386  ;;  %v808_v47 = vmul.f32 1.442695, %v753_v41  ;;  %vm791_vm3 = vcmp.gt.f32.partialorder %v753_v41, 20.0 }
 0x183   : >> { %v838_v48 = vadd.f32 1.0, %v2387_v22  ;;  %v841_v3 = vmul.f32 -0.5, %v2387_v22  ;;  %v844_v58 = vand.u32 2147483647, %v2387_v22 }
 0x184   : >> { %2388 = vpow2.f32 %v808_v47 }
 0x185   : >> { %2390 = vlog2.f32 %v838_v48  ;;  %v842_v25 = vadd.f32 1.0, %v841_v3  ;;  %vm845_vm0 = vcmp.lt.f32.partialorder %v844_v58, 0.0004427343 }
 0x187   : >> { %v755_v11 = vpop.f32.mrf.mxu1  ;;  %v843_v62 = vmul.f32 %v2387_v22, %v842_v25 }
 0x188   : >> { %v3184_v49 = vadd.f32 %v3179_v30, %v755_v11 }
 0x18a   : >> { %v2389_v52 = vpop.eup %2388  ;;  %v810_v54 = vmul.f32 1.442695, %v3184_v49  ;;  %vm792_vm5 = vcmp.gt.f32.partialorder %v3184_v49, 20.0 }
 0x18b   : >> { %v2391_v55 = vpop.eup %2390  ;;  %v847_v24 = vadd.f32 1.0, %v2389_v52  ;;  %v850_v56 = vmul.f32 -0.5, %v2389_v52  ;;  %v853_v2 = vand.u32 2147483647, %v2389_v52 }
 0x18c   : >> { %2392 = vpow2.f32 %v810_v54  ;;  %v840_v59 = vmul.f32 0.6931472, %v2391_v55 }
 0x18d   : >> { %2394 = vlog2.f32 %v847_v24  ;;  %v851_v60 = vadd.f32 1.0, %v850_v56  ;;  %vm854_vm2 = vcmp.lt.f32.partialorder %v853_v2, 0.0004427343 }
 0x18e   : >> { %v846_v6 = vsel %vm845_vm0, %v843_v62, %v840_v59 }
 0x18f   : >> { %v757_v57 = vpop.f32.mrf.mxu1  ;;  %v852_v8 = vmul.f32 %v2389_v52, %v851_v60  ;;  %v982_v18 = vsel %vm790_vm1, %v751_v27, %v846_v6 }
 0x190   : >> { %v758_v0 = vadd.f32 %v3179_v30, %v757_v57  ;;  %v3192_v12 = vadd.f32 %v982_v18, %v3048_v34 }
 0x192   : >> { %v2393_v5 = vpop.eup %2392  ;;  %v812_v20 = vmul.f32 1.442695, %v758_v0  ;;  %vm793_vm7 = vcmp.gt.f32.partialorder %v758_v0, 20.0 }
 0x193   : >> { %v2395_v21 = vpop.eup %2394  ;;  %v856_v7 = vadd.f32 1.0, %v2393_v5  ;;  %v859_v53 = vmul.f32 -0.5, %v2393_v5  ;;  %v862_v39 = vand.u32 2147483647, %v2393_v5 }
 0x194   : >> { %v849_v23 = vmul.f32 0.6931472, %v2395_v21  ;;  %2396 = vpow2.f32 %v812_v20 }
 0x195   : >> { %2398 = vlog2.f32 %v856_v7  ;;  %v860_v13 = vadd.f32 1.0, %v859_v53  ;;  %vm863_vm4 = vcmp.lt.f32.partialorder %v862_v39, 0.0004427343 }
 0x196   : >> { %v855_v19 = vsel %vm854_vm2, %v852_v8, %v849_v23 }
 0x197   : >> { %v983_v28 = vsel %vm791_vm3, %v753_v41, %v855_v19  ;;  %v760_v14 = vpop.f32.mrf.mxu1  ;;  %v861_v46 = vmul.f32 %v2393_v5, %v860_v13 }
 0x198   : >> { %v3189_v15 = vadd.f32 %v3179_v30, %v760_v14  ;;  %v3195_v29 = vadd.f32 %v983_v28, %v3051_v35 }
 0x19a   : >> { %v2397_v31 = vpop.eup %2396  ;;  %v814_v38 = vmul.f32 1.442695, %v3189_v15  ;;  %v1014_v40 = vpack.c.bf16 %v3195_v29, %v3192_v12  ;;  %vm794_vm9 = vcmp.gt.f32.partialorder %v3189_v15, 20.0 }
 0x19b   : >> { %v2399_v42 = vpop.eup %2398  ;;  %v865_v43 = vadd.f32 1.0, %v2397_v31  ;;  %v868_v26 = vmul.f32 -0.5, %v2397_v31  ;;  %v871_v45 = vand.u32 2147483647, %v2397_v31 }
 0x19c   : >> { %2400 = vpow2.f32 %v814_v38  ;;  %1097 = vmatmul.bf16.vlgmr.msrb.gmra.mxu2 %v1014_v40  ;;  %v858_v34 = vmul.f32 0.6931472, %v2399_v42 }
 0x19d   : >> { %2402 = vlog2.f32 %v865_v43  ;;  %v869_v37 = vadd.f32 1.0, %v868_v26  ;;  %vm872_vm6 = vcmp.lt.f32.partialorder %v871_v45, 0.0004427343 }
 0x19e   : >> { %v864_v47 = vsel %vm863_vm4, %v861_v46, %v858_v34 }
 0x19f   : >> { %v762_v27 = vpop.f32.mrf.mxu1  ;;  %v870_v52 = vmul.f32 %v2397_v31, %v869_v37  ;;  %v984_v54 = vsel %vm792_vm5, %v3184_v49, %v864_v47 }
 0x1a0   : >> { %v763_v35 = vadd.f32 %v3179_v30, %v762_v27  ;;  %v3207_v58 = vadd.f32 %v984_v54, %v3068_v16 }
 0x1a2   : >> { %v2401_v41 = vpop.eup %2400  ;;  %v816_v22 = vmul.f32 1.442695, %v763_v35  ;;  %vm795_vm11 = vcmp.gt.f32.partialorder %v763_v35, 20.0 }
 0x1a3   : >> { %v2403_v48 = vpop.eup %2402  ;;  %v874_v11 = vadd.f32 1.0, %v2401_v41  ;;  %v877_v57 = vmul.f32 -0.5, %v2401_v41  ;;  %v880_v20 = vand.u32 2147483647, %v2401_v41 }
 0x1a4   : >> { %2404 = vpow2.f32 %v816_v22  ;;  %v867_v3 = vmul.f32 0.6931472, %v2403_v48 }
 0x1a5   : >> { %2406 = vlog2.f32 %v874_v11  ;;  %vm881_vm8 = vcmp.lt.f32.partialorder %v880_v20, 0.0004427343 }
 0x1a6   : >> { %v873_v55 = vsel %vm872_vm6, %v870_v52, %v867_v3 }
 0x1a7   : >> { %v765_v24 = vpop.f32.mrf.mxu1  ;;  %v985_v25 = vsel %vm793_vm7, %v758_v0, %v873_v55  ;;  %v878_v0 = vadd.f32 1.0, %v877_v57 }
 0x1a8   : >> { %v3204_v56 = vadd.f32 %v3179_v30, %v765_v24  ;;  %v3210_v59 = vadd.f32 %v985_v25, %v3071_v17 }
 0x1a9   : >> { %v879_v7 = vmul.f32 %v2401_v41, %v878_v0 }
 0x1aa   : >> { %v2405_v62 = vpop.eup %2404  ;;  %v818_v60 = vmul.f32 1.442695, %v3204_v56  ;;  %v1015_v49 = vpack.c.bf16 %v3210_v59, %v3207_v58  ;;  %vm796_vm13 = vcmp.gt.f32.partialorder %v3204_v56, 20.0 }
 0x1ab   : >> { %v2407_v2 = vpop.eup %2406  ;;  %v883_v5 = vadd.f32 1.0, %v2405_v62  ;;  %v886_v6 = vmul.f32 -0.5, %v2405_v62  ;;  %v889_v8 = vand.u32 2147483647, %v2405_v62 }
 0x1ac   : >> { %2408 = vpow2.f32 %v818_v60  ;;  %1102 = vmatmul.bf16.gmra.mxu2 %v1015_v49  ;;  %v876_v16 = vmul.f32 0.6931472, %v2407_v2 }
 0x1ad   : >> { %2410 = vlog2.f32 %v883_v5  ;;  %v887_v23 = vadd.f32 1.0, %v886_v6  ;;  %vm890_vm10 = vcmp.lt.f32.partialorder %v889_v8, 0.0004427343 }
 0x1ae   : >> { %v882_v28 = vsel %vm881_vm8, %v879_v7, %v876_v16 }
 0x1af   : >> { %v767_v21 = vpop.f32.mrf.mxu1  ;;  %v888_v38 = vmul.f32 %v2405_v62, %v887_v23  ;;  %v986_v40 = vsel %vm794_vm9, %v3189_v15, %v882_v28 }
 0x1b0   : >> { %v768_v17 = vadd.f32 %v3179_v30, %v767_v21  ;;  %v3222_v39 = vadd.f32 %v986_v40, %v3088_v50 }
 0x1b2   : >> { %v2409_v18 = vpop.eup %2408  ;;  %v820_v19 = vmul.f32 1.442695, %v768_v17  ;;  %vm797_vm15 = vcmp.gt.f32.partialorder %v768_v17, 20.0 }
 0x1b3   : >> { %v2411_v14 = vpop.eup %2410  ;;  %v892_v53 = vadd.f32 1.0, %v2409_v18  ;;  %v895_v27 = vmul.f32 -0.5, %v2409_v18  ;;  %v898_v47 = vand.u32 2147483647, %v2409_v18 }
 0x1b4   : >> { %2412 = vpow2.f32 %v820_v19  ;;  %v885_v31 = vmul.f32 0.6931472, %v2411_v14 }
 0x1b5   : >> { %2414 = vlog2.f32 %v892_v53  ;;  %vm899_vm12 = vcmp.lt.f32.partialorder %v898_v47, 0.0004427343 }
 0x1b6   : >> { %v891_v42 = vsel %vm890_vm10, %v888_v38, %v885_v31 }
 0x1b7   : >> { %v770_v43 = vpop.f32.mrf.mxu1  ;;  %v987_v13 = vsel %vm795_vm11, %v763_v35, %v891_v42  ;;  %v896_v35 = vadd.f32 1.0, %v895_v27 }
 0x1b8   : >> { %v3219_v26 = vadd.f32 %v3179_v30, %v770_v43  ;;  %v3225_v34 = vadd.f32 %v987_v13, %v3091_v51 }
 0x1b9   : >> { %v897_v11 = vmul.f32 %v2409_v18, %v896_v35 }
 0x1ba   : >> { %v2413_v46 = vpop.eup %2412  ;;  %v822_v37 = vmul.f32 1.442695, %v3219_v26  ;;  %v1016_v15 = vpack.c.bf16 %v3225_v34, %v3222_v39  ;;  %vm798_vm1 = vcmp.gt.f32.partialorder %v3219_v26, 20.0 }
 0x1bb   : >> { %v2415_v45 = vpop.eup %2414  ;;  %v901_v41 = vadd.f32 1.0, %v2413_v46  ;;  %v904_v22 = vmul.f32 -0.5, %v2413_v46  ;;  %v907_v52 = vand.u32 2147483647, %v2413_v46 }
 0x1bc   : >> { %2416 = vpow2.f32 %v822_v37  ;;  %1107 = vmatmul.bf16.gmra.mxu2 %v1016_v15  ;;  %v894_v50 = vmul.f32 0.6931472, %v2415_v45 }
 0x1bd   : >> { %2418 = vlog2.f32 %v901_v41  ;;  %v905_v3 = vadd.f32 1.0, %v904_v22  ;;  %vm908_vm14 = vcmp.lt.f32.partialorder %v907_v52, 0.0004427343 }
 0x1be   : >> { %v900_v24 = vsel %vm899_vm12, %v897_v11, %v894_v50 }
 0x1bf   : >> { %v772_v48 = vpop.f32.mrf.mxu1  ;;  %v906_v60 = vmul.f32 %v2413_v46, %v905_v3  ;;  %v988_v49 = vsel %vm796_vm13, %v3204_v56, %v900_v24 }
 0x1c0   : >> { %v773_v51 = vadd.f32 %v3179_v30, %v772_v48  ;;  %v3237_v20 = vadd.f32 %v988_v49, %v3108_v32 }
 0x1c2   : >> { %v2417_v54 = vpop.eup %2416  ;;  %v824_v55 = vmul.f32 1.442695, %v773_v51  ;;  %vm799_vm3 = vcmp.gt.f32.partialorder %v773_v51, 20.0 }
 0x1c3   : >> { %v2419_v25 = vpop.eup %2418  ;;  %v910_v57 = vadd.f32 1.0, %v2417_v54  ;;  %v913_v21 = vmul.f32 -0.5, %v2417_v54  ;;  %v916_v28 = vand.u32 2147483647, %v2417_v54 }
 0x1c4   : >> { %2420 = vpow2.f32 %v824_v55  ;;  %v903_v62 = vmul.f32 0.6931472, %v2419_v25 }
 0x1c5   : >> { %2422 = vlog2.f32 %v910_v57  ;;  %vm917_vm0 = vcmp.lt.f32.partialorder %v916_v28, 0.0004427343 }
 0x1c6   : >> { %v909_v2 = vsel %vm908_vm14, %v906_v60, %v903_v62 }
 0x1c7   : >> { %v775_v5 = vpop.f32.mrf.mxu1  ;;  %v989_v0 = vsel %vm797_vm15, %v768_v17, %v909_v2  ;;  %v914_v17 = vadd.f32 1.0, %v913_v21 }
 0x1c8   : >> { %v3234_v6 = vadd.f32 %v3179_v30, %v775_v5  ;;  %v3240_v16 = vadd.f32 %v989_v0, %v3111_v33 }
 0x1c9   : >> { %v915_v53 = vmul.f32 %v2417_v54, %v914_v17 }
 0x1ca   : >> { %v2421_v7 = vpop.eup %2420  ;;  %v826_v23 = vmul.f32 1.442695, %v3234_v6  ;;  %v1017_v56 = vpack.c.bf16 %v3240_v16, %v3237_v20  ;;  %vm800_vm5 = vcmp.gt.f32.partialorder %v3234_v6, 20.0 }
 0x1cb   : >> { %v2423_v8 = vpop.eup %2422  ;;  %v919_v18 = vadd.f32 1.0, %v2421_v7  ;;  %v922_v19 = vmul.f32 -0.5, %v2421_v7  ;;  %v925_v38 = vand.u32 2147483647, %v2421_v7 }
 0x1cc   : >> { %2424 = vpow2.f32 %v826_v23  ;;  %1112 = vmatmul.bf16.gmra.mxu2 %v1017_v56  ;;  %v912_v32 = vmul.f32 0.6931472, %v2423_v8 }
 0x1cd   : >> { %2426 = vlog2.f32 %v919_v18  ;;  %v923_v31 = vadd.f32 1.0, %v922_v19  ;;  %vm926_vm2 = vcmp.lt.f32.partialorder %v925_v38, 0.0004427343 }
 0x1ce   : >> { %v918_v43 = vsel %vm917_vm0, %v915_v53, %v912_v32 }
 0x1cf   : >> { %v777_v14 = vpop.f32.mrf.mxu1  ;;  %v924_v37 = vmul.f32 %v2421_v7, %v923_v31  ;;  %v990_v15 = vsel %vm798_vm1, %v3219_v26, %v918_v43 }
 0x1d0   : >> { %v778_v33 = vadd.f32 %v3179_v30, %v777_v14  ;;  %v3252_v47 = vadd.f32 %v990_v15, %v3128_v61 }
 0x1d2   : >> { %v2425_v40 = vpop.eup %2424  ;;  %v828_v42 = vmul.f32 1.442695, %v778_v33  ;;  %vm801_vm7 = vcmp.gt.f32.partialorder %v778_v33, 20.0 }
 0x1d3   : >> { %v2427_v13 = vpop.eup %2426  ;;  %v928_v27 = vadd.f32 1.0, %v2425_v40  ;;  %v931_v48 = vmul.f32 -0.5, %v2425_v40  ;;  %v934_v24 = vand.u32 2147483647, %v2425_v40 }
 0x1d4   : >> { %2428 = vpow2.f32 %v828_v42  ;;  %v921_v46 = vmul.f32 0.6931472, %v2427_v13 }
 0x1d5   : >> { %2430 = vlog2.f32 %v928_v27  ;;  %vm935_vm4 = vcmp.lt.f32.partialorder %v934_v24, 0.0004427343 }
 0x1d6   : >> { %v927_v45 = vsel %vm926_vm2, %v924_v37, %v921_v46 }
 0x1d7   : >> { %v780_v41 = vpop.f32.mrf.mxu1  ;;  %v991_v35 = vsel %vm799_vm3, %v773_v51, %v927_v45  ;;  %v932_v51 = vadd.f32 1.0, %v931_v48 }
 0x1d8   : >> { %v3249_v22 = vadd.f32 %v3179_v30, %v780_v41  ;;  %v3255_v50 = vadd.f32 %v991_v35, %v3131_v63 }
 0x1d9   : >> { %v933_v57 = vmul.f32 %v2425_v40, %v932_v51 }
 0x1da   : >> { %v2429_v11 = vpop.eup %2428  ;;  %v830_v3 = vmul.f32 1.442695, %v3249_v22  ;;  %v1018_v26 = vpack.c.bf16 %v3255_v50, %v3252_v47  ;;  %vm802_vm9 = vcmp.gt.f32.partialorder %v3249_v22, 20.0 }
 0x1db   : >> { %v2431_v52 = vpop.eup %2430  ;;  %v937_v54 = vadd.f32 1.0, %v2429_v11  ;;  %v940_v55 = vmul.f32 -0.5, %v2429_v11  ;;  %v943_v60 = vand.u32 2147483647, %v2429_v11 }
 0x1dc   : >> { %2432 = vpow2.f32 %v830_v3  ;;  %1117 = vmatmul.bf16.gmra.mxu2 %v1018_v26  ;;  %v930_v61 = vmul.f32 0.6931472, %v2431_v52 }
 0x1dd   : >> { %2434 = vlog2.f32 %v937_v54  ;;  %v941_v62 = vadd.f32 1.0, %v940_v55  ;;  %vm944_vm6 = vcmp.lt.f32.partialorder %v943_v60, 0.0004427343 }
 0x1de   : >> { %v936_v5 = vsel %vm935_vm4, %v933_v57, %v930_v61 }
 0x1df   : >> { %v782_v25 = vpop.f32.mrf.mxu1  ;;  %v942_v23 = vmul.f32 %v2429_v11, %v941_v62  ;;  %v992_v56 = vsel %vm800_vm5, %v3234_v6, %v936_v5 }
 0x1e0   : >> { %v783_v63 = vadd.f32 %v3179_v30, %v782_v25  ;;  %v3265_v28 = vadd.f32 %v992_v56, %v3148_v9  ;;  %v2192_v56 = vld [vmem:[#allocation5 + $0xf8] sm:$0xff] }
 0x1e1   : >> { %1437 = vmatpush.bf16.msrb.mxu3 %v2192_v56 }
 0x1e2   : >> { %v2433_v49 = vpop.eup %2432  ;;  %v832_v2 = vmul.f32 1.442695, %v783_v63  ;;  %vm803_vm11 = vcmp.gt.f32.partialorder %v783_v63, 20.0 }
 0x1e3   : >> { %v2435_v0 = vpop.eup %2434  ;;  %v946_v21 = vadd.f32 1.0, %v2433_v49  ;;  %v949_v14 = vmul.f32 -0.5, %v2433_v49  ;;  %v952_v43 = vand.u32 2147483647, %v2433_v49 }
 0x1e4   : >> { %2436 = vpow2.f32 %v832_v2  ;;  %v939_v7 = vmul.f32 0.6931472, %v2435_v0 }
 0x1e5   : >> { %2438 = vlog2.f32 %v946_v21  ;;  %v950_v42 = vadd.f32 1.0, %v949_v14  ;;  %vm953_vm8 = vcmp.lt.f32.partialorder %v952_v43, 0.0004427343  ;;  %v2185_v43 = vld [vmem:[#allocation5 + $0xc0] sm:$0xff] }
 0x1e6   : >> { %v945_v8 = vsel %vm944_vm6, %v942_v23, %v939_v7 }
 0x1e7   : >> { %v785_v18 = vpop.f32.mrf.mxu1  ;;  %v993_v17 = vsel %vm801_vm7, %v778_v33, %v945_v8 }
 0x1e8   : >> { %v786_v19 = vadd.f32 %v3179_v30, %v785_v18  ;;  %v3268_v32 = vadd.f32 %v993_v17, %v3151_v44  ;;  %v951_v44 = vmul.f32 %v2433_v49, %v950_v42 }
 0x1ea   : >> { %v2437_v53 = vpop.eup %2436  ;;  %v834_v31 = vmul.f32 1.442695, %v786_v19  ;;  %v1019_v38 = vpack.c.bf16 %v3268_v32, %v3265_v28  ;;  %vm804_vm13 = vcmp.gt.f32.partialorder %v786_v19, 20.0 }
 0x1eb   : >> { %v2439_v6 = vpop.eup %2438  ;;  %v955_v40 = vadd.f32 1.0, %v2437_v53  ;;  %v958_v33 = vmul.f32 -0.5, %v2437_v53  ;;  %v961_v37 = vand.u32 2147483647, %v2437_v53 }
 0x1ec   : >> { %2440 = vpow2.f32 %v834_v31  ;;  %1122 = vmatmul.bf16.gmra.mxu2 %v1019_v38  ;;  %v948_v13 = vmul.f32 0.6931472, %v2439_v6  ;;  %v2190_v31 = vld [vmem:[#allocation5 + $0xe8] sm:$0xff]  ;;  %v2188_v38 = vld [vmem:[#allocation5 + $0xd8] sm:$0xff]  ;;  %v2187_v6 = vld [vmem:[#allocation5 + $0xd0] sm:$0xff] }
 0x1ed   : >> { %2442 = vlog2.f32 %v955_v40  ;;  %v959_v46 = vadd.f32 1.0, %v958_v33  ;;  %vm962_vm10 = vcmp.lt.f32.partialorder %v961_v37, 0.0004427343  ;;  %v3291_v40 = vld [vmem:[#allocation7 + $0x2] ss:$0 sm:$0xff] }
 0x1ee   : >> { %v954_v41 = vsel %vm953_vm8, %v951_v44, %v948_v13 }
 0x1ef   : >> { %v787_v9 = vpop.f32.mrf.mxu1  ;;  %v960_v3 = vmul.f32 %v2437_v53, %v959_v46  ;;  %v994_v26 = vsel %vm802_vm9, %v3249_v22, %v954_v41  ;;  %v2191_v53 = vld [vmem:[#allocation5 + $0xf0] sm:$0xff] }
 0x1f0   : >> { %v788_v27 = vadd.f32 %v3179_v30, %v787_v9  ;;  %v3276_v54 = vadd.f32 %v994_v26, %v3160_v10  ;;  %1438 = vmatpush.bf16.msrb.mxu3 %v2191_v53 }
 0x1f2   : >> { %v2441_v15 = vpop.eup %2440  ;;  %v836_v45 = vmul.f32 1.442695, %v788_v27  ;;  %vm805_vm15 = vcmp.gt.f32.partialorder %v788_v27, 20.0 }
 0x1f3   : >> { %v2443_v35 = vpop.eup %2442  ;;  %v964_v48 = vadd.f32 1.0, %v2441_v15  ;;  %v967_v55 = vmul.f32 -0.5, %v2441_v15  ;;  %v970_v60 = vand.u32 2147483647, %v2441_v15 }
 0x1f4   : >> { %2444 = vpow2.f32 %v836_v45  ;;  %v957_v11 = vmul.f32 0.6931472, %v2443_v35  ;;  %1439 = vmatpush.bf16.msrb.mxu3 %v2190_v31 }
 0x1f5   : >> { %2446 = vlog2.f32 %v964_v48  ;;  %v968_v62 = vadd.f32 1.0, %v967_v55  ;;  %vm971_vm12 = vcmp.lt.f32.partialorder %v970_v60, 0.0004427343 }
 0x1f6   : >> { %v963_v30 = vsel %vm962_vm10, %v960_v3, %v957_v11 }
 0x1f7   : >> { %v995_v52 = vsel %vm803_vm11, %v783_v63, %v963_v30  ;;  %v969_v63 = vmul.f32 %v2441_v15, %v968_v62 }
 0x1f8   : >> { %v3279_v51 = vadd.f32 %v995_v52, %v3163_v1 }
 0x1fa   : >> { %v2445_v24 = vpop.eup %2444  ;;  %v1020_v61 = vpack.c.bf16 %v3279_v51, %v3276_v54 }
 0x1fb   : >> { %v2447_v25 = vpop.eup %2446  ;;  %v973_v57 = vadd.f32 1.0, %v2445_v24  ;;  %v976_v22 = vmul.f32 -0.5, %v2445_v24  ;;  %v979_v10 = vand.u32 2147483647, %v2445_v24 }
 0x1fc   : >> { %1127 = vmatmul.bf16.gmra.mxu2 %v1020_v61  ;;  %v966_v49 = vmul.f32 0.6931472, %v2447_v25 }
 0x1fd   : >> { %2448 = vlog2.f32 %v973_v57  ;;  %v977_v2 = vadd.f32 1.0, %v976_v22  ;;  %vm980_vm14 = vcmp.lt.f32.partialorder %v979_v10, 0.0004427343 }
 0x1fe   : >> { %v972_v5 = vsel %vm971_vm12, %v969_v63, %v966_v49 }
 0x1ff   : >> { %v978_v21 = vmul.f32 %v2445_v24, %v977_v2  ;;  %v996_v7 = vsel %vm804_vm13, %v786_v19, %v972_v5  ;;  %v2189_v19 = vld [vmem:[#allocation5 + $0xe0] sm:$0xff] }
 0x200   : >> { %v3284_v18 = vadd.f32 %v996_v7, %v3172_v4  ;;  %1440 = vmatpush.bf16.msrb.mxu3 %v2189_v19  ;;  %v2186_v4 = vld [vmem:[#allocation5 + $0xc8] sm:$0xff] }
 0x203   : >> { %v2449_v1 = vpop.eup %2448 }
 0x204   : >> { %v975_v0 = vmul.f32 0.6931472, %v2449_v1  ;;  %1441 = vmatpush.bf16.msrb.mxu3 %v2188_v38 }
 0x206   : >> { %v981_v23 = vsel %vm980_vm14, %v978_v21, %v975_v0 }
 0x207   : >> { %v997_v8 = vsel %vm805_vm15, %v788_v27, %v981_v23 }
 0x208   : >> { %v3287_v17 = vadd.f32 %v997_v8, %v3175_v36  ;;  %1442 = vmatpush.bf16.msrb.mxu3 %v2187_v6 }
 0x20a   : >> { %v1021_v14 = vpack.c.bf16 %v3287_v17, %v3284_v18 }
 0x20c   : >> { %1132 = vmatmul.bf16.gmra.mxu2 %v1021_v14  ;;  %1443 = vmatpush.bf16.msrb.mxu3 %v2186_v4 }
 0x210   : >> { %1444 = vmatpush.bf16.msrb.mxu3 %v2185_v43 }
 0x21f   : >> { %v1098_v36 = vpop.f32.mrf.mxu2 }
 0x220   : >> { %v1099_v42 = vadd.f32 %v3291_v40, %v1098_v36 }
 0x222   : >> { %v1154_v33 = vmul.f32 1.442695, %v1099_v42  ;;  %vm1138_vm1 = vcmp.gt.f32.partialorder %v1099_v42, 20.0 }
 0x224   : >> { %2450 = vpow2.f32 %v1154_v33 }
 0x227   : >> { %v1100_v13 = vpop.f32.mrf.mxu2 }
 0x228   : >> { %v1101_v9 = vadd.f32 %v3291_v40, %v1100_v13 }
 0x22a   : >> { %v2451_v27 = vpop.eup %2450  ;;  %v1156_v44 = vmul.f32 1.442695, %v1101_v9  ;;  %vm1139_vm3 = vcmp.gt.f32.partialorder %v1101_v9, 20.0 }
 0x22b   : >> { %v1186_v46 = vadd.f32 1.0, %v2451_v27  ;;  %v1189_v15 = vmul.f32 -0.5, %v2451_v27  ;;  %v1192_v30 = vand.u32 2147483647, %v2451_v27 }
 0x22c   : >> { %2452 = vpow2.f32 %v1156_v44 }
 0x22d   : >> { %2454 = vlog2.f32 %v1186_v46  ;;  %v1190_v3 = vadd.f32 1.0, %v1189_v15  ;;  %vm1193_vm0 = vcmp.lt.f32.partialorder %v1192_v30, 0.0004427343 }
 0x22f   : >> { %v1103_v37 = vpop.f32.mrf.mxu2  ;;  %v1191_v24 = vmul.f32 %v2451_v27, %v1190_v3 }
 0x230   : >> { %v3296_v45 = vadd.f32 %v3291_v40, %v1103_v37 }
 0x232   : >> { %v2453_v41 = vpop.eup %2452  ;;  %v1158_v35 = vmul.f32 1.442695, %v3296_v45  ;;  %vm1140_vm5 = vcmp.gt.f32.partialorder %v3296_v45, 20.0 }
 0x233   : >> { %v2455_v48 = vpop.eup %2454  ;;  %v1195_v11 = vadd.f32 1.0, %v2453_v41  ;;  %v1198_v26 = vmul.f32 -0.5, %v2453_v41  ;;  %v1201_v57 = vand.u32 2147483647, %v2453_v41 }
 0x234   : >> { %2456 = vpow2.f32 %v1158_v35  ;;  %v1188_v52 = vmul.f32 0.6931472, %v2455_v48 }
 0x235   : >> { %2458 = vlog2.f32 %v1195_v11  ;;  %v1199_v61 = vadd.f32 1.0, %v1198_v26  ;;  %vm1202_vm2 = vcmp.lt.f32.partialorder %v1201_v57, 0.0004427343 }
 0x236   : >> { %v1194_v22 = vsel %vm1193_vm0, %v1191_v24, %v1188_v52 }
 0x237   : >> { %v1105_v55 = vpop.f32.mrf.mxu2  ;;  %v1200_v10 = vmul.f32 %v2453_v41, %v1199_v61  ;;  %v1330_v5 = vsel %vm1138_vm1, %v1099_v42, %v1194_v22 }
 0x238   : >> { %v1106_v25 = vadd.f32 %v3291_v40, %v1105_v55  ;;  %v3304_v23 = vadd.f32 %v1330_v5, %v3192_v12 }
 0x23a   : >> { %v2457_v62 = vpop.eup %2456  ;;  %v1160_v60 = vmul.f32 1.442695, %v1106_v25  ;;  %vm1141_vm7 = vcmp.gt.f32.partialorder %v1106_v25, 20.0 }
 0x23b   : >> { %v2459_v49 = vpop.eup %2458  ;;  %v1204_v63 = vadd.f32 1.0, %v2457_v62  ;;  %v1207_v8 = vmul.f32 -0.5, %v2457_v62  ;;  %v1210_v36 = vand.u32 2147483647, %v2457_v62 }
 0x23c   : >> { %v1197_v2 = vmul.f32 0.6931472, %v2459_v49  ;;  %2460 = vpow2.f32 %v1160_v60 }
 0x23d   : >> { %2462 = vlog2.f32 %v1204_v63  ;;  %v1208_v6 = vadd.f32 1.0, %v1207_v8  ;;  %vm1211_vm4 = vcmp.lt.f32.partialorder %v1210_v36, 0.0004427343 }
 0x23e   : >> { %v1203_v1 = vsel %vm1202_vm2, %v1200_v10, %v1197_v2 }
 0x23f   : >> { %v1331_v0 = vsel %vm1139_vm3, %v1101_v9, %v1203_v1  ;;  %v1108_v21 = vpop.f32.mrf.mxu2  ;;  %v1209_v33 = vmul.f32 %v2457_v62, %v1208_v6 }
 0x240   : >> { %v3301_v7 = vadd.f32 %v3291_v40, %v1108_v21  ;;  %v3307_v56 = vadd.f32 %v1331_v0, %v3195_v29 }
 0x242   : >> { %v2461_v14 = vpop.eup %2460  ;;  %v1162_v53 = vmul.f32 1.442695, %v3301_v7  ;;  %v1362_v31 = vpack.c.bf16 %v3307_v56, %v3304_v23  ;;  %vm1142_vm9 = vcmp.gt.f32.partialorder %v3301_v7, 20.0 }
 0x243   : >> { %v2463_v19 = vpop.eup %2462  ;;  %v1213_v38 = vadd.f32 1.0, %v2461_v14  ;;  %v1216_v4 = vmul.f32 -0.5, %v2461_v14  ;;  %v1219_v13 = vand.u32 2147483647, %v2461_v14 }
 0x244   : >> { %2464 = vpow2.f32 %v1162_v53  ;;  %1445 = vmatmul.bf16.vlgmr.msrb.gmra.mxu3 %v1362_v31  ;;  %v1206_v12 = vmul.f32 0.6931472, %v2463_v19 }
 0x245   : >> { %2466 = vlog2.f32 %v1213_v38  ;;  %v1217_v43 = vadd.f32 1.0, %v1216_v4  ;;  %vm1220_vm6 = vcmp.lt.f32.partialorder %v1219_v13, 0.0004427343 }
 0x246   : >> { %v1212_v44 = vsel %vm1211_vm4, %v1209_v33, %v1206_v12 }
 0x247   : >> { %v1110_v42 = vpop.f32.mrf.mxu2  ;;  %v1218_v41 = vmul.f32 %v2461_v14, %v1217_v43  ;;  %v1332_v35 = vsel %vm1140_vm5, %v3296_v45, %v1212_v44 }
 0x248   : >> { %v1111_v29 = vadd.f32 %v3291_v40, %v1110_v42  ;;  %v3319_v30 = vadd.f32 %v1332_v35, %v3207_v58 }
 0x24a   : >> { %v2465_v9 = vpop.eup %2464  ;;  %v1164_v27 = vmul.f32 1.442695, %v1111_v29  ;;  %vm1143_vm11 = vcmp.gt.f32.partialorder %v1111_v29, 20.0 }
 0x24b   : >> { %v2467_v46 = vpop.eup %2466  ;;  %v1222_v37 = vadd.f32 1.0, %v2465_v9  ;;  %v1225_v55 = vmul.f32 -0.5, %v2465_v9  ;;  %v1228_v60 = vand.u32 2147483647, %v2465_v9 }
 0x24c   : >> { %2468 = vpow2.f32 %v1164_v27  ;;  %v1215_v15 = vmul.f32 0.6931472, %v2467_v46 }
 0x24d   : >> { %2470 = vlog2.f32 %v1222_v37  ;;  %vm1229_vm8 = vcmp.lt.f32.partialorder %v1228_v60, 0.0004427343 }
 0x24e   : >> { %v1221_v48 = vsel %vm1220_vm6, %v1218_v41, %v1215_v15 }
 0x24f   : >> { %v1113_v11 = vpop.f32.mrf.mxu2  ;;  %v1333_v3 = vsel %vm1141_vm7, %v1106_v25, %v1221_v48  ;;  %v1226_v25 = vadd.f32 1.0, %v1225_v55 }
 0x250   : >> { %v3316_v26 = vadd.f32 %v3291_v40, %v1113_v11  ;;  %v3322_v52 = vadd.f32 %v1333_v3, %v3210_v59 }
 0x251   : >> { %v1227_v63 = vmul.f32 %v2465_v9, %v1226_v25 }
 0x252   : >> { %v2469_v24 = vpop.eup %2468  ;;  %v1166_v61 = vmul.f32 1.442695, %v3316_v26  ;;  %v1363_v45 = vpack.c.bf16 %v3322_v52, %v3319_v30  ;;  %vm1144_vm13 = vcmp.gt.f32.partialorder %v3316_v26, 20.0 }
 0x253   : >> { %v2471_v57 = vpop.eup %2470  ;;  %v1231_v62 = vadd.f32 1.0, %v2469_v24  ;;  %v1234_v22 = vmul.f32 -0.5, %v2469_v24  ;;  %v1237_v10 = vand.u32 2147483647, %v2469_v24 }
 0x254   : >> { %2472 = vpow2.f32 %v1166_v61  ;;  %1450 = vmatmul.bf16.gmra.mxu3 %v1363_v45  ;;  %v1224_v58 = vmul.f32 0.6931472, %v2471_v57 }
 0x255   : >> { %2474 = vlog2.f32 %v1231_v62  ;;  %v1235_v2 = vadd.f32 1.0, %v1234_v22  ;;  %vm1238_vm10 = vcmp.lt.f32.partialorder %v1237_v10, 0.0004427343 }
 0x256   : >> { %v1230_v0 = vsel %vm1229_vm8, %v1227_v63, %v1224_v58 }
 0x257   : >> { %v1115_v49 = vpop.f32.mrf.mxu2  ;;  %v1236_v53 = vmul.f32 %v2469_v24, %v1235_v2  ;;  %v1334_v31 = vsel %vm1142_vm9, %v3301_v7, %v1230_v0 }
 0x258   : >> { %v1116_v59 = vadd.f32 %v3291_v40, %v1115_v49  ;;  %v3334_v36 = vadd.f32 %v1334_v31, %v3222_v39 }
 0x25a   : >> { %v2473_v5 = vpop.eup %2472  ;;  %v1168_v1 = vmul.f32 1.442695, %v1116_v59  ;;  %vm1145_vm15 = vcmp.gt.f32.partialorder %v1116_v59, 20.0 }
 0x25b   : >> { %v2475_v21 = vpop.eup %2474  ;;  %v1240_v8 = vadd.f32 1.0, %v2473_v5  ;;  %v1243_v42 = vmul.f32 -0.5, %v2473_v5  ;;  %v1246_v44 = vand.u32 2147483647, %v2473_v5 }
 0x25c   : >> { %2476 = vpow2.f32 %v1168_v1  ;;  %v1233_v14 = vmul.f32 0.6931472, %v2475_v21 }
 0x25d   : >> { %2478 = vlog2.f32 %v1240_v8  ;;  %vm1247_vm12 = vcmp.lt.f32.partialorder %v1246_v44, 0.0004427343 }
 0x25e   : >> { %v1239_v19 = vsel %vm1238_vm10, %v1236_v53, %v1233_v14 }
 0x25f   : >> { %v1118_v38 = vpop.f32.mrf.mxu2  ;;  %v1335_v6 = vsel %vm1143_vm11, %v1111_v29, %v1239_v19  ;;  %v1244_v29 = vadd.f32 1.0, %v1243_v42 }
 0x260   : >> { %v3331_v4 = vadd.f32 %v3291_v40, %v1118_v38  ;;  %v3337_v12 = vadd.f32 %v1335_v6, %v3225_v34 }
 0x261   : >> { %v1245_v37 = vmul.f32 %v2473_v5, %v1244_v29 }
 0x262   : >> { %v2477_v33 = vpop.eup %2476  ;;  %v1170_v43 = vmul.f32 1.442695, %v3331_v4  ;;  %v1364_v7 = vpack.c.bf16 %v3337_v12, %v3334_v36  ;;  %vm1146_vm1 = vcmp.gt.f32.partialorder %v3331_v4, 20.0 }
 0x263   : >> { %v2479_v13 = vpop.eup %2478  ;;  %v1249_v9 = vadd.f32 1.0, %v2477_v33  ;;  %v1252_v27 = vmul.f32 -0.5, %v2477_v33  ;;  %v1255_v41 = vand.u32 2147483647, %v2477_v33 }
 0x264   : >> { %2480 = vpow2.f32 %v1170_v43  ;;  %1455 = vmatmul.bf16.gmra.mxu3 %v1364_v7  ;;  %v1242_v39 = vmul.f32 0.6931472, %v2479_v13 }
 0x265   : >> { %2482 = vlog2.f32 %v1249_v9  ;;  %v1253_v15 = vadd.f32 1.0, %v1252_v27  ;;  %vm1256_vm14 = vcmp.lt.f32.partialorder %v1255_v41, 0.0004427343 }
 0x266   : >> { %v1248_v11 = vsel %vm1247_vm12, %v1245_v37, %v1242_v39 }
 0x267   : >> { %v1120_v46 = vpop.f32.mrf.mxu2  ;;  %v1254_v61 = vmul.f32 %v2477_v33, %v1253_v15  ;;  %v1336_v45 = vsel %vm1144_vm13, %v3316_v26, %v1248_v11 }
 0x268   : >> { %v1121_v34 = vadd.f32 %v3291_v40, %v1120_v46  ;;  %v3349_v60 = vadd.f32 %v1336_v45, %v3237_v20 }
 0x26a   : >> { %v2481_v35 = vpop.eup %2480  ;;  %v1172_v48 = vmul.f32 1.442695, %v1121_v34  ;;  %vm1147_vm3 = vcmp.gt.f32.partialorder %v1121_v34, 20.0 }
 0x26b   : >> { %v2483_v3 = vpop.eup %2482  ;;  %v1258_v55 = vadd.f32 1.0, %v2481_v35  ;;  %v1261_v49 = vmul.f32 -0.5, %v2481_v35  ;;  %v1264_v0 = vand.u32 2147483647, %v2481_v35 }
 0x26c   : >> { %2484 = vpow2.f32 %v1172_v48  ;;  %v1251_v24 = vmul.f32 0.6931472, %v2483_v3 }
 0x26d   : >> { %2486 = vlog2.f32 %v1258_v55  ;;  %vm1265_vm0 = vcmp.lt.f32.partialorder %v1264_v0, 0.0004427343 }
 0x26e   : >> { %v1257_v57 = vsel %vm1256_vm14, %v1254_v61, %v1251_v24 }
 0x26f   : >> { %v1123_v62 = vpop.f32.mrf.mxu2  ;;  %v1337_v25 = vsel %vm1145_vm15, %v1116_v59, %v1257_v57  ;;  %v1262_v59 = vadd.f32 1.0, %v1261_v49 }
 0x270   : >> { %v3346_v22 = vadd.f32 %v3291_v40, %v1123_v62  ;;  %v3352_v58 = vadd.f32 %v1337_v25, %v3240_v16 }
 0x271   : >> { %v1263_v8 = vmul.f32 %v2481_v35, %v1262_v59 }
 0x272   : >> { %v2485_v63 = vpop.eup %2484  ;;  %v1174_v2 = vmul.f32 1.442695, %v3346_v22  ;;  %v1365_v26 = vpack.c.bf16 %v3352_v58, %v3349_v60  ;;  %vm1148_vm5 = vcmp.gt.f32.partialorder %v3346_v22, 20.0 }
 0x273   : >> { %v2487_v10 = vpop.eup %2486  ;;  %v1267_v5 = vadd.f32 1.0, %v2485_v63  ;;  %v1270_v1 = vmul.f32 -0.5, %v2485_v63  ;;  %v1273_v53 = vand.u32 2147483647, %v2485_v63 }
 0x274   : >> { %2488 = vpow2.f32 %v1174_v2  ;;  %1460 = vmatmul.bf16.gmra.mxu3 %v1365_v26  ;;  %v1260_v20 = vmul.f32 0.6931472, %v2487_v10 }
 0x275   : >> { %2490 = vlog2.f32 %v1267_v5  ;;  %v1271_v14 = vadd.f32 1.0, %v1270_v1  ;;  %vm1274_vm2 = vcmp.lt.f32.partialorder %v1273_v53, 0.0004427343 }
 0x276   : >> { %v1266_v38 = vsel %vm1265_vm0, %v1263_v8, %v1260_v20 }
 0x277   : >> { %v1125_v21 = vpop.f32.mrf.mxu2  ;;  %v1272_v43 = vmul.f32 %v2485_v63, %v1271_v14  ;;  %v1338_v7 = vsel %vm1146_vm1, %v3331_v4, %v1266_v38 }
 0x278   : >> { %v1126_v16 = vadd.f32 %v3291_v40, %v1125_v21  ;;  %v3364_v44 = vadd.f32 %v1338_v7, %v3252_v47 }
 0x27a   : >> { %v2489_v31 = vpop.eup %2488  ;;  %v1176_v19 = vmul.f32 1.442695, %v1126_v16  ;;  %vm1149_vm7 = vcmp.gt.f32.partialorder %v1126_v16, 20.0 }
 0x27b   : >> { %v2491_v6 = vpop.eup %2490  ;;  %v1276_v42 = vadd.f32 1.0, %v2489_v31  ;;  %v1279_v46 = vmul.f32 -0.5, %v2489_v31  ;;  %v1282_v11 = vand.u32 2147483647, %v2489_v31 }
 0x27c   : >> { %2492 = vpow2.f32 %v1176_v19  ;;  %v1269_v33 = vmul.f32 0.6931472, %v2491_v6 }
 0x27d   : >> { %2494 = vlog2.f32 %v1276_v42  ;;  %vm1283_vm4 = vcmp.lt.f32.partialorder %v1282_v11, 0.0004427343 }
 0x27e   : >> { %v1275_v13 = vsel %vm1274_vm2, %v1272_v43, %v1269_v33 }
 0x27f   : >> { %v1128_v9 = vpop.f32.mrf.mxu2  ;;  %v1339_v29 = vsel %vm1147_vm3, %v1121_v34, %v1275_v13  ;;  %v1280_v34 = vadd.f32 1.0, %v1279_v46 }
 0x280   : >> { %v3361_v27 = vadd.f32 %v3291_v40, %v1128_v9  ;;  %v3367_v39 = vadd.f32 %v1339_v29, %v3255_v50 }
 0x281   : >> { %v1281_v55 = vmul.f32 %v2489_v31, %v1280_v34 }
 0x282   : >> { %v2493_v37 = vpop.eup %2492  ;;  %v1178_v15 = vmul.f32 1.442695, %v3361_v27  ;;  %v1366_v4 = vpack.c.bf16 %v3367_v39, %v3364_v44  ;;  %vm1150_vm9 = vcmp.gt.f32.partialorder %v3361_v27, 20.0 }
 0x283   : >> { %v2495_v41 = vpop.eup %2494  ;;  %v1285_v35 = vadd.f32 1.0, %v2493_v37  ;;  %v1288_v48 = vmul.f32 -0.5, %v2493_v37  ;;  %v1291_v61 = vand.u32 2147483647, %v2493_v37 }
 0x284   : >> { %2496 = vpow2.f32 %v1178_v15  ;;  %1465 = vmatmul.bf16.gmra.mxu3 %v1366_v4  ;;  %v1278_v47 = vmul.f32 0.6931472, %v2495_v41 }
 0x285   : >> { %2498 = vlog2.f32 %v1285_v35  ;;  %v1289_v24 = vadd.f32 1.0, %v1288_v48  ;;  %vm1292_vm6 = vcmp.lt.f32.partialorder %v1291_v61, 0.0004427343 }
 0x286   : >> { %v1284_v62 = vsel %vm1283_vm4, %v1281_v55, %v1278_v47 }
 0x287   : >> { %v1130_v3 = vpop.f32.mrf.mxu2  ;;  %v1290_v2 = vmul.f32 %v2493_v37, %v1289_v24  ;;  %v1340_v26 = vsel %vm1148_vm5, %v3346_v22, %v1284_v62 }
 0x288   : >> { %v1131_v50 = vadd.f32 %v3291_v40, %v1130_v3  ;;  %v3377_v0 = vadd.f32 %v1340_v26, %v3265_v28  ;;  %v2200_v26 = vld [vmem:[#allocation8 + $0x38] sm:$0xff] }
 0x289   : >> { %1786 = vmatpush.bf16.msrb.mxu0 %v2200_v26 }
 0x28a   : >> { %v2497_v45 = vpop.eup %2496  ;;  %v1180_v57 = vmul.f32 1.442695, %v1131_v50  ;;  %vm1151_vm11 = vcmp.gt.f32.partialorder %v1131_v50, 20.0 }
 0x28b   : >> { %v2499_v25 = vpop.eup %2498  ;;  %v1294_v49 = vadd.f32 1.0, %v2497_v45  ;;  %v1297_v21 = vmul.f32 -0.5, %v2497_v45  ;;  %v1300_v38 = vand.u32 2147483647, %v2497_v45 }
 0x28c   : >> { %2500 = vpow2.f32 %v1180_v57  ;;  %v1287_v63 = vmul.f32 0.6931472, %v2499_v25 }
 0x28d   : >> { %2502 = vlog2.f32 %v1294_v49  ;;  %v1298_v19 = vadd.f32 1.0, %v1297_v21  ;;  %vm1301_vm8 = vcmp.lt.f32.partialorder %v1300_v38, 0.0004427343  ;;  %v2193_v38 = vld [vmem:[#allocation8] sm:$0xff] }
 0x28e   : >> { %v1293_v10 = vsel %vm1292_vm6, %v1290_v2, %v1287_v63 }
 0x28f   : >> { %v1133_v5 = vpop.f32.mrf.mxu2  ;;  %v1341_v59 = vsel %vm1149_vm7, %v1126_v16, %v1293_v10 }
 0x290   : >> { %v1134_v1 = vadd.f32 %v3291_v40, %v1133_v5  ;;  %v3380_v20 = vadd.f32 %v1341_v59, %v3268_v32  ;;  %v1299_v32 = vmul.f32 %v2497_v45, %v1298_v19 }
 0x292   : >> { %v2501_v8 = vpop.eup %2500  ;;  %v1182_v14 = vmul.f32 1.442695, %v1134_v1  ;;  %v1367_v53 = vpack.c.bf16 %v3380_v20, %v3377_v0  ;;  %vm1152_vm13 = vcmp.gt.f32.partialorder %v1134_v1, 20.0 }
 0x293   : >> { %v2503_v22 = vpop.eup %2502  ;;  %v1303_v31 = vadd.f32 1.0, %v2501_v8  ;;  %v1306_v16 = vmul.f32 -0.5, %v2501_v8  ;;  %v1309_v43 = vand.u32 2147483647, %v2501_v8 }
 0x294   : >> { %2504 = vpow2.f32 %v1182_v14  ;;  %1470 = vmatmul.bf16.gmra.mxu3 %v1367_v53  ;;  %v1296_v6 = vmul.f32 0.6931472, %v2503_v22  ;;  %v2198_v14 = vld [vmem:[#allocation8 + $0x28] sm:$0xff]  ;;  %v2196_v53 = vld [vmem:[#allocation8 + $0x18] sm:$0xff]  ;;  %v2195_v22 = vld [vmem:[#allocation8 + $0x10] sm:$0xff] }
 0x295   : >> { %2506 = vlog2.f32 %v1303_v31  ;;  %v1307_v33 = vadd.f32 1.0, %v1306_v16  ;;  %vm1310_vm10 = vcmp.lt.f32.partialorder %v1309_v43, 0.0004427343  ;;  %v3403_v31 = vld [vmem:[#allocation7 + $0x3] ss:$0 sm:$0xff] }
 0x296   : >> { %v1302_v9 = vsel %vm1301_vm8, %v1299_v32, %v1296_v6 }
 0x297   : >> { %v1135_v28 = vpop.f32.mrf.mxu2  ;;  %v1308_v15 = vmul.f32 %v2501_v8, %v1307_v33  ;;  %v1342_v4 = vsel %vm1150_vm9, %v3361_v27, %v1302_v9  ;;  %v2199_v8 = vld [vmem:[#allocation8 + $0x30] sm:$0xff] }
 0x298   : >> { %v1136_v42 = vadd.f32 %v3291_v40, %v1135_v28  ;;  %v3388_v35 = vadd.f32 %v1342_v4, %v3276_v54  ;;  %1787 = vmatpush.bf16.msrb.mxu0 %v2199_v8 }
 0x29a   : >> { %v2505_v7 = vpop.eup %2504  ;;  %v1184_v13 = vmul.f32 1.442695, %v1136_v42  ;;  %vm1153_vm15 = vcmp.gt.f32.partialorder %v1136_v42, 20.0 }
 0x29b   : >> { %v2507_v29 = vpop.eup %2506  ;;  %v1312_v46 = vadd.f32 1.0, %v2505_v7  ;;  %v1315_v48 = vmul.f32 -0.5, %v2505_v7  ;;  %v1318_v61 = vand.u32 2147483647, %v2505_v7 }
 0x29c   : >> { %2508 = vpow2.f32 %v1184_v13  ;;  %v1305_v37 = vmul.f32 0.6931472, %v2507_v29  ;;  %1788 = vmatpush.bf16.msrb.mxu0 %v2198_v14 }
 0x29d   : >> { %2510 = vlog2.f32 %v1312_v46  ;;  %v1316_v24 = vadd.f32 1.0, %v1315_v48  ;;  %vm1319_vm12 = vcmp.lt.f32.partialorder %v1318_v61, 0.0004427343 }
 0x29e   : >> { %v1311_v40 = vsel %vm1310_vm10, %v1308_v15, %v1305_v37 }
 0x29f   : >> { %v1343_v41 = vsel %vm1151_vm11, %v1131_v50, %v1311_v40  ;;  %v1317_v50 = vmul.f32 %v2505_v7, %v1316_v24 }
 0x2a0   : >> { %v3391_v34 = vadd.f32 %v1343_v41, %v3279_v51 }
 0x2a2   : >> { %v2509_v11 = vpop.eup %2508  ;;  %v1368_v47 = vpack.c.bf16 %v3391_v34, %v3388_v35 }
 0x2a3   : >> { %v2511_v3 = vpop.eup %2510  ;;  %v1321_v55 = vadd.f32 1.0, %v2509_v11  ;;  %v1324_v27 = vmul.f32 -0.5, %v2509_v11  ;;  %v1327_v54 = vand.u32 2147483647, %v2509_v11 }
 0x2a4   : >> { %1475 = vmatmul.bf16.gmra.mxu3 %v1368_v47  ;;  %v1314_v45 = vmul.f32 0.6931472, %v2511_v3 }
 0x2a5   : >> { %2512 = vlog2.f32 %v1321_v55  ;;  %v1325_v57 = vadd.f32 1.0, %v1324_v27  ;;  %vm1328_vm14 = vcmp.lt.f32.partialorder %v1327_v54, 0.0004427343 }
 0x2a6   : >> { %v1320_v62 = vsel %vm1319_vm12, %v1317_v50, %v1314_v45 }
 0x2a7   : >> { %v1326_v49 = vmul.f32 %v2509_v11, %v1325_v57  ;;  %v1344_v63 = vsel %vm1152_vm13, %v1134_v1, %v1320_v62  ;;  %v2197_v1 = vld [vmem:[#allocation8 + $0x20] sm:$0xff] }
 0x2a8   : >> { %v3396_v5 = vadd.f32 %v1344_v63, %v3284_v18  ;;  %1789 = vmatpush.bf16.msrb.mxu0 %v2197_v1  ;;  %v2194_v18 = vld [vmem:[#allocation8 + $0x8] sm:$0xff] }
 0x2ab   : >> { %v2513_v51 = vpop.eup %2512 }
 0x2ac   : >> { %v1323_v25 = vmul.f32 0.6931472, %v2513_v51  ;;  %1790 = vmatpush.bf16.msrb.mxu0 %v2196_v53 }
 0x2ae   : >> { %v1329_v2 = vsel %vm1328_vm14, %v1326_v49, %v1323_v25 }
 0x2af   : >> { %v1345_v10 = vsel %vm1153_vm15, %v1136_v42, %v1329_v2 }
 0x2b0   : >> { %v3399_v59 = vadd.f32 %v1345_v10, %v3287_v17  ;;  %1791 = vmatpush.bf16.msrb.mxu0 %v2195_v22 }
 0x2b2   : >> { %v1369_v21 = vpack.c.bf16 %v3399_v59, %v3396_v5 }
 0x2b4   : >> { %1480 = vmatmul.bf16.gmra.mxu3 %v1369_v21  ;;  %1792 = vmatpush.bf16.msrb.mxu0 %v2194_v18 }
 0x2b8   : >> { %1793 = vmatpush.bf16.msrb.mxu0 %v2193_v38 }
 0x2c7   : >> { %v1446_v17 = vpop.f32.mrf.mxu3 }
 0x2c8   : >> { %v1447_v19 = vadd.f32 %v3403_v31, %v1446_v17 }
 0x2ca   : >> { %v1502_v16 = vmul.f32 1.442695, %v1447_v19  ;;  %vm1486_vm1 = vcmp.gt.f32.partialorder %v1447_v19, 20.0 }
 0x2cc   : >> { %2514 = vpow2.f32 %v1502_v16 }
 0x2cf   : >> { %v1448_v6 = vpop.f32.mrf.mxu3 }
 0x2d0   : >> { %v1449_v28 = vadd.f32 %v3403_v31, %v1448_v6 }
 0x2d2   : >> { %v2515_v42 = vpop.eup %2514  ;;  %v1504_v32 = vmul.f32 1.442695, %v1449_v28  ;;  %vm1487_vm3 = vcmp.gt.f32.partialorder %v1449_v28, 20.0 }
 0x2d3   : >> { %v1534_v33 = vadd.f32 1.0, %v2515_v42  ;;  %v1537_v7 = vmul.f32 -0.5, %v2515_v42  ;;  %v1540_v40 = vand.u32 2147483647, %v2515_v42 }
 0x2d4   : >> { %2516 = vpow2.f32 %v1504_v32 }
 0x2d5   : >> { %2518 = vlog2.f32 %v1534_v33  ;;  %v1538_v15 = vadd.f32 1.0, %v1537_v7  ;;  %vm1541_vm0 = vcmp.lt.f32.partialorder %v1540_v40, 0.0004427343 }
 0x2d7   : >> { %v1451_v43 = vpop.f32.mrf.mxu3  ;;  %v1539_v11 = vmul.f32 %v2515_v42, %v1538_v15 }
 0x2d8   : >> { %v3408_v13 = vadd.f32 %v3403_v31, %v1451_v43 }
 0x2da   : >> { %v2517_v9 = vpop.eup %2516  ;;  %v1506_v29 = vmul.f32 1.442695, %v3408_v13  ;;  %vm1488_vm5 = vcmp.gt.f32.partialorder %v3408_v13, 20.0 }
 0x2db   : >> { %v2519_v46 = vpop.eup %2518  ;;  %v1543_v37 = vadd.f32 1.0, %v2517_v9  ;;  %v1546_v4 = vmul.f32 -0.5, %v2517_v9  ;;  %v1549_v55 = vand.u32 2147483647, %v2517_v9 }
 0x2dc   : >> { %2520 = vpow2.f32 %v1506_v29  ;;  %v1536_v41 = vmul.f32 0.6931472, %v2519_v46 }
 0x2dd   : >> { %2522 = vlog2.f32 %v1543_v37  ;;  %v1547_v47 = vadd.f32 1.0, %v1546_v4  ;;  %vm1550_vm2 = vcmp.lt.f32.partialorder %v1549_v55, 0.0004427343 }
 0x2de   : >> { %v1542_v27 = vsel %vm1541_vm0, %v1539_v11, %v1536_v41 }
 0x2df   : >> { %v1453_v48 = vpop.f32.mrf.mxu3  ;;  %v1548_v54 = vmul.f32 %v2517_v9, %v1547_v47  ;;  %v1678_v62 = vsel %vm1486_vm1, %v1447_v19, %v1542_v27 }
 0x2e0   : >> { %v1454_v3 = vadd.f32 %v3403_v31, %v1453_v48  ;;  %v1694_v2 = vadd.f32 %v1678_v62, %v3304_v23 }
 0x2e2   : >> { %v2521_v24 = vpop.eup %2520  ;;  %v1508_v61 = vmul.f32 1.442695, %v1454_v3  ;;  %vm1489_vm7 = vcmp.gt.f32.partialorder %v1454_v3, 20.0 }
 0x2e3   : >> { %v2523_v45 = vpop.eup %2522  ;;  %v1552_v50 = vadd.f32 1.0, %v2521_v24  ;;  %v1555_v10 = vmul.f32 -0.5, %v2521_v24  ;;  %v1558_v17 = vand.u32 2147483647, %v2521_v24 }
 0x2e4   : >> { %v1545_v57 = vmul.f32 0.6931472, %v2523_v45  ;;  %2524 = vpow2.f32 %v1508_v61 }
 0x2e5   : >> { %2526 = vlog2.f32 %v1552_v50  ;;  %v1556_v22 = vadd.f32 1.0, %v1555_v10  ;;  %vm1559_vm4 = vcmp.lt.f32.partialorder %v1558_v17, 0.0004427343 }
 0x2e6   : >> { %v1551_v51 = vsel %vm1550_vm2, %v1548_v54, %v1545_v57 }
 0x2e7   : >> { %v1679_v25 = vsel %vm1487_vm3, %v1449_v28, %v1551_v51  ;;  %v1456_v49 = vpop.f32.mrf.mxu3  ;;  %v1557_v23 = vmul.f32 %v2521_v24, %v1556_v22 }
 0x2e8   : >> { %v3413_v63 = vadd.f32 %v3403_v31, %v1456_v49  ;;  %v1695_v26 = vadd.f32 %v1679_v25, %v3307_v56 }
 0x2ea   : >> { %v2525_v21 = vpop.eup %2524  ;;  %v1510_v8 = vmul.f32 1.442695, %v3413_v63  ;;  %v1710_v14 = vpack.c.bf16 %v1695_v26, %v1694_v2  ;;  %vm1490_vm9 = vcmp.gt.f32.partialorder %v3413_v63, 20.0 }
 0x2eb   : >> { %v2527_v1 = vpop.eup %2526  ;;  %v1561_v53 = vadd.f32 1.0, %v2525_v21  ;;  %v1564_v18 = vmul.f32 -0.5, %v2525_v21  ;;  %v1567_v56 = vand.u32 2147483647, %v2525_v21 }
 0x2ec   : >> { %2528 = vpow2.f32 %v1510_v8  ;;  %1794 = vmatmul.bf16.vlgmr.msrb.gmra.mxu0 %v1710_v14  ;;  %v1554_v19 = vmul.f32 0.6931472, %v2527_v1 }
 0x2ed   : >> { %2530 = vlog2.f32 %v1561_v53  ;;  %v1565_v6 = vadd.f32 1.0, %v1564_v18  ;;  %vm1568_vm6 = vcmp.lt.f32.partialorder %v1567_v56, 0.0004427343 }
 0x2ee   : >> { %v1560_v32 = vsel %vm1559_vm4, %v1557_v23, %v1554_v19 }
 0x2ef   : >> { %v1458_v16 = vpop.f32.mrf.mxu3  ;;  %v1566_v9 = vmul.f32 %v2525_v21, %v1565_v6  ;;  %v1680_v29 = vsel %vm1488_vm5, %v3408_v13, %v1560_v32 }
 0x2f0   : >> { %v1459_v38 = vadd.f32 %v3403_v31, %v1458_v16  ;;  %v1696_v40 = vadd.f32 %v1680_v29, %v3319_v30 }
 0x2f2   : >> { %v2529_v28 = vpop.eup %2528  ;;  %v1512_v42 = vmul.f32 1.442695, %v1459_v38  ;;  %vm1491_vm11 = vcmp.gt.f32.partialorder %v1459_v38, 20.0 }
 0x2f3   : >> { %v2531_v33 = vpop.eup %2530  ;;  %v1570_v43 = vadd.f32 1.0, %v2529_v28  ;;  %v1573_v48 = vmul.f32 -0.5, %v2529_v28  ;;  %v1576_v45 = vand.u32 2147483647, %v2529_v28 }
 0x2f4   : >> { %2532 = vpow2.f32 %v1512_v42  ;;  %v1563_v7 = vmul.f32 0.6931472, %v2531_v33 }
 0x2f5   : >> { %2534 = vlog2.f32 %v1570_v43  ;;  %v1574_v13 = vadd.f32 1.0, %v1573_v48  ;;  %vm1577_vm8 = vcmp.lt.f32.partialorder %v1576_v45, 0.0004427343 }
 0x2f6   : >> { %v1569_v46 = vsel %vm1568_vm6, %v1566_v9, %v1563_v7 }
 0x2f7   : >> { %v1461_v37 = vpop.f32.mrf.mxu3  ;;  %v1681_v15 = vsel %vm1489_vm7, %v1454_v3, %v1569_v46  ;;  %v1575_v30 = vmul.f32 %v2529_v28, %v1574_v13 }
 0x2f8   : >> { %v3422_v4 = vadd.f32 %v3403_v31, %v1461_v37  ;;  %v1697_v41 = vadd.f32 %v1681_v15, %v3322_v52 }
 0x2fa   : >> { %v2533_v11 = vpop.eup %2532  ;;  %v1514_v47 = vmul.f32 1.442695, %v3422_v4  ;;  %v1711_v55 = vpack.c.bf16 %v1697_v41, %v1696_v40  ;;  %vm1492_vm13 = vcmp.gt.f32.partialorder %v3422_v4, 20.0 }
 0x2fb   : >> { %v2535_v24 = vpop.eup %2534  ;;  %v1579_v27 = vadd.f32 1.0, %v2533_v11  ;;  %v1582_v61 = vmul.f32 -0.5, %v2533_v11  ;;  %v1585_v52 = vand.u32 2147483647, %v2533_v11 }
 0x2fc   : >> { %2536 = vpow2.f32 %v1514_v47  ;;  %1799 = vmatmul.bf16.gmra.mxu0 %v1711_v55  ;;  %v1572_v3 = vmul.f32 0.6931472, %v2535_v24 }
 0x2fd   : >> { %2538 = vlog2.f32 %v1579_v27  ;;  %v1583_v54 = vadd.f32 1.0, %v1582_v61  ;;  %vm1586_vm10 = vcmp.lt.f32.partialorder %v1585_v52, 0.0004427343 }
 0x2fe   : >> { %v1578_v25 = vsel %vm1577_vm8, %v1575_v30, %v1572_v3 }
 0x2ff   : >> { %v1463_v50 = vpop.f32.mrf.mxu3  ;;  %v1584_v10 = vmul.f32 %v2533_v11, %v1583_v54  ;;  %v1682_v21 = vsel %vm1490_vm9, %v3413_v63, %v1578_v25 }
 0x300   : >> { %v1464_v57 = vadd.f32 %v3403_v31, %v1463_v50  ;;  %v1698_v22 = vadd.f32 %v1682_v21, %v3334_v36 }
 0x302   : >> { %v2537_v62 = vpop.eup %2536  ;;  %v1516_v51 = vmul.f32 1.442695, %v1464_v57  ;;  %vm1493_vm15 = vcmp.gt.f32.partialorder %v1464_v57, 20.0 }
 0x303   : >> { %v2539_v49 = vpop.eup %2538  ;;  %v1588_v2 = vadd.f32 1.0, %v2537_v62  ;;  %v1591_v17 = vmul.f32 -0.5, %v2537_v62  ;;  %v1594_v42 = vand.u32 2147483647, %v2537_v62 }
 0x304   : >> { %2540 = vpow2.f32 %v1516_v51  ;;  %v1581_v26 = vmul.f32 0.6931472, %v2539_v49 }
 0x305   : >> { %2542 = vlog2.f32 %v1588_v2  ;;  %v1592_v63 = vadd.f32 1.0, %v1591_v17  ;;  %vm1595_vm12 = vcmp.lt.f32.partialorder %v1594_v42, 0.0004427343 }
 0x306   : >> { %v1587_v8 = vsel %vm1586_vm10, %v1584_v10, %v1581_v26 }
 0x307   : >> { %v1466_v14 = vpop.f32.mrf.mxu3  ;;  %v1683_v1 = vsel %vm1491_vm11, %v1459_v38, %v1587_v8  ;;  %v1593_v36 = vmul.f32 %v2537_v62, %v1592_v63 }
 0x308   : >> { %v3431_v53 = vadd.f32 %v3403_v31, %v1466_v14  ;;  %v1699_v18 = vadd.f32 %v1683_v1, %v3337_v12 }
 0x30a   : >> { %v2541_v19 = vpop.eup %2540  ;;  %v1518_v16 = vmul.f32 1.442695, %v3431_v53  ;;  %v1712_v23 = vpack.c.bf16 %v1699_v18, %v1698_v22  ;;  %vm1494_vm1 = vcmp.gt.f32.partialorder %v3431_v53, 20.0 }
 0x30b   : >> { %v2543_v6 = vpop.eup %2542  ;;  %v1597_v56 = vadd.f32 1.0, %v2541_v19  ;;  %v1600_v28 = vmul.f32 -0.5, %v2541_v19  ;;  %v1603_v12 = vand.u32 2147483647, %v2541_v19 }
 0x30c   : >> { %2544 = vpow2.f32 %v1518_v16  ;;  %1804 = vmatmul.bf16.gmra.mxu0 %v1712_v23  ;;  %v1590_v38 = vmul.f32 0.6931472, %v2543_v6 }
 0x30d   : >> { %2546 = vlog2.f32 %v1597_v56  ;;  %v1601_v43 = vadd.f32 1.0, %v1600_v28  ;;  %vm1604_vm14 = vcmp.lt.f32.partialorder %v1603_v12, 0.0004427343 }
 0x30e   : >> { %v1596_v29 = vsel %vm1595_vm12, %v1593_v36, %v1590_v38 }
 0x30f   : >> { %v1468_v32 = vpop.f32.mrf.mxu3  ;;  %v1602_v40 = vmul.f32 %v2541_v19, %v1601_v43  ;;  %v1684_v41 = vsel %vm1492_vm13, %v3422_v4, %v1596_v29 }
 0x310   : >> { %v1469_v33 = vadd.f32 %v3403_v31, %v1468_v32  ;;  %v1700_v24 = vadd.f32 %v1684_v41, %v3349_v60 }
 0x312   : >> { %v2545_v7 = vpop.eup %2544  ;;  %v1520_v9 = vmul.f32 1.442695, %v1469_v33  ;;  %vm1495_vm3 = vcmp.gt.f32.partialorder %v1469_v33, 20.0 }
 0x313   : >> { %v2547_v46 = vpop.eup %2546  ;;  %v1606_v37 = vadd.f32 1.0, %v2545_v7  ;;  %v1609_v13 = vmul.f32 -0.5, %v2545_v7  ;;  %v1612_v52 = vand.u32 2147483647, %v2545_v7 }
 0x314   : >> { %2548 = vpow2.f32 %v1520_v9  ;;  %v1599_v15 = vmul.f32 0.6931472, %v2547_v46 }
 0x315   : >> { %2550 = vlog2.f32 %v1606_v37  ;;  %v1610_v4 = vadd.f32 1.0, %v1609_v13  ;;  %vm1613_vm0 = vcmp.lt.f32.partialorder %v1612_v52, 0.0004427343 }
 0x316   : >> { %v1605_v48 = vsel %vm1604_vm14, %v1602_v40, %v1599_v15 }
 0x317   : >> { %v1471_v11 = vpop.f32.mrf.mxu3  ;;  %v1685_v47 = vsel %vm1493_vm15, %v1464_v57, %v1605_v48  ;;  %v1611_v60 = vmul.f32 %v2545_v7, %v1610_v4 }
 0x318   : >> { %v3440_v55 = vadd.f32 %v3403_v31, %v1471_v11  ;;  %v1701_v27 = vadd.f32 %v1685_v47, %v3352_v58 }
 0x31a   : >> { %v2549_v61 = vpop.eup %2548  ;;  %v1522_v45 = vmul.f32 1.442695, %v3440_v55  ;;  %v1713_v3 = vpack.c.bf16 %v1701_v27, %v1700_v24  ;;  %vm1496_vm5 = vcmp.gt.f32.partialorder %v3440_v55, 20.0 }
 0x31b   : >> { %v2551_v50 = vpop.eup %2550  ;;  %v1615_v30 = vadd.f32 1.0, %v2549_v61  ;;  %v1618_v54 = vmul.f32 -0.5, %v2549_v61  ;;  %v1621_v58 = vand.u32 2147483647, %v2549_v61 }
 0x31c   : >> { %2552 = vpow2.f32 %v1522_v45  ;;  %1809 = vmatmul.bf16.gmra.mxu0 %v1713_v3  ;;  %v1608_v57 = vmul.f32 0.6931472, %v2551_v50 }
 0x31d   : >> { %2554 = vlog2.f32 %v1615_v30  ;;  %v1619_v25 = vadd.f32 1.0, %v1618_v54  ;;  %vm1622_vm2 = vcmp.lt.f32.partialorder %v1621_v58, 0.0004427343 }
 0x31e   : >> { %v1614_v26 = vsel %vm1613_vm0, %v1611_v60, %v1608_v57 }
 0x31f   : >> { %v1473_v62 = vpop.f32.mrf.mxu3  ;;  %v1620_v14 = vmul.f32 %v2549_v61, %v1619_v25  ;;  %v1686_v1 = vsel %vm1494_vm1, %v3431_v53, %v1614_v26 }
 0x320   : >> { %v1474_v51 = vadd.f32 %v3403_v31, %v1473_v62  ;;  %v1702_v16 = vadd.f32 %v1686_v1, %v3364_v44 }
 0x322   : >> { %v2553_v49 = vpop.eup %2552  ;;  %v1524_v2 = vmul.f32 1.442695, %v1474_v51  ;;  %vm1497_vm7 = vcmp.gt.f32.partialorder %v1474_v51, 20.0 }
 0x323   : >> { %v2555_v10 = vpop.eup %2554  ;;  %v1624_v21 = vadd.f32 1.0, %v2553_v49  ;;  %v1627_v6 = vmul.f32 -0.5, %v2553_v49  ;;  %v1630_v36 = vand.u32 2147483647, %v2553_v49 }
 0x324   : >> { %2556 = vpow2.f32 %v1524_v2  ;;  %v1617_v8 = vmul.f32 0.6931472, %v2555_v10 }
 0x325   : >> { %2558 = vlog2.f32 %v1624_v21  ;;  %v1628_v53 = vadd.f32 1.0, %v1627_v6  ;;  %vm1631_vm4 = vcmp.lt.f32.partialorder %v1630_v36, 0.0004427343 }
 0x326   : >> { %v1623_v22 = vsel %vm1622_vm2, %v1620_v14, %v1617_v8 }
 0x327   : >> { %v1476_v18 = vpop.f32.mrf.mxu3  ;;  %v1687_v17 = vsel %vm1495_vm3, %v1469_v33, %v1623_v22  ;;  %v1629_v44 = vmul.f32 %v2553_v49, %v1628_v53 }
 0x328   : >> { %v3449_v19 = vadd.f32 %v3403_v31, %v1476_v18  ;;  %v1703_v23 = vadd.f32 %v1687_v17, %v3367_v39 }
 0x32a   : >> { %v2557_v56 = vpop.eup %2556  ;;  %v1526_v63 = vmul.f32 1.442695, %v3449_v19  ;;  %v1714_v28 = vpack.c.bf16 %v1703_v23, %v1702_v16  ;;  %vm1498_vm9 = vcmp.gt.f32.partialorder %v3449_v19, 20.0 }
 0x32b   : >> { %v2559_v42 = vpop.eup %2558  ;;  %v1633_v38 = vadd.f32 1.0, %v2557_v56  ;;  %v1636_v32 = vmul.f32 -0.5, %v2557_v56  ;;  %v1639_v39 = vand.u32 2147483647, %v2557_v56 }
 0x32c   : >> { %2560 = vpow2.f32 %v1526_v63  ;;  %1814 = vmatmul.bf16.gmra.mxu0 %v1714_v28  ;;  %v1626_v33 = vmul.f32 0.6931472, %v2559_v42 }
 0x32d   : >> { %2562 = vlog2.f32 %v1633_v38  ;;  %v1637_v7 = vadd.f32 1.0, %v1636_v32  ;;  %vm1640_vm6 = vcmp.lt.f32.partialorder %v1639_v39, 0.0004427343 }
 0x32e   : >> { %v1632_v46 = vsel %vm1631_vm4, %v1629_v44, %v1626_v33 }
 0x32f   : >> { %v1478_v43 = vpop.f32.mrf.mxu3  ;;  %v1638_v41 = vmul.f32 %v2557_v56, %v1637_v7  ;;  %v1688_v48 = vsel %vm1496_vm5, %v3440_v55, %v1632_v46 }
 0x330   : >> { %v1479_v12 = vadd.f32 %v3403_v31, %v1478_v43  ;;  %v1704_v13 = vadd.f32 %v1688_v48, %v3377_v0 }
 0x332   : >> { %v2561_v9 = vpop.eup %2560  ;;  %v1528_v29 = vmul.f32 1.442695, %v1479_v12  ;;  %vm1499_vm11 = vcmp.gt.f32.partialorder %v1479_v12, 20.0 }
 0x333   : >> { %v2563_v37 = vpop.eup %2562  ;;  %v1642_v15 = vadd.f32 1.0, %v2561_v9  ;;  %v1645_v45 = vmul.f32 -0.5, %v2561_v9  ;;  %v1648_v57 = vand.u32 2147483647, %v2561_v9 }
 0x334   : >> { %2564 = vpow2.f32 %v1528_v29  ;;  %v1635_v40 = vmul.f32 0.6931472, %v2563_v37  ;;  %v2321_v29 = vld [vmem:[%s3532_s4] ss:$0 sm:$0xff] }
 0x335   : >> { %2566 = vlog2.f32 %v1642_v15  ;;  %v1646_v55 = vadd.f32 1.0, %v1645_v45  ;;  %vm1649_vm8 = vcmp.lt.f32.partialorder %v1648_v57, 0.0004427343 }
 0x336   : >> { %v1641_v11 = vsel %vm1640_vm6, %v1638_v41, %v1635_v40 }
 0x337   : >> { %v1481_v47 = vpop.f32.mrf.mxu3  ;;  %v1689_v24 = vsel %vm1497_vm7, %v1474_v51, %v1641_v11  ;;  %v1647_v25 = vmul.f32 %v2561_v9, %v1646_v55 }
 0x338   : >> { %v1482_v27 = vadd.f32 %v3403_v31, %v1481_v47  ;;  %v1705_v61 = vadd.f32 %v1689_v24, %v3380_v20 }
 0x33a   : >> { %v2565_v3 = vpop.eup %2564  ;;  %v1530_v50 = vmul.f32 1.442695, %v1482_v27  ;;  %v1715_v30 = vpack.c.bf16 %v1705_v61, %v1704_v13  ;;  %vm1500_vm13 = vcmp.gt.f32.partialorder %v1482_v27, 20.0 }
 0x33b   : >> { %v2567_v4 = vpop.eup %2566  ;;  %v1651_v54 = vadd.f32 1.0, %v2565_v3  ;;  %v1654_v52 = vmul.f32 -0.5, %v2565_v3  ;;  %v1657_v20 = vand.u32 2147483647, %v2565_v3 }
 0x33c   : >> { %2568 = vpow2.f32 %v1530_v50  ;;  %1819 = vmatmul.bf16.gmra.mxu0 %v1715_v30  ;;  %v1644_v62 = vmul.f32 0.6931472, %v2567_v4 }
 0x33d   : >> { %2570 = vlog2.f32 %v1651_v54  ;;  %v1655_v0 = vadd.f32 1.0, %v1654_v52  ;;  %vm1658_vm10 = vcmp.lt.f32.partialorder %v1657_v20, 0.0004427343 }
 0x33e   : >> { %v1650_v2 = vsel %vm1649_vm8, %v1647_v25, %v1644_v62 }
 0x33f   : >> { %v1483_v51 = vpop.f32.mrf.mxu3  ;;  %v1656_v8 = vmul.f32 %v2565_v3, %v1655_v0  ;;  %v1690_v14 = vsel %vm1498_vm9, %v3449_v19, %v1650_v2 }
 0x340   : >> { %v1484_v60 = vadd.f32 %v3403_v31, %v1483_v51  ;;  %v1706_v22 = vadd.f32 %v1690_v14, %v3388_v35 }
 0x342   : >> { %v2569_v58 = vpop.eup %2568  ;;  %v1532_v49 = vmul.f32 1.442695, %v1484_v60  ;;  %vm1501_vm15 = vcmp.gt.f32.partialorder %v1484_v60, 20.0 }
 0x343   : >> { %v2571_v26 = vpop.eup %2570  ;;  %v1660_v10 = vadd.f32 1.0, %v2569_v58  ;;  %v1663_v17 = vmul.f32 -0.5, %v2569_v58  ;;  %v1666_v42 = vand.u32 2147483647, %v2569_v58 }
 0x344   : >> { %2572 = vpow2.f32 %v1532_v49  ;;  %v1653_v21 = vmul.f32 0.6931472, %v2571_v26 }
 0x345   : >> { %2574 = vlog2.f32 %v1660_v10  ;;  %v1664_v63 = vadd.f32 1.0, %v1663_v17  ;;  %vm1667_vm12 = vcmp.lt.f32.partialorder %v1666_v42, 0.0004427343 }
 0x346   : >> { %v1659_v31 = vsel %vm1658_vm10, %v1656_v8, %v1653_v21 }
 0x347   : >> { %v1691_v1 = vsel %vm1499_vm11, %v1479_v12, %v1659_v31  ;;  %v1665_v19 = vmul.f32 %v2569_v58, %v1664_v63 }
 0x348   : >> { %v1707_v18 = vadd.f32 %v1691_v1, %v3391_v34 }
 0x34a   : >> { %v2573_v16 = vpop.eup %2572  ;;  %v1716_v23 = vpack.c.bf16 %v1707_v18, %v1706_v22 }
 0x34b   : >> { %v2575_v6 = vpop.eup %2574  ;;  %v1669_v56 = vadd.f32 1.0, %v2573_v16  ;;  %v1672_v28 = vmul.f32 -0.5, %v2573_v16  ;;  %v1675_v32 = vand.u32 2147483647, %v2573_v16 }
 0x34c   : >> { %1824 = vmatmul.bf16.gmra.mxu0 %v1716_v23  ;;  %v1662_v38 = vmul.f32 0.6931472, %v2575_v6 }
 0x34d   : >> { %2576 = vlog2.f32 %v1669_v56  ;;  %v1673_v53 = vadd.f32 1.0, %v1672_v28  ;;  %vm1676_vm14 = vcmp.lt.f32.partialorder %v1675_v32, 0.0004427343 }
 0x34e   : >> { %v1668_v36 = vsel %vm1667_vm12, %v1665_v19, %v1662_v38 }
 0x34f   : >> { %v1674_v33 = vmul.f32 %v2573_v16, %v1673_v53  ;;  %v1692_v43 = vsel %vm1500_vm13, %v1482_v27, %v1668_v36 }
 0x350   : >> { %v1708_v7 = vadd.f32 %v1692_v43, %v3396_v5 }
 0x353   : >> { %v2577_v35 = vpop.eup %2576 }
 0x354   : >> { %v1671_v34 = vmul.f32 0.6931472, %v2577_v35 }
 0x356   : >> { %v1677_v12 = vsel %vm1676_vm14, %v1674_v33, %v1671_v34 }
 0x357   : >> { %v1693_v44 = vsel %vm1501_vm15, %v1484_v60, %v1677_v12 }
 0x358   : >> { %v1709_v39 = vadd.f32 %v1693_v44, %v3399_v59 }
 0x35a   : >> { %v1717_v9 = vpack.c.bf16 %v1709_v39, %v1708_v7 }
 0x35c   : >> { %1829 = vmatmul.bf16.gmra.mxu0 %v1717_v9 }
 0x369   : >> { %v1795_v46 = vpop.f32.mrf.mxu0 }
 0x36a   : >> { %v1796_v37 = vadd.f32 %v2321_v29, %v1795_v46 }
 0x36c   : >> { %1836 = vst [vmem:[%s3473_s10] sm:$0xff] %v1796_v37 }
 0x371   : >> { %v1797_v5 = vpop.f32.mrf.mxu0 }
 0x372   : >> { %v1798_v59 = vadd.f32 %v2321_v29, %v1797_v5 }
 0x374   : >> { %1837 = vst [vmem:[%s3473_s10 + $0x8] sm:$0xff] %v1798_v59 }
 0x379   : >> { %v1800_v15 = vpop.f32.mrf.mxu0 }
 0x37a   : >> { %v1801_v40 = vadd.f32 %v2321_v29, %v1800_v15 }
 0x37c   : >> { %1838 = vst [vmem:[%s3473_s10 + $0x10] sm:$0xff] %v1801_v40 }
 0x381   : >> { %v1802_v41 = vpop.f32.mrf.mxu0 }
 0x382   : >> { %v1803_v48 = vadd.f32 %v2321_v29, %v1802_v41 }
 0x384   : >> { %1839 = vst [vmem:[%s3473_s10 + $0x18] sm:$0xff] %v1803_v48 }
 0x389   : >> { %v1805_v11 = vpop.f32.mrf.mxu0 }
 0x38a   : >> { %v1806_v47 = vadd.f32 %v2321_v29, %v1805_v11 }
 0x38c   : >> { %1840 = vst [vmem:[%s3473_s10 + $0x20] sm:$0xff] %v1806_v47 }
 0x391   : >> { %v1807_v24 = vpop.f32.mrf.mxu0 }
 0x392   : >> { %v1808_v27 = vadd.f32 %v2321_v29, %v1807_v24 }
 0x394   : >> { %1841 = vst [vmem:[%s3473_s10 + $0x28] sm:$0xff] %v1808_v27 }
 0x399   : >> { %v1810_v13 = vpop.f32.mrf.mxu0 }
 0x39a   : >> { %v1811_v61 = vadd.f32 %v2321_v29, %v1810_v13 }
 0x39c   : >> { %1842 = vst [vmem:[%s3473_s10 + $0x30] sm:$0xff] %v1811_v61 }
 0x3a1   : >> { %v1812_v45 = vpop.f32.mrf.mxu0 }
 0x3a2   : >> { %v1813_v3 = vadd.f32 %v2321_v29, %v1812_v45 }
 0x3a4   : >> { %1843 = vst [vmem:[%s3473_s10 + $0x38] sm:$0xff] %v1813_v3 }
 0x3a9   : >> { %v1815_v50 = vpop.f32.mrf.mxu0 }
 0x3aa   : >> { %v1816_v30 = vadd.f32 %v2321_v29, %v1815_v50 }
 0x3ac   : >> { %1844 = vst [vmem:[%s3473_s10 + $0x40] sm:$0xff] %v1816_v30 }
 0x3b1   : >> { %v1817_v4 = vpop.f32.mrf.mxu0 }
 0x3b2   : >> { %v1818_v54 = vadd.f32 %v2321_v29, %v1817_v4 }
 0x3b4   : >> { %1845 = vst [vmem:[%s3473_s10 + $0x48] sm:$0xff] %v1818_v54 }
 0x3b9   : >> { %v1820_v55 = vpop.f32.mrf.mxu0 }
 0x3ba   : >> { %v1821_v52 = vadd.f32 %v2321_v29, %v1820_v55 }
 0x3bc   : >> { %1846 = vst [vmem:[%s3473_s10 + $0x50] sm:$0xff] %v1821_v52 }
 0x3c1   : >> { %v1822_v57 = vpop.f32.mrf.mxu0 }
 0x3c2   : >> { %v1823_v62 = vadd.f32 %v2321_v29, %v1822_v57 }
 0x3c4   : >> { %1847 = vst [vmem:[%s3473_s10 + $0x58] sm:$0xff] %v1823_v62 }
 0x3c9   : >> { %v1825_v51 = vpop.f32.mrf.mxu0 }
 0x3ca   : >> { %v1826_v60 = vadd.f32 %v2321_v29, %v1825_v51 }
 0x3cc   : >> { %1848 = vst [vmem:[%s3473_s10 + $0x60] sm:$0xff] %v1826_v60 }
 0x3d1   : >> { %v1827_v25 = vpop.f32.mrf.mxu0 }
 0x3d2   : >> { %v1828_v0 = vadd.f32 %v2321_v29, %v1827_v25 }
 0x3d4   : >> { %1849 = vst [vmem:[%s3473_s10 + $0x68] sm:$0xff] %v1828_v0 }
 0x3d9   : >> { %v1830_v20 = vpop.f32.mrf.mxu0 }
 0x3da   : >> { %v1831_v58 = vadd.f32 %v2321_v29, %v1830_v20 }
 0x3dc   : >> { %1850 = vst [vmem:[%s3473_s10 + $0x70] sm:$0xff] %v1831_v58 }
 0x3e0   : > { %299 = sbr.rel (!%p297_p1) target bundleno = 56 (0x38), region = 109 }
 0x3e1   : >> { %v1832_v49 = vpop.f32.mrf.mxu0 }
 0x3e2   : >> { %v1833_v2 = vadd.f32 %v2321_v29, %v1832_v49 }
 0x3e4   : >> { %1851 = vst [vmem:[%s3473_s10 + $0x78] sm:$0xff] %v1833_v2 }
 0x3e5   : > { %2725 = shalt.err (!%p2722_p12)
}
 0x3e6   : > { %s2789_s15 = smov 128   ;;  %s2790_s29 = smov 8  }
 0x3e7   : > { %2240 = dma.vmem_to_hbm [thread:$0]  (%p2904_p7), %s1866_s12, 4096, %s1868_s30, %s1853_s26, %s2789_s15, %s2789_s15, %s2790_s29  }
 0x3e8 PF: > { %s1882_s10 = sand.u32 1, %s2764_s18   ;;  %p3540_p13 = scmp.ge.s32.totalorder %s2776_s21, 2 }
 0x3e9   : > { %s1883_s7 = scalar_lea.sflag [#allocation4], %s1882_s10 }
 0x3ea   : > { %p2257_p0 = pnand %p3540_p13, %p2856_p6 }
 0x3ec   : > { %p2258_p3 = pneg %p2257_p0 }
 0x3ee   : > { %2759 = dma.done.wait (%p2258_p3), %s1883_s7, 4096  }
 0x3ef   : > { %2761 = vsyncadd (%p2258_p3), %s1883_s7, 4294963200  ;;  %p20_p5 = scmp.ge.s32.totalorder %s2888_s27, 4   ;;  %s3541_s18 = smov %s2768_s19 }
 0x3f0   : > { %s3542_s19 = smov %s2772_s20  ;;  %s3543_s20 = smov %s2900_s6 }
 0x3f1   : > { %s3544_s21 = smov %s2888_s27  ;;  %22 = sbr.rel (!%p20_p5) target bundleno = 7 (0x7), region = 120 }
 0x3f6   :  { %1889 = vsyncpa [#allocation3], 1 }
 0x3f7   :  { %1891 = vsyncpa [#allocation3 + $0x1], 1 }
 0x3f8   :  { %1892 = vsyncpa [#allocation6], 1 }
 0x3f9   :  { %1893 = vsyncpa [#allocation9], 1 }
 0x3fa   :  { %1894 = vsyncpa [#allocation4], 1 }
 0x3fb   :  { %1896 = vsyncpa [#allocation4 + $0x1], 1 }

</bundles_post_ra>
